<compile_context>
chip_gen: v6e
topology: v6e:2x2x1
jax: 0.10.0
libtpu: 0.0.40
codegen_flags: <defaults>
</compile_context>

<pallas_src>
import jax
import jax.numpy as jnp
from jax.experimental import pallas as pl
from jax.experimental.pallas import tpu as pltpu

# ----------------------------- config (small, tile-friendly) ----------------
B = 2             # batch
C = 3             # image channels
H = W = 16        # spatial
P = 4             # patch size
NP = (H // P) * (W // P)     # 16 patches
PATCH_DIM = C * P * P        # 48
PATCH_PAD = 128              # zero-padded contraction dim (lane aligned)
D = 128           # hidden dim
D_FF = 512        # MLP hidden
T = 8             # text tokens
VOCAB = 64
D_PROJ = 128      # projection dim (BLIP-2 uses 256; kept lane-aligned here)
EPS = 1e-6

# Order in which (prepared) parameters are passed to the fused kernel.
PARAM_ORDER = (
    "patch_w", "patch_b", "vis_pos", "txt_pos",
    "vis_ln1_g", "vis_ln1_b", "vis_wqkv", "vis_wo",
    "vis_ln2_g", "vis_ln2_b", "vis_w1", "vis_b1", "vis_w2", "vis_b2",
    "txt_ln1_g", "txt_ln1_b", "txt_wqkv", "txt_wo",
    "txt_ln2_g", "txt_ln2_b", "txt_w1", "txt_b1", "txt_w2", "txt_b2",
    "vis_proj", "txt_proj",
    "mm_wq", "mm_wkv", "mm_wo",
    "final_ln_g", "final_ln_b",
)
N_PARAMS = len(PARAM_ORDER)


# ----------------------------- fused kernel ----------------------------------
def _vlm_fused_kernel(*refs):
    patches_ref, txt_ref = refs[0], refs[1]
    prm = dict(zip(PARAM_ORDER, refs[2:2 + N_PARAMS]))
    (img_ref, img_proj_ref, txt_out_ref, txt_proj_ref, mm_ref) = refs[2 + N_PARAMS:]

    scale = 1.0 / (D ** 0.5)

    def mxu(a, b):
        # bf16 operands on the MXU, f32 accumulation.
        return jnp.dot(a.astype(jnp.bfloat16), b.astype(jnp.bfloat16),
                       preferred_element_type=jnp.float32)

    def layernorm(x, g, b):
        mu = jnp.mean(x, axis=-1, keepdims=True)
        var = jnp.mean((x - mu) ** 2, axis=-1, keepdims=True)
        return (x - mu) * jax.lax.rsqrt(var + EPS) * g + b

    def softmax(s):
        s = s - jnp.max(s, axis=-1, keepdims=True)
        e = jnp.exp(s)
        return e * pl.reciprocal(jnp.sum(e, axis=-1, keepdims=True), approx=True)

    def attend(q, k, v, wo):
        # scores without an explicit transpose: contract dim 1 of both operands.
        s = jax.lax.dot_general(
            q.astype(jnp.bfloat16), k.astype(jnp.bfloat16),
            (((1,), (1,)), ((), ())),
            preferred_element_type=jnp.float32) * scale
        p = softmax(s)
        ctx = mxu(p, v)
        return mxu(ctx, wo)

    def block(x, pre):
        # pre-LN transformer block, residuals fused in.
        h = layernorm(x, prm[f"{pre}_ln1_g"][...], prm[f"{pre}_ln1_b"][...])
        qkv = mxu(h, prm[f"{pre}_wqkv"][...])              # (S, 3D)
        q, k, v = qkv[:, :D], qkv[:, D:2 * D], qkv[:, 2 * D:]
        x = x + attend(q, k, v, prm[f"{pre}_wo"][...])
        h2 = layernorm(x, prm[f"{pre}_ln2_g"][...], prm[f"{pre}_ln2_b"][...])
        ff = mxu(h2, prm[f"{pre}_w1"][...]) + prm[f"{pre}_b1"][...]
        ff = jax.nn.gelu(ff, approximate=True)
        return x + mxu(ff, prm[f"{pre}_w2"][...]) + prm[f"{pre}_b2"][...]

    def proj_norm(x, w):
        y = mxu(x, w)
        return y * jax.lax.rsqrt(jnp.sum(y * y, axis=-1, keepdims=True) + 1e-12)

    # ---- vision tower ----
    x = (mxu(patches_ref[0], prm["patch_w"][...])
         + prm["patch_b"][...] + prm["vis_pos"][...])
    x = block(x, "vis")
    img_ref[0] = x.astype(img_ref.dtype)
    img_proj_ref[0] = proj_norm(x, prm["vis_proj"][...]).astype(img_proj_ref.dtype)

    # ---- text tower ----
    t = txt_ref[0] + prm["txt_pos"][...]
    t = block(t, "txt")
    txt_out_ref[0] = t.astype(txt_out_ref.dtype)
    txt_proj_ref[0] = proj_norm(t, prm["txt_proj"][...]).astype(txt_proj_ref.dtype)

    # ---- multimodal (Q-Former-style: text queries attend over image) ----
    q = mxu(t, prm["mm_wq"][...])
    kv = mxu(x, prm["mm_wkv"][...])                        # (NP, 2D)
    k, v = kv[:, :D], kv[:, D:]
    mm = t + attend(q, k, v, prm["mm_wo"][...])
    mm_ref[0] = layernorm(mm, prm["final_ln_g"][...],
                          prm["final_ln_b"][...]).astype(mm_ref.dtype)


# ----------------------------- parameter prep --------------------------------
def _prep_params(p):
    """Fold / cast raw params into the layout the fused kernel expects."""
    bf = lambda a: a.astype(jnp.bfloat16)
    w = {}
    # patch-embed weight zero-padded 48 -> 128 along the contraction dim.
    w["patch_w"] = bf(jnp.pad(p["patch_w"], ((0, PATCH_PAD - PATCH_DIM), (0, 0))))
    w["patch_b"] = p["patch_b"].reshape(1, D)
    w["vis_pos"] = p["vis_pos"].reshape(NP, D)
    w["txt_pos"] = p["txt_pos"].reshape(T, D)
    for pre in ("vis", "txt"):
        w[f"{pre}_ln1_g"] = p[f"{pre}_ln1_g"]
        w[f"{pre}_ln1_b"] = p[f"{pre}_ln1_b"]
        w[f"{pre}_ln2_g"] = p[f"{pre}_ln2_g"]
        w[f"{pre}_ln2_b"] = p[f"{pre}_ln2_b"]
        w[f"{pre}_wqkv"] = bf(jnp.concatenate(
            [p[f"{pre}_wq"], p[f"{pre}_wk"], p[f"{pre}_wv"]], axis=1))
        w[f"{pre}_wo"] = bf(p[f"{pre}_wo"])
        w[f"{pre}_w1"] = bf(p[f"{pre}_w1"])
        w[f"{pre}_b1"] = p[f"{pre}_b1"].reshape(1, D_FF)
        w[f"{pre}_w2"] = bf(p[f"{pre}_w2"])
        w[f"{pre}_b2"] = p[f"{pre}_b2"].reshape(1, D)
    w["vis_proj"] = bf(p["vis_proj"])
    w["txt_proj"] = bf(p["txt_proj"])
    w["mm_wq"] = bf(p["mm_wq"])
    w["mm_wkv"] = bf(jnp.concatenate([p["mm_wk"], p["mm_wv"]], axis=1))
    w["mm_wo"] = bf(p["mm_wo"])
    w["final_ln_g"] = p["final_ln_g"]
    w["final_ln_b"] = p["final_ln_b"]
    return w


def _const_spec(shape):
    nd = len(shape)
    return pl.BlockSpec(shape, lambda b, _n=nd: (0,) * _n)


# ----------------------------- model ------------------------------------------
def init_params(key):
    def dense(k, shape, scale=0.02):
        return scale * jax.random.normal(k, shape, jnp.float32)

    keys = iter(jax.random.split(key, 64))
    p = {}
    p["patch_w"] = dense(next(keys), (PATCH_DIM, D))
    p["patch_b"] = jnp.zeros((D,), jnp.float32)
    p["vis_pos"] = dense(next(keys), (1, NP, D))
    p["tok_emb"] = dense(next(keys), (VOCAB, D))
    p["txt_pos"] = dense(next(keys), (1, T, D))
    for pre in ("vis", "txt"):
        p[f"{pre}_ln1_g"] = jnp.ones((1, D), jnp.float32)
        p[f"{pre}_ln1_b"] = jnp.zeros((1, D), jnp.float32)
        p[f"{pre}_ln2_g"] = jnp.ones((1, D), jnp.float32)
        p[f"{pre}_ln2_b"] = jnp.zeros((1, D), jnp.float32)
        for w in ("wq", "wk", "wv", "wo"):
            p[f"{pre}_{w}"] = dense(next(keys), (D, D))
        p[f"{pre}_w1"] = dense(next(keys), (D, D_FF))
        p[f"{pre}_b1"] = jnp.zeros((D_FF,), jnp.float32)
        p[f"{pre}_w2"] = dense(next(keys), (D_FF, D))
        p[f"{pre}_b2"] = jnp.zeros((D,), jnp.float32)
    p["vis_proj"] = dense(next(keys), (D, D_PROJ))
    p["txt_proj"] = dense(next(keys), (D, D_PROJ))
    for w in ("wq", "wk", "wv", "wo"):
        p[f"mm_{w}"] = dense(next(keys), (D, D))
    p["final_ln_g"] = jnp.ones((1, D), jnp.float32)
    p["final_ln_b"] = jnp.zeros((1, D), jnp.float32)
    return p


def vlm_extract_features(raw_image, token_ids, params):
    """Equivalent of VLM.forward -> model.extract_features(sample)."""
    Bx = raw_image.shape[0]

    # vis_processors['eval'] : per-channel normalization (glue)
    mean = jnp.array([0.48145466, 0.4578275, 0.40821073],
                     jnp.float32).reshape(1, C, 1, 1)
    std = jnp.array([0.26862954, 0.26130258, 0.27577711],
                    jnp.float32).reshape(1, C, 1, 1)
    img = (raw_image - mean) / std

    # patchify NCHW -> (B, NP, PATCH_DIM), zero-pad feature dim to 128 (glue)
    patches = img.reshape(Bx, C, H // P, P, W // P, P)
    patches = patches.transpose(0, 2, 4, 1, 3, 5).reshape(Bx, NP, PATCH_DIM)
    patches = jnp.pad(patches, ((0, 0), (0, 0), (0, PATCH_PAD - PATCH_DIM)))

    # token embedding lookup (gather) stays in plain JAX (glue)
    t_emb = jnp.take(params["tok_emb"], token_ids, axis=0)   # (B, T, D)

    w = _prep_params(params)
    flat_w = [w[name] for name in PARAM_ORDER]

    in_specs = ([pl.BlockSpec((1, NP, PATCH_PAD), lambda b: (b, 0, 0)),
                 pl.BlockSpec((1, T, D), lambda b: (b, 0, 0))]
                + [_const_spec(a.shape) for a in flat_w])

    out_specs = [
        pl.BlockSpec((1, NP, D), lambda b: (b, 0, 0)),
        pl.BlockSpec((1, NP, D_PROJ), lambda b: (b, 0, 0)),
        pl.BlockSpec((1, T, D), lambda b: (b, 0, 0)),
        pl.BlockSpec((1, T, D_PROJ), lambda b: (b, 0, 0)),
        pl.BlockSpec((1, T, D), lambda b: (b, 0, 0)),
    ]
    out_shape = [
        jax.ShapeDtypeStruct((Bx, NP, D), jnp.float32),
        jax.ShapeDtypeStruct((Bx, NP, D_PROJ), jnp.float32),
        jax.ShapeDtypeStruct((Bx, T, D), jnp.float32),
        jax.ShapeDtypeStruct((Bx, T, D_PROJ), jnp.float32),
        jax.ShapeDtypeStruct((Bx, T, D), jnp.float32),
    ]

    (image_embeds, image_embeds_proj, text_embeds, text_embeds_proj,
     multimodal_embeds) = pl.pallas_call(
        _vlm_fused_kernel,
        grid=(Bx,),
        in_specs=in_specs,
        out_specs=out_specs,
        out_shape=out_shape,
        compiler_params=pltpu.CompilerParams(
            dimension_semantics=("parallel",)),
    )(patches, t_emb, *flat_w)

    return {
        "image_embeds": image_embeds,
        "image_embeds_proj": image_embeds_proj,
        "text_embeds": text_embeds,
        "text_embeds_proj": text_embeds_proj,
        "multimodal_embeds": multimodal_embeds,
    }


# ----------------------------- main -------------------------------------------
if __name__ == "__main__":
    key = jax.random.PRNGKey(0)
    k_img, k_tok, k_par = jax.random.split(key, 3)

    # "raw_image" in [0,1], NCHW; "prompt" stands in as pre-tokenized ids.
    raw_image = jax.random.uniform(k_img, (B, C, H, W), jnp.float32)
    token_ids = jax.random.randint(k_tok, (B, T), 0, VOCAB)
    params = init_params(k_par)

    feats = jax.jit(vlm_extract_features)(raw_image, token_ids, params)
    feats = jax.block_until_ready(feats)

    assert feats["image_embeds"].shape == (B, NP, D)
    assert feats["image_embeds_proj"].shape == (B, NP, D_PROJ)
    assert feats["text_embeds"].shape == (B, T, D)
    assert feats["text_embeds_proj"].shape == (B, T, D_PROJ)
    assert feats["multimodal_embeds"].shape == (B, T, D)
    assert all(bool(jnp.all(jnp.isfinite(v))) for v in feats.values())
    print("KERNEL_OK")
</pallas_src>

<mosaic_0001>
module attributes {stable_mosaic.version = 11 : i64} {
  func.func @_vlm_fused_kernel(%arg0: i32, %arg1: memref<1x16x128xf32, #tpu.memory_space<vmem>>, %arg2: memref<1x8x128xf32, #tpu.memory_space<vmem>>, %arg3: memref<128x128xbf16, #tpu.memory_space<vmem>>, %arg4: memref<1x128xf32, #tpu.memory_space<vmem>>, %arg5: memref<16x128xf32, #tpu.memory_space<vmem>>, %arg6: memref<8x128xf32, #tpu.memory_space<vmem>>, %arg7: memref<1x128xf32, #tpu.memory_space<vmem>>, %arg8: memref<1x128xf32, #tpu.memory_space<vmem>>, %arg9: memref<128x384xbf16, #tpu.memory_space<vmem>>, %arg10: memref<128x128xbf16, #tpu.memory_space<vmem>>, %arg11: memref<1x128xf32, #tpu.memory_space<vmem>>, %arg12: memref<1x128xf32, #tpu.memory_space<vmem>>, %arg13: memref<128x512xbf16, #tpu.memory_space<vmem>>, %arg14: memref<1x512xf32, #tpu.memory_space<vmem>>, %arg15: memref<512x128xbf16, #tpu.memory_space<vmem>>, %arg16: memref<1x128xf32, #tpu.memory_space<vmem>>, %arg17: memref<1x128xf32, #tpu.memory_space<vmem>>, %arg18: memref<1x128xf32, #tpu.memory_space<vmem>>, %arg19: memref<128x384xbf16, #tpu.memory_space<vmem>>, %arg20: memref<128x128xbf16, #tpu.memory_space<vmem>>, %arg21: memref<1x128xf32, #tpu.memory_space<vmem>>, %arg22: memref<1x128xf32, #tpu.memory_space<vmem>>, %arg23: memref<128x512xbf16, #tpu.memory_space<vmem>>, %arg24: memref<1x512xf32, #tpu.memory_space<vmem>>, %arg25: memref<512x128xbf16, #tpu.memory_space<vmem>>, %arg26: memref<1x128xf32, #tpu.memory_space<vmem>>, %arg27: memref<128x128xbf16, #tpu.memory_space<vmem>>, %arg28: memref<128x128xbf16, #tpu.memory_space<vmem>>, %arg29: memref<128x128xbf16, #tpu.memory_space<vmem>>, %arg30: memref<128x256xbf16, #tpu.memory_space<vmem>>, %arg31: memref<128x128xbf16, #tpu.memory_space<vmem>>, %arg32: memref<1x128xf32, #tpu.memory_space<vmem>>, %arg33: memref<1x128xf32, #tpu.memory_space<vmem>>, %arg34: memref<1x16x128xf32, #tpu.memory_space<vmem>>, %arg35: memref<1x16x128xf32, #tpu.memory_space<vmem>>, %arg36: memref<1x8x128xf32, #tpu.memory_space<vmem>>, %arg37: memref<1x8x128xf32, #tpu.memory_space<vmem>>, %arg38: memref<1x8x128xf32, #tpu.memory_space<vmem>>) attributes {dimension_semantics = [#tpu.dimension_semantics<parallel>], iteration_bounds = array<i64: 2>, scalar_prefetch = 0 : i64, scratch_operands = 0 : i64, tpu.core_type = #tpu.core_type<tc>, window_params = [{transform_indices = @transform_0, window_bounds = array<i64: 1, 16, 128>}, {transform_indices = @transform_1, window_bounds = array<i64: 1, 8, 128>}, {pipeline_mode = #tpu.pipeline_mode<synchronous>, transform_indices = @transform_2, window_bounds = array<i64: 128, 128>}, {pipeline_mode = #tpu.pipeline_mode<synchronous>, transform_indices = @transform_3, window_bounds = array<i64: 1, 128>}, {pipeline_mode = #tpu.pipeline_mode<synchronous>, transform_indices = @transform_4, window_bounds = array<i64: 16, 128>}, {pipeline_mode = #tpu.pipeline_mode<synchronous>, transform_indices = @transform_5, window_bounds = array<i64: 8, 128>}, {pipeline_mode = #tpu.pipeline_mode<synchronous>, transform_indices = @transform_6, window_bounds = array<i64: 1, 128>}, {pipeline_mode = #tpu.pipeline_mode<synchronous>, transform_indices = @transform_7, window_bounds = array<i64: 1, 128>}, {pipeline_mode = #tpu.pipeline_mode<synchronous>, transform_indices = @transform_8, window_bounds = array<i64: 128, 384>}, {pipeline_mode = #tpu.pipeline_mode<synchronous>, transform_indices = @transform_9, window_bounds = array<i64: 128, 128>}, {pipeline_mode = #tpu.pipeline_mode<synchronous>, transform_indices = @transform_10, window_bounds = array<i64: 1, 128>}, {pipeline_mode = #tpu.pipeline_mode<synchronous>, transform_indices = @transform_11, window_bounds = array<i64: 1, 128>}, {pipeline_mode = #tpu.pipeline_mode<synchronous>, transform_indices = @transform_12, window_bounds = array<i64: 128, 512>}, {pipeline_mode = #tpu.pipeline_mode<synchronous>, transform_indices = @transform_13, window_bounds = array<i64: 1, 512>}, {pipeline_mode = #tpu.pipeline_mode<synchronous>, transform_indices = @transform_14, window_bounds = array<i64: 512, 128>}, {pipeline_mode = #tpu.pipeline_mode<synchronous>, transform_indices = @transform_15, window_bounds = array<i64: 1, 128>}, {pipeline_mode = #tpu.pipeline_mode<synchronous>, transform_indices = @transform_16, window_bounds = array<i64: 1, 128>}, {pipeline_mode = #tpu.pipeline_mode<synchronous>, transform_indices = @transform_17, window_bounds = array<i64: 1, 128>}, {pipeline_mode = #tpu.pipeline_mode<synchronous>, transform_indices = @transform_18, window_bounds = array<i64: 128, 384>}, {pipeline_mode = #tpu.pipeline_mode<synchronous>, transform_indices = @transform_19, window_bounds = array<i64: 128, 128>}, {pipeline_mode = #tpu.pipeline_mode<synchronous>, transform_indices = @transform_20, window_bounds = array<i64: 1, 128>}, {pipeline_mode = #tpu.pipeline_mode<synchronous>, transform_indices = @transform_21, window_bounds = array<i64: 1, 128>}, {pipeline_mode = #tpu.pipeline_mode<synchronous>, transform_indices = @transform_22, window_bounds = array<i64: 128, 512>}, {pipeline_mode = #tpu.pipeline_mode<synchronous>, transform_indices = @transform_23, window_bounds = array<i64: 1, 512>}, {pipeline_mode = #tpu.pipeline_mode<synchronous>, transform_indices = @transform_24, window_bounds = array<i64: 512, 128>}, {pipeline_mode = #tpu.pipeline_mode<synchronous>, transform_indices = @transform_25, window_bounds = array<i64: 1, 128>}, {pipeline_mode = #tpu.pipeline_mode<synchronous>, transform_indices = @transform_26, window_bounds = array<i64: 128, 128>}, {pipeline_mode = #tpu.pipeline_mode<synchronous>, transform_indices = @transform_27, window_bounds = array<i64: 128, 128>}, {pipeline_mode = #tpu.pipeline_mode<synchronous>, transform_indices = @transform_28, window_bounds = array<i64: 128, 128>}, {pipeline_mode = #tpu.pipeline_mode<synchronous>, transform_indices = @transform_29, window_bounds = array<i64: 128, 256>}, {pipeline_mode = #tpu.pipeline_mode<synchronous>, transform_indices = @transform_30, window_bounds = array<i64: 128, 128>}, {pipeline_mode = #tpu.pipeline_mode<synchronous>, transform_indices = @transform_31, window_bounds = array<i64: 1, 128>}, {pipeline_mode = #tpu.pipeline_mode<synchronous>, transform_indices = @transform_32, window_bounds = array<i64: 1, 128>}, {transform_indices = @transform_33, window_bounds = array<i64: 1, 16, 128>}, {transform_indices = @transform_34, window_bounds = array<i64: 1, 16, 128>}, {transform_indices = @transform_35, window_bounds = array<i64: 1, 8, 128>}, {transform_indices = @transform_36, window_bounds = array<i64: 1, 8, 128>}, {transform_indices = @transform_37, window_bounds = array<i64: 1, 8, 128>}]} {
    %c0 = arith.constant 0 : index
    %c0_0 = arith.constant 0 : index
    %c0_1 = arith.constant 0 : index
    %0 = vector.load %arg1[%c0, %c0_0, %c0_1] : memref<1x16x128xf32, #tpu.memory_space<vmem>>, vector<1x16x128xf32>
    %1 = vector.shape_cast %0 : vector<1x16x128xf32> to vector<16x128xf32>
    %c0_2 = arith.constant 0 : index
    %c0_3 = arith.constant 0 : index
    %2 = vector.load %arg3[%c0_2, %c0_3] : memref<128x128xbf16, #tpu.memory_space<vmem>>, vector<128x128xbf16>
    %3 = arith.truncf %1 : vector<16x128xf32> to vector<16x128xbf16>
    %cst = arith.constant dense<0.000000e+00> : vector<16x128xf32>
    %4 = tpu.matmul %3, %2, %cst {dimension_numbers = #tpu.dot_dimension_numbers<[1], [0], [0], [1], [0, 0, 1, 1], [], []>} : vector<16x128xbf16>, vector<128x128xbf16>, vector<16x128xf32> -> vector<16x128xf32>
    %c0_4 = arith.constant 0 : index
    %c0_5 = arith.constant 0 : index
    %5 = vector.load %arg4[%c0_4, %c0_5] : memref<1x128xf32, #tpu.memory_space<vmem>>, vector<1x128xf32>
    %6 = vector.broadcast %5 : vector<1x128xf32> to vector<16x128xf32>
    %7 = arith.addf %4, %6 : vector<16x128xf32>
    %c0_6 = arith.constant 0 : index
    %c0_7 = arith.constant 0 : index
    %8 = vector.load %arg5[%c0_6, %c0_7] : memref<16x128xf32, #tpu.memory_space<vmem>>, vector<16x128xf32>
    %9 = arith.addf %7, %8 : vector<16x128xf32>
    %c0_8 = arith.constant 0 : index
    %c0_9 = arith.constant 0 : index
    %10 = vector.load %arg7[%c0_8, %c0_9] : memref<1x128xf32, #tpu.memory_space<vmem>>, vector<1x128xf32>
    %c0_10 = arith.constant 0 : index
    %c0_11 = arith.constant 0 : index
    %11 = vector.load %arg8[%c0_10, %c0_11] : memref<1x128xf32, #tpu.memory_space<vmem>>, vector<1x128xf32>
    %cst_12 = arith.constant dense<0.000000e+00> : vector<16xf32>
    %12 = vector.multi_reduction <add>, %9, %cst_12 [1] : vector<16x128xf32> to vector<16xf32>
    %13 = vector.shape_cast %12 : vector<16xf32> to vector<16x1xf32>
    %cst_13 = arith.constant 1.280000e+02 : f32
    %14 = vector.broadcast %cst_13 : f32 to vector<16x1xf32>
    %15 = arith.divf %13, %14 : vector<16x1xf32>
    %16 = vector.broadcast %15 : vector<16x1xf32> to vector<16x128xf32>
    %17 = arith.subf %9, %16 : vector<16x128xf32>
    %18 = arith.mulf %17, %17 : vector<16x128xf32>
    %cst_14 = arith.constant dense<0.000000e+00> : vector<16xf32>
    %19 = vector.multi_reduction <add>, %18, %cst_14 [1] : vector<16x128xf32> to vector<16xf32>
    %20 = vector.shape_cast %19 : vector<16xf32> to vector<16x1xf32>
    %cst_15 = arith.constant 1.280000e+02 : f32
    %21 = vector.broadcast %cst_15 : f32 to vector<16x1xf32>
    %22 = arith.divf %20, %21 : vector<16x1xf32>
    %23 = vector.broadcast %15 : vector<16x1xf32> to vector<16x128xf32>
    %24 = arith.subf %9, %23 : vector<16x128xf32>
    %cst_16 = arith.constant 9.99999997E-7 : f32
    %25 = vector.broadcast %cst_16 : f32 to vector<16x1xf32>
    %26 = arith.addf %22, %25 : vector<16x1xf32>
    %27 = math.rsqrt %26 : vector<16x1xf32>
    %28 = vector.broadcast %27 : vector<16x1xf32> to vector<16x128xf32>
    %29 = arith.mulf %24, %28 : vector<16x128xf32>
    %30 = vector.broadcast %10 : vector<1x128xf32> to vector<16x128xf32>
    %31 = arith.mulf %29, %30 : vector<16x128xf32>
    %32 = vector.broadcast %11 : vector<1x128xf32> to vector<16x128xf32>
    %33 = arith.addf %31, %32 : vector<16x128xf32>
    %c0_17 = arith.constant 0 : index
    %c0_18 = arith.constant 0 : index
    %34 = vector.load %arg9[%c0_17, %c0_18] : memref<128x384xbf16, #tpu.memory_space<vmem>>, vector<128x384xbf16>
    %35 = arith.truncf %33 : vector<16x128xf32> to vector<16x128xbf16>
    %cst_19 = arith.constant dense<0.000000e+00> : vector<16x384xf32>
    %36 = tpu.matmul %35, %34, %cst_19 {dimension_numbers = #tpu.dot_dimension_numbers<[1], [0], [0], [1], [0, 0, 1, 1], [], []>} : vector<16x128xbf16>, vector<128x384xbf16>, vector<16x384xf32> -> vector<16x384xf32>
    %37 = vector.extract_strided_slice %36 {offsets = [0, 0], sizes = [16, 128], strides = [1, 1]} : vector<16x384xf32> to vector<16x128xf32>
    %38 = vector.extract_strided_slice %36 {offsets = [0, 128], sizes = [16, 128], strides = [1, 1]} : vector<16x384xf32> to vector<16x128xf32>
    %39 = vector.extract_strided_slice %36 {offsets = [0, 256], sizes = [16, 128], strides = [1, 1]} : vector<16x384xf32> to vector<16x128xf32>
    %c0_20 = arith.constant 0 : index
    %c0_21 = arith.constant 0 : index
    %40 = vector.load %arg10[%c0_20, %c0_21] : memref<128x128xbf16, #tpu.memory_space<vmem>>, vector<128x128xbf16>
    %41 = arith.truncf %37 : vector<16x128xf32> to vector<16x128xbf16>
    %42 = arith.truncf %38 : vector<16x128xf32> to vector<16x128xbf16>
    %cst_22 = arith.constant dense<0.000000e+00> : vector<16x16xf32>
    %43 = tpu.matmul %41, %42, %cst_22 {dimension_numbers = #tpu.dot_dimension_numbers<[1], [1], [0], [0], [0, 0, 1, 0], [], []>} : vector<16x128xbf16>, vector<16x128xbf16>, vector<16x16xf32> -> vector<16x16xf32>
    %cst_23 = arith.constant 0.0883883461 : f32
    %44 = vector.broadcast %cst_23 : f32 to vector<16x16xf32>
    %45 = arith.mulf %43, %44 : vector<16x16xf32>
    %cst_24 = arith.constant dense<0xFF800000> : vector<16xf32>
    %46 = vector.multi_reduction <maximumf>, %45, %cst_24 [1] : vector<16x16xf32> to vector<16xf32>
    %47 = vector.shape_cast %46 : vector<16xf32> to vector<16x1xf32>
    %48 = vector.broadcast %47 : vector<16x1xf32> to vector<16x16xf32>
    %49 = arith.subf %45, %48 : vector<16x16xf32>
    %50 = math.exp %49 : vector<16x16xf32>
    %cst_25 = arith.constant dense<0.000000e+00> : vector<16xf32>
    %51 = vector.multi_reduction <add>, %50, %cst_25 [1] : vector<16x16xf32> to vector<16xf32>
    %52 = vector.shape_cast %51 : vector<16xf32> to vector<16x1xf32>
    %53 = tpu.reciprocal %52 {approx = true} : vector<16x1xf32> -> vector<16x1xf32>
    %54 = vector.broadcast %53 : vector<16x1xf32> to vector<16x16xf32>
    %55 = arith.mulf %50, %54 : vector<16x16xf32>
    %56 = arith.truncf %55 : vector<16x16xf32> to vector<16x16xbf16>
    %57 = arith.truncf %39 : vector<16x128xf32> to vector<16x128xbf16>
    %cst_26 = arith.constant dense<0.000000e+00> : vector<16x128xf32>
    %58 = tpu.matmul %56, %57, %cst_26 {dimension_numbers = #tpu.dot_dimension_numbers<[1], [0], [0], [1], [0, 0, 1, 1], [], []>} : vector<16x16xbf16>, vector<16x128xbf16>, vector<16x128xf32> -> vector<16x128xf32>
    %59 = arith.truncf %58 : vector<16x128xf32> to vector<16x128xbf16>
    %cst_27 = arith.constant dense<0.000000e+00> : vector<16x128xf32>
    %60 = tpu.matmul %59, %40, %cst_27 {dimension_numbers = #tpu.dot_dimension_numbers<[1], [0], [0], [1], [0, 0, 1, 1], [], []>} : vector<16x128xbf16>, vector<128x128xbf16>, vector<16x128xf32> -> vector<16x128xf32>
    %61 = arith.addf %9, %60 : vector<16x128xf32>
    %c0_28 = arith.constant 0 : index
    %c0_29 = arith.constant 0 : index
    %62 = vector.load %arg11[%c0_28, %c0_29] : memref<1x128xf32, #tpu.memory_space<vmem>>, vector<1x128xf32>
    %c0_30 = arith.constant 0 : index
    %c0_31 = arith.constant 0 : index
    %63 = vector.load %arg12[%c0_30, %c0_31] : memref<1x128xf32, #tpu.memory_space<vmem>>, vector<1x128xf32>
    %cst_32 = arith.constant dense<0.000000e+00> : vector<16xf32>
    %64 = vector.multi_reduction <add>, %61, %cst_32 [1] : vector<16x128xf32> to vector<16xf32>
    %65 = vector.shape_cast %64 : vector<16xf32> to vector<16x1xf32>
    %cst_33 = arith.constant 1.280000e+02 : f32
    %66 = vector.broadcast %cst_33 : f32 to vector<16x1xf32>
    %67 = arith.divf %65, %66 : vector<16x1xf32>
    %68 = vector.broadcast %67 : vector<16x1xf32> to vector<16x128xf32>
    %69 = arith.subf %61, %68 : vector<16x128xf32>
    %70 = arith.mulf %69, %69 : vector<16x128xf32>
    %cst_34 = arith.constant dense<0.000000e+00> : vector<16xf32>
    %71 = vector.multi_reduction <add>, %70, %cst_34 [1] : vector<16x128xf32> to vector<16xf32>
    %72 = vector.shape_cast %71 : vector<16xf32> to vector<16x1xf32>
    %cst_35 = arith.constant 1.280000e+02 : f32
    %73 = vector.broadcast %cst_35 : f32 to vector<16x1xf32>
    %74 = arith.divf %72, %73 : vector<16x1xf32>
    %75 = vector.broadcast %67 : vector<16x1xf32> to vector<16x128xf32>
    %76 = arith.subf %61, %75 : vector<16x128xf32>
    %cst_36 = arith.constant 9.99999997E-7 : f32
    %77 = vector.broadcast %cst_36 : f32 to vector<16x1xf32>
    %78 = arith.addf %74, %77 : vector<16x1xf32>
    %79 = math.rsqrt %78 : vector<16x1xf32>
    %80 = vector.broadcast %79 : vector<16x1xf32> to vector<16x128xf32>
    %81 = arith.mulf %76, %80 : vector<16x128xf32>
    %82 = vector.broadcast %62 : vector<1x128xf32> to vector<16x128xf32>
    %83 = arith.mulf %81, %82 : vector<16x128xf32>
    %84 = vector.broadcast %63 : vector<1x128xf32> to vector<16x128xf32>
    %85 = arith.addf %83, %84 : vector<16x128xf32>
    %c0_37 = arith.constant 0 : index
    %c0_38 = arith.constant 0 : index
    %86 = vector.load %arg13[%c0_37, %c0_38] : memref<128x512xbf16, #tpu.memory_space<vmem>>, vector<128x512xbf16>
    %87 = arith.truncf %85 : vector<16x128xf32> to vector<16x128xbf16>
    %cst_39 = arith.constant dense<0.000000e+00> : vector<16x512xf32>
    %88 = tpu.matmul %87, %86, %cst_39 {dimension_numbers = #tpu.dot_dimension_numbers<[1], [0], [0], [1], [0, 0, 1, 1], [], []>} : vector<16x128xbf16>, vector<128x512xbf16>, vector<16x512xf32> -> vector<16x512xf32>
    %c0_40 = arith.constant 0 : index
    %c0_41 = arith.constant 0 : index
    %89 = vector.load %arg14[%c0_40, %c0_41] : memref<1x512xf32, #tpu.memory_space<vmem>>, vector<1x512xf32>
    %90 = vector.broadcast %89 : vector<1x512xf32> to vector<16x512xf32>
    %91 = arith.addf %88, %90 : vector<16x512xf32>
    %92 = arith.mulf %91, %91 : vector<16x512xf32>
    %93 = arith.mulf %91, %92 : vector<16x512xf32>
    %cst_42 = arith.constant 4.471500e-02 : f32
    %94 = vector.broadcast %cst_42 : f32 to vector<16x512xf32>
    %95 = arith.mulf %94, %93 : vector<16x512xf32>
    %96 = arith.addf %91, %95 : vector<16x512xf32>
    %cst_43 = arith.constant 0.797884583 : f32
    %97 = vector.broadcast %cst_43 : f32 to vector<16x512xf32>
    %98 = arith.mulf %97, %96 : vector<16x512xf32>
    %99 = math.tanh %98 : vector<16x512xf32>
    %cst_44 = arith.constant 1.000000e+00 : f32
    %100 = vector.broadcast %cst_44 : f32 to vector<16x512xf32>
    %101 = arith.addf %100, %99 : vector<16x512xf32>
    %cst_45 = arith.constant 5.000000e-01 : f32
    %102 = vector.broadcast %cst_45 : f32 to vector<16x512xf32>
    %103 = arith.mulf %102, %101 : vector<16x512xf32>
    %104 = arith.mulf %91, %103 : vector<16x512xf32>
    %c0_46 = arith.constant 0 : index
    %c0_47 = arith.constant 0 : index
    %105 = vector.load %arg15[%c0_46, %c0_47] : memref<512x128xbf16, #tpu.memory_space<vmem>>, vector<512x128xbf16>
    %106 = arith.truncf %104 : vector<16x512xf32> to vector<16x512xbf16>
    %cst_48 = arith.constant dense<0.000000e+00> : vector<16x128xf32>
    %107 = tpu.matmul %106, %105, %cst_48 {dimension_numbers = #tpu.dot_dimension_numbers<[1], [0], [0], [1], [0, 0, 1, 1], [], []>} : vector<16x512xbf16>, vector<512x128xbf16>, vector<16x128xf32> -> vector<16x128xf32>
    %108 = arith.addf %61, %107 : vector<16x128xf32>
    %c0_49 = arith.constant 0 : index
    %c0_50 = arith.constant 0 : index
    %109 = vector.load %arg16[%c0_49, %c0_50] : memref<1x128xf32, #tpu.memory_space<vmem>>, vector<1x128xf32>
    %110 = vector.broadcast %109 : vector<1x128xf32> to vector<16x128xf32>
    %111 = arith.addf %108, %110 : vector<16x128xf32>
    %c0_51 = arith.constant 0 : index
    %c0_52 = arith.constant 0 : index
    %c0_53 = arith.constant 0 : index
    %112 = vector.load %arg34[%c0_51, %c0_52, %c0_53] : memref<1x16x128xf32, #tpu.memory_space<vmem>>, vector<1x16x128xf32>
    %113 = vector.shape_cast %112 : vector<1x16x128xf32> to vector<16x128xf32>
    %114 = vector.shape_cast %111 : vector<16x128xf32> to vector<1x16x128xf32>
    tpu.vector_store %arg34[%c0_51, %c0_52, %c0_53], %114 {strides = array<i32>} : memref<1x16x128xf32, #tpu.memory_space<vmem>>, vector<1x16x128xf32>,
    %c0_54 = arith.constant 0 : index
    %c0_55 = arith.constant 0 : index
    %115 = vector.load %arg27[%c0_54, %c0_55] : memref<128x128xbf16, #tpu.memory_space<vmem>>, vector<128x128xbf16>
    %116 = arith.truncf %111 : vector<16x128xf32> to vector<16x128xbf16>
    %cst_56 = arith.constant dense<0.000000e+00> : vector<16x128xf32>
    %117 = tpu.matmul %116, %115, %cst_56 {dimension_numbers = #tpu.dot_dimension_numbers<[1], [0], [0], [1], [0, 0, 1, 1], [], []>} : vector<16x128xbf16>, vector<128x128xbf16>, vector<16x128xf32> -> vector<16x128xf32>
    %118 = arith.mulf %117, %117 : vector<16x128xf32>
    %cst_57 = arith.constant dense<0.000000e+00> : vector<16xf32>
    %119 = vector.multi_reduction <add>, %118, %cst_57 [1] : vector<16x128xf32> to vector<16xf32>
    %120 = vector.shape_cast %119 : vector<16xf32> to vector<16x1xf32>
    %cst_58 = arith.constant 9.99999996E-13 : f32
    %121 = vector.broadcast %cst_58 : f32 to vector<16x1xf32>
    %122 = arith.addf %120, %121 : vector<16x1xf32>
    %123 = math.rsqrt %122 : vector<16x1xf32>
    %124 = vector.broadcast %123 : vector<16x1xf32> to vector<16x128xf32>
    %125 = arith.mulf %117, %124 : vector<16x128xf32>
    %c0_59 = arith.constant 0 : index
    %c0_60 = arith.constant 0 : index
    %c0_61 = arith.constant 0 : index
    %126 = vector.load %arg35[%c0_59, %c0_60, %c0_61] : memref<1x16x128xf32, #tpu.memory_space<vmem>>, vector<1x16x128xf32>
    %127 = vector.shape_cast %126 : vector<1x16x128xf32> to vector<16x128xf32>
    %128 = vector.shape_cast %125 : vector<16x128xf32> to vector<1x16x128xf32>
    tpu.vector_store %arg35[%c0_59, %c0_60, %c0_61], %128 {strides = array<i32>} : memref<1x16x128xf32, #tpu.memory_space<vmem>>, vector<1x16x128xf32>,
    %c0_62 = arith.constant 0 : index
    %c0_63 = arith.constant 0 : index
    %c0_64 = arith.constant 0 : index
    %129 = vector.load %arg2[%c0_62, %c0_63, %c0_64] : memref<1x8x128xf32, #tpu.memory_space<vmem>>, vector<1x8x128xf32>
    %130 = vector.shape_cast %129 : vector<1x8x128xf32> to vector<8x128xf32>
    %c0_65 = arith.constant 0 : index
    %c0_66 = arith.constant 0 : index
    %131 = vector.load %arg6[%c0_65, %c0_66] : memref<8x128xf32, #tpu.memory_space<vmem>>, vector<8x128xf32>
    %132 = arith.addf %130, %131 : vector<8x128xf32>
    %c0_67 = arith.constant 0 : index
    %c0_68 = arith.constant 0 : index
    %133 = vector.load %arg17[%c0_67, %c0_68] : memref<1x128xf32, #tpu.memory_space<vmem>>, vector<1x128xf32>
    %c0_69 = arith.constant 0 : index
    %c0_70 = arith.constant 0 : index
    %134 = vector.load %arg18[%c0_69, %c0_70] : memref<1x128xf32, #tpu.memory_space<vmem>>, vector<1x128xf32>
    %cst_71 = arith.constant dense<0.000000e+00> : vector<8xf32>
    %135 = vector.multi_reduction <add>, %132, %cst_71 [1] : vector<8x128xf32> to vector<8xf32>
    %136 = vector.shape_cast %135 : vector<8xf32> to vector<8x1xf32>
    %cst_72 = arith.constant 1.280000e+02 : f32
    %137 = vector.broadcast %cst_72 : f32 to vector<8x1xf32>
    %138 = arith.divf %136, %137 : vector<8x1xf32>
    %139 = vector.broadcast %138 : vector<8x1xf32> to vector<8x128xf32>
    %140 = arith.subf %132, %139 : vector<8x128xf32>
    %141 = arith.mulf %140, %140 : vector<8x128xf32>
    %cst_73 = arith.constant dense<0.000000e+00> : vector<8xf32>
    %142 = vector.multi_reduction <add>, %141, %cst_73 [1] : vector<8x128xf32> to vector<8xf32>
    %143 = vector.shape_cast %142 : vector<8xf32> to vector<8x1xf32>
    %cst_74 = arith.constant 1.280000e+02 : f32
    %144 = vector.broadcast %cst_74 : f32 to vector<8x1xf32>
    %145 = arith.divf %143, %144 : vector<8x1xf32>
    %146 = vector.broadcast %138 : vector<8x1xf32> to vector<8x128xf32>
    %147 = arith.subf %132, %146 : vector<8x128xf32>
    %cst_75 = arith.constant 9.99999997E-7 : f32
    %148 = vector.broadcast %cst_75 : f32 to vector<8x1xf32>
    %149 = arith.addf %145, %148 : vector<8x1xf32>
    %150 = math.rsqrt %149 : vector<8x1xf32>
    %151 = vector.broadcast %150 : vector<8x1xf32> to vector<8x128xf32>
    %152 = arith.mulf %147, %151 : vector<8x128xf32>
    %153 = vector.broadcast %133 : vector<1x128xf32> to vector<8x128xf32>
    %154 = arith.mulf %152, %153 : vector<8x128xf32>
    %155 = vector.broadcast %134 : vector<1x128xf32> to vector<8x128xf32>
    %156 = arith.addf %154, %155 : vector<8x128xf32>
    %c0_76 = arith.constant 0 : index
    %c0_77 = arith.constant 0 : index
    %157 = vector.load %arg19[%c0_76, %c0_77] : memref<128x384xbf16, #tpu.memory_space<vmem>>, vector<128x384xbf16>
    %158 = arith.truncf %156 : vector<8x128xf32> to vector<8x128xbf16>
    %cst_78 = arith.constant dense<0.000000e+00> : vector<8x384xf32>
    %159 = tpu.matmul %158, %157, %cst_78 {dimension_numbers = #tpu.dot_dimension_numbers<[1], [0], [0], [1], [0, 0, 1, 1], [], []>} : vector<8x128xbf16>, vector<128x384xbf16>, vector<8x384xf32> -> vector<8x384xf32>
    %160 = vector.extract_strided_slice %159 {offsets = [0, 0], sizes = [8, 128], strides = [1, 1]} : vector<8x384xf32> to vector<8x128xf32>
    %161 = vector.extract_strided_slice %159 {offsets = [0, 128], sizes = [8, 128], strides = [1, 1]} : vector<8x384xf32> to vector<8x128xf32>
    %162 = vector.extract_strided_slice %159 {offsets = [0, 256], sizes = [8, 128], strides = [1, 1]} : vector<8x384xf32> to vector<8x128xf32>
    %c0_79 = arith.constant 0 : index
    %c0_80 = arith.constant 0 : index
    %163 = vector.load %arg20[%c0_79, %c0_80] : memref<128x128xbf16, #tpu.memory_space<vmem>>, vector<128x128xbf16>
    %164 = arith.truncf %160 : vector<8x128xf32> to vector<8x128xbf16>
    %165 = arith.truncf %161 : vector<8x128xf32> to vector<8x128xbf16>
    %cst_81 = arith.constant dense<0.000000e+00> : vector<8x8xf32>
    %166 = tpu.matmul %164, %165, %cst_81 {dimension_numbers = #tpu.dot_dimension_numbers<[1], [1], [0], [0], [0, 0, 1, 0], [], []>} : vector<8x128xbf16>, vector<8x128xbf16>, vector<8x8xf32> -> vector<8x8xf32>
    %cst_82 = arith.constant 0.0883883461 : f32
    %167 = vector.broadcast %cst_82 : f32 to vector<8x8xf32>
    %168 = arith.mulf %166, %167 : vector<8x8xf32>
    %cst_83 = arith.constant dense<0xFF800000> : vector<8xf32>
    %169 = vector.multi_reduction <maximumf>, %168, %cst_83 [1] : vector<8x8xf32> to vector<8xf32>
    %170 = vector.shape_cast %169 : vector<8xf32> to vector<8x1xf32>
    %171 = vector.broadcast %170 : vector<8x1xf32> to vector<8x8xf32>
    %172 = arith.subf %168, %171 : vector<8x8xf32>
    %173 = math.exp %172 : vector<8x8xf32>
    %cst_84 = arith.constant dense<0.000000e+00> : vector<8xf32>
    %174 = vector.multi_reduction <add>, %173, %cst_84 [1] : vector<8x8xf32> to vector<8xf32>
    %175 = vector.shape_cast %174 : vector<8xf32> to vector<8x1xf32>
    %176 = tpu.reciprocal %175 {approx = true} : vector<8x1xf32> -> vector<8x1xf32>
    %177 = vector.broadcast %176 : vector<8x1xf32> to vector<8x8xf32>
    %178 = arith.mulf %173, %177 : vector<8x8xf32>
    %179 = arith.truncf %178 : vector<8x8xf32> to vector<8x8xbf16>
    %180 = arith.truncf %162 : vector<8x128xf32> to vector<8x128xbf16>
    %cst_85 = arith.constant dense<0.000000e+00> : vector<8x128xf32>
    %181 = tpu.matmul %179, %180, %cst_85 {dimension_numbers = #tpu.dot_dimension_numbers<[1], [0], [0], [1], [0, 0, 1, 1], [], []>} : vector<8x8xbf16>, vector<8x128xbf16>, vector<8x128xf32> -> vector<8x128xf32>
    %182 = arith.truncf %181 : vector<8x128xf32> to vector<8x128xbf16>
    %cst_86 = arith.constant dense<0.000000e+00> : vector<8x128xf32>
    %183 = tpu.matmul %182, %163, %cst_86 {dimension_numbers = #tpu.dot_dimension_numbers<[1], [0], [0], [1], [0, 0, 1, 1], [], []>} : vector<8x128xbf16>, vector<128x128xbf16>, vector<8x128xf32> -> vector<8x128xf32>
    %184 = arith.addf %132, %183 : vector<8x128xf32>
    %c0_87 = arith.constant 0 : index
    %c0_88 = arith.constant 0 : index
    %185 = vector.load %arg21[%c0_87, %c0_88] : memref<1x128xf32, #tpu.memory_space<vmem>>, vector<1x128xf32>
    %c0_89 = arith.constant 0 : index
    %c0_90 = arith.constant 0 : index
    %186 = vector.load %arg22[%c0_89, %c0_90] : memref<1x128xf32, #tpu.memory_space<vmem>>, vector<1x128xf32>
    %cst_91 = arith.constant dense<0.000000e+00> : vector<8xf32>
    %187 = vector.multi_reduction <add>, %184, %cst_91 [1] : vector<8x128xf32> to vector<8xf32>
    %188 = vector.shape_cast %187 : vector<8xf32> to vector<8x1xf32>
    %cst_92 = arith.constant 1.280000e+02 : f32
    %189 = vector.broadcast %cst_92 : f32 to vector<8x1xf32>
    %190 = arith.divf %188, %189 : vector<8x1xf32>
    %191 = vector.broadcast %190 : vector<8x1xf32> to vector<8x128xf32>
    %192 = arith.subf %184, %191 : vector<8x128xf32>
    %193 = arith.mulf %192, %192 : vector<8x128xf32>
    %cst_93 = arith.constant dense<0.000000e+00> : vector<8xf32>
    %194 = vector.multi_reduction <add>, %193, %cst_93 [1] : vector<8x128xf32> to vector<8xf32>
    %195 = vector.shape_cast %194 : vector<8xf32> to vector<8x1xf32>
    %cst_94 = arith.constant 1.280000e+02 : f32
    %196 = vector.broadcast %cst_94 : f32 to vector<8x1xf32>
    %197 = arith.divf %195, %196 : vector<8x1xf32>
    %198 = vector.broadcast %190 : vector<8x1xf32> to vector<8x128xf32>
    %199 = arith.subf %184, %198 : vector<8x128xf32>
    %cst_95 = arith.constant 9.99999997E-7 : f32
    %200 = vector.broadcast %cst_95 : f32 to vector<8x1xf32>
    %201 = arith.addf %197, %200 : vector<8x1xf32>
    %202 = math.rsqrt %201 : vector<8x1xf32>
    %203 = vector.broadcast %202 : vector<8x1xf32> to vector<8x128xf32>
    %204 = arith.mulf %199, %203 : vector<8x128xf32>
    %205 = vector.broadcast %185 : vector<1x128xf32> to vector<8x128xf32>
    %206 = arith.mulf %204, %205 : vector<8x128xf32>
    %207 = vector.broadcast %186 : vector<1x128xf32> to vector<8x128xf32>
    %208 = arith.addf %206, %207 : vector<8x128xf32>
    %c0_96 = arith.constant 0 : index
    %c0_97 = arith.constant 0 : index
    %209 = vector.load %arg23[%c0_96, %c0_97] : memref<128x512xbf16, #tpu.memory_space<vmem>>, vector<128x512xbf16>
    %210 = arith.truncf %208 : vector<8x128xf32> to vector<8x128xbf16>
    %cst_98 = arith.constant dense<0.000000e+00> : vector<8x512xf32>
    %211 = tpu.matmul %210, %209, %cst_98 {dimension_numbers = #tpu.dot_dimension_numbers<[1], [0], [0], [1], [0, 0, 1, 1], [], []>} : vector<8x128xbf16>, vector<128x512xbf16>, vector<8x512xf32> -> vector<8x512xf32>
    %c0_99 = arith.constant 0 : index
    %c0_100 = arith.constant 0 : index
    %212 = vector.load %arg24[%c0_99, %c0_100] : memref<1x512xf32, #tpu.memory_space<vmem>>, vector<1x512xf32>
    %213 = vector.broadcast %212 : vector<1x512xf32> to vector<8x512xf32>
    %214 = arith.addf %211, %213 : vector<8x512xf32>
    %215 = arith.mulf %214, %214 : vector<8x512xf32>
    %216 = arith.mulf %214, %215 : vector<8x512xf32>
    %cst_101 = arith.constant 4.471500e-02 : f32
    %217 = vector.broadcast %cst_101 : f32 to vector<8x512xf32>
    %218 = arith.mulf %217, %216 : vector<8x512xf32>
    %219 = arith.addf %214, %218 : vector<8x512xf32>
    %cst_102 = arith.constant 0.797884583 : f32
    %220 = vector.broadcast %cst_102 : f32 to vector<8x512xf32>
    %221 = arith.mulf %220, %219 : vector<8x512xf32>
    %222 = math.tanh %221 : vector<8x512xf32>
    %cst_103 = arith.constant 1.000000e+00 : f32
    %223 = vector.broadcast %cst_103 : f32 to vector<8x512xf32>
    %224 = arith.addf %223, %222 : vector<8x512xf32>
    %cst_104 = arith.constant 5.000000e-01 : f32
    %225 = vector.broadcast %cst_104 : f32 to vector<8x512xf32>
    %226 = arith.mulf %225, %224 : vector<8x512xf32>
    %227 = arith.mulf %214, %226 : vector<8x512xf32>
    %c0_105 = arith.constant 0 : index
    %c0_106 = arith.constant 0 : index
    %228 = vector.load %arg25[%c0_105, %c0_106] : memref<512x128xbf16, #tpu.memory_space<vmem>>, vector<512x128xbf16>
    %229 = arith.truncf %227 : vector<8x512xf32> to vector<8x512xbf16>
    %cst_107 = arith.constant dense<0.000000e+00> : vector<8x128xf32>
    %230 = tpu.matmul %229, %228, %cst_107 {dimension_numbers = #tpu.dot_dimension_numbers<[1], [0], [0], [1], [0, 0, 1, 1], [], []>} : vector<8x512xbf16>, vector<512x128xbf16>, vector<8x128xf32> -> vector<8x128xf32>
    %231 = arith.addf %184, %230 : vector<8x128xf32>
    %c0_108 = arith.constant 0 : index
    %c0_109 = arith.constant 0 : index
    %232 = vector.load %arg26[%c0_108, %c0_109] : memref<1x128xf32, #tpu.memory_space<vmem>>, vector<1x128xf32>
    %233 = vector.broadcast %232 : vector<1x128xf32> to vector<8x128xf32>
    %234 = arith.addf %231, %233 : vector<8x128xf32>
    %c0_110 = arith.constant 0 : index
    %c0_111 = arith.constant 0 : index
    %c0_112 = arith.constant 0 : index
    %235 = vector.load %arg36[%c0_110, %c0_111, %c0_112] : memref<1x8x128xf32, #tpu.memory_space<vmem>>, vector<1x8x128xf32>
    %236 = vector.shape_cast %235 : vector<1x8x128xf32> to vector<8x128xf32>
    %237 = vector.shape_cast %234 : vector<8x128xf32> to vector<1x8x128xf32>
    tpu.vector_store %arg36[%c0_110, %c0_111, %c0_112], %237 {strides = array<i32>} : memref<1x8x128xf32, #tpu.memory_space<vmem>>, vector<1x8x128xf32>,
    %c0_113 = arith.constant 0 : index
    %c0_114 = arith.constant 0 : index
    %238 = vector.load %arg28[%c0_113, %c0_114] : memref<128x128xbf16, #tpu.memory_space<vmem>>, vector<128x128xbf16>
    %239 = arith.truncf %234 : vector<8x128xf32> to vector<8x128xbf16>
    %cst_115 = arith.constant dense<0.000000e+00> : vector<8x128xf32>
    %240 = tpu.matmul %239, %238, %cst_115 {dimension_numbers = #tpu.dot_dimension_numbers<[1], [0], [0], [1], [0, 0, 1, 1], [], []>} : vector<8x128xbf16>, vector<128x128xbf16>, vector<8x128xf32> -> vector<8x128xf32>
    %241 = arith.mulf %240, %240 : vector<8x128xf32>
    %cst_116 = arith.constant dense<0.000000e+00> : vector<8xf32>
    %242 = vector.multi_reduction <add>, %241, %cst_116 [1] : vector<8x128xf32> to vector<8xf32>
    %243 = vector.shape_cast %242 : vector<8xf32> to vector<8x1xf32>
    %cst_117 = arith.constant 9.99999996E-13 : f32
    %244 = vector.broadcast %cst_117 : f32 to vector<8x1xf32>
    %245 = arith.addf %243, %244 : vector<8x1xf32>
    %246 = math.rsqrt %245 : vector<8x1xf32>
    %247 = vector.broadcast %246 : vector<8x1xf32> to vector<8x128xf32>
    %248 = arith.mulf %240, %247 : vector<8x128xf32>
    %c0_118 = arith.constant 0 : index
    %c0_119 = arith.constant 0 : index
    %c0_120 = arith.constant 0 : index
    %249 = vector.load %arg37[%c0_118, %c0_119, %c0_120] : memref<1x8x128xf32, #tpu.memory_space<vmem>>, vector<1x8x128xf32>
    %250 = vector.shape_cast %249 : vector<1x8x128xf32> to vector<8x128xf32>
    %251 = vector.shape_cast %248 : vector<8x128xf32> to vector<1x8x128xf32>
    tpu.vector_store %arg37[%c0_118, %c0_119, %c0_120], %251 {strides = array<i32>} : memref<1x8x128xf32, #tpu.memory_space<vmem>>, vector<1x8x128xf32>,
    %c0_121 = arith.constant 0 : index
    %c0_122 = arith.constant 0 : index
    %252 = vector.load %arg29[%c0_121, %c0_122] : memref<128x128xbf16, #tpu.memory_space<vmem>>, vector<128x128xbf16>
    %253 = arith.truncf %234 : vector<8x128xf32> to vector<8x128xbf16>
    %cst_123 = arith.constant dense<0.000000e+00> : vector<8x128xf32>
    %254 = tpu.matmul %253, %252, %cst_123 {dimension_numbers = #tpu.dot_dimension_numbers<[1], [0], [0], [1], [0, 0, 1, 1], [], []>} : vector<8x128xbf16>, vector<128x128xbf16>, vector<8x128xf32> -> vector<8x128xf32>
    %c0_124 = arith.constant 0 : index
    %c0_125 = arith.constant 0 : index
    %255 = vector.load %arg30[%c0_124, %c0_125] : memref<128x256xbf16, #tpu.memory_space<vmem>>, vector<128x256xbf16>
    %256 = arith.truncf %111 : vector<16x128xf32> to vector<16x128xbf16>
    %cst_126 = arith.constant dense<0.000000e+00> : vector<16x256xf32>
    %257 = tpu.matmul %256, %255, %cst_126 {dimension_numbers = #tpu.dot_dimension_numbers<[1], [0], [0], [1], [0, 0, 1, 1], [], []>} : vector<16x128xbf16>, vector<128x256xbf16>, vector<16x256xf32> -> vector<16x256xf32>
    %258 = vector.extract_strided_slice %257 {offsets = [0, 0], sizes = [16, 128], strides = [1, 1]} : vector<16x256xf32> to vector<16x128xf32>
    %259 = vector.extract_strided_slice %257 {offsets = [0, 128], sizes = [16, 128], strides = [1, 1]} : vector<16x256xf32> to vector<16x128xf32>
    %c0_127 = arith.constant 0 : index
    %c0_128 = arith.constant 0 : index
    %260 = vector.load %arg31[%c0_127, %c0_128] : memref<128x128xbf16, #tpu.memory_space<vmem>>, vector<128x128xbf16>
    %261 = arith.truncf %254 : vector<8x128xf32> to vector<8x128xbf16>
    %262 = arith.truncf %258 : vector<16x128xf32> to vector<16x128xbf16>
    %cst_129 = arith.constant dense<0.000000e+00> : vector<8x16xf32>
    %263 = tpu.matmul %261, %262, %cst_129 {dimension_numbers = #tpu.dot_dimension_numbers<[1], [1], [0], [0], [0, 0, 1, 0], [], []>} : vector<8x128xbf16>, vector<16x128xbf16>, vector<8x16xf32> -> vector<8x16xf32>
    %cst_130 = arith.constant 0.0883883461 : f32
    %264 = vector.broadcast %cst_130 : f32 to vector<8x16xf32>
    %265 = arith.mulf %263, %264 : vector<8x16xf32>
    %cst_131 = arith.constant dense<0xFF800000> : vector<8xf32>
    %266 = vector.multi_reduction <maximumf>, %265, %cst_131 [1] : vector<8x16xf32> to vector<8xf32>
    %267 = vector.shape_cast %266 : vector<8xf32> to vector<8x1xf32>
    %268 = vector.broadcast %267 : vector<8x1xf32> to vector<8x16xf32>
    %269 = arith.subf %265, %268 : vector<8x16xf32>
    %270 = math.exp %269 : vector<8x16xf32>
    %cst_132 = arith.constant dense<0.000000e+00> : vector<8xf32>
    %271 = vector.multi_reduction <add>, %270, %cst_132 [1] : vector<8x16xf32> to vector<8xf32>
    %272 = vector.shape_cast %271 : vector<8xf32> to vector<8x1xf32>
    %273 = tpu.reciprocal %272 {approx = true} : vector<8x1xf32> -> vector<8x1xf32>
    %274 = vector.broadcast %273 : vector<8x1xf32> to vector<8x16xf32>
    %275 = arith.mulf %270, %274 : vector<8x16xf32>
    %276 = arith.truncf %275 : vector<8x16xf32> to vector<8x16xbf16>
    %277 = arith.truncf %259 : vector<16x128xf32> to vector<16x128xbf16>
    %cst_133 = arith.constant dense<0.000000e+00> : vector<8x128xf32>
    %278 = tpu.matmul %276, %277, %cst_133 {dimension_numbers = #tpu.dot_dimension_numbers<[1], [0], [0], [1], [0, 0, 1, 1], [], []>} : vector<8x16xbf16>, vector<16x128xbf16>, vector<8x128xf32> -> vector<8x128xf32>
    %279 = arith.truncf %278 : vector<8x128xf32> to vector<8x128xbf16>
    %cst_134 = arith.constant dense<0.000000e+00> : vector<8x128xf32>
    %280 = tpu.matmul %279, %260, %cst_134 {dimension_numbers = #tpu.dot_dimension_numbers<[1], [0], [0], [1], [0, 0, 1, 1], [], []>} : vector<8x128xbf16>, vector<128x128xbf16>, vector<8x128xf32> -> vector<8x128xf32>
    %281 = arith.addf %234, %280 : vector<8x128xf32>
    %c0_135 = arith.constant 0 : index
    %c0_136 = arith.constant 0 : index
    %282 = vector.load %arg32[%c0_135, %c0_136] : memref<1x128xf32, #tpu.memory_space<vmem>>, vector<1x128xf32>
    %c0_137 = arith.constant 0 : index
    %c0_138 = arith.constant 0 : index
    %283 = vector.load %arg33[%c0_137, %c0_138] : memref<1x128xf32, #tpu.memory_space<vmem>>, vector<1x128xf32>
    %cst_139 = arith.constant dense<0.000000e+00> : vector<8xf32>
    %284 = vector.multi_reduction <add>, %281, %cst_139 [1] : vector<8x128xf32> to vector<8xf32>
    %285 = vector.shape_cast %284 : vector<8xf32> to vector<8x1xf32>
    %cst_140 = arith.constant 1.280000e+02 : f32
    %286 = vector.broadcast %cst_140 : f32 to vector<8x1xf32>
    %287 = arith.divf %285, %286 : vector<8x1xf32>
    %288 = vector.broadcast %287 : vector<8x1xf32> to vector<8x128xf32>
    %289 = arith.subf %281, %288 : vector<8x128xf32>
    %290 = arith.mulf %289, %289 : vector<8x128xf32>
    %cst_141 = arith.constant dense<0.000000e+00> : vector<8xf32>
    %291 = vector.multi_reduction <add>, %290, %cst_141 [1] : vector<8x128xf32> to vector<8xf32>
    %292 = vector.shape_cast %291 : vector<8xf32> to vector<8x1xf32>
    %cst_142 = arith.constant 1.280000e+02 : f32
    %293 = vector.broadcast %cst_142 : f32 to vector<8x1xf32>
    %294 = arith.divf %292, %293 : vector<8x1xf32>
    %295 = vector.broadcast %287 : vector<8x1xf32> to vector<8x128xf32>
    %296 = arith.subf %281, %295 : vector<8x128xf32>
    %cst_143 = arith.constant 9.99999997E-7 : f32
    %297 = vector.broadcast %cst_143 : f32 to vector<8x1xf32>
    %298 = arith.addf %294, %297 : vector<8x1xf32>
    %299 = math.rsqrt %298 : vector<8x1xf32>
    %300 = vector.broadcast %299 : vector<8x1xf32> to vector<8x128xf32>
    %301 = arith.mulf %296, %300 : vector<8x128xf32>
    %302 = vector.broadcast %282 : vector<1x128xf32> to vector<8x128xf32>
    %303 = arith.mulf %301, %302 : vector<8x128xf32>
    %304 = vector.broadcast %283 : vector<1x128xf32> to vector<8x128xf32>
    %305 = arith.addf %303, %304 : vector<8x128xf32>
    %c0_144 = arith.constant 0 : index
    %c0_145 = arith.constant 0 : index
    %c0_146 = arith.constant 0 : index
    %306 = vector.load %arg38[%c0_144, %c0_145, %c0_146] : memref<1x8x128xf32, #tpu.memory_space<vmem>>, vector<1x8x128xf32>
    %307 = vector.shape_cast %306 : vector<1x8x128xf32> to vector<8x128xf32>
    %308 = vector.shape_cast %305 : vector<8x128xf32> to vector<1x8x128xf32>
    tpu.vector_store %arg38[%c0_144, %c0_145, %c0_146], %308 {strides = array<i32>} : memref<1x8x128xf32, #tpu.memory_space<vmem>>, vector<1x8x128xf32>,
    return
  }
  func.func @transform_0(%arg0: i32) -> (i32, i32, i32) {
    %c0_i32 = arith.constant 0 : i32
    %c0_i32_0 = arith.constant 0 : i32
    %c0_i32_1 = arith.constant 0 : i32
    return %arg0, %c0_i32, %c0_i32_0 : i32, i32, i32
  }
  func.func @transform_1(%arg0: i32) -> (i32, i32, i32) {
    %c0_i32 = arith.constant 0 : i32
    %c0_i32_0 = arith.constant 0 : i32
    %c0_i32_1 = arith.constant 0 : i32
    return %arg0, %c0_i32, %c0_i32_0 : i32, i32, i32
  }
  func.func @transform_2(%arg0: i32) -> (i32, i32) {
    %c0_i32 = arith.constant 0 : i32
    %c0_i32_0 = arith.constant 0 : i32
    %c0_i32_1 = arith.constant 0 : i32
    return %c0_i32, %c0_i32_0 : i32, i32
  }
  func.func @transform_3(%arg0: i32) -> (i32, i32) {
    %c0_i32 = arith.constant 0 : i32
    %c0_i32_0 = arith.constant 0 : i32
    %c0_i32_1 = arith.constant 0 : i32
    return %c0_i32, %c0_i32_0 : i32, i32
  }
  func.func @transform_4(%arg0: i32) -> (i32, i32) {
    %c0_i32 = arith.constant 0 : i32
    %c0_i32_0 = arith.constant 0 : i32
    %c0_i32_1 = arith.constant 0 : i32
    return %c0_i32, %c0_i32_0 : i32, i32
  }
  func.func @transform_5(%arg0: i32) -> (i32, i32) {
    %c0_i32 = arith.constant 0 : i32
    %c0_i32_0 = arith.constant 0 : i32
    %c0_i32_1 = arith.constant 0 : i32
    return %c0_i32, %c0_i32_0 : i32, i32
  }
  func.func @transform_6(%arg0: i32) -> (i32, i32) {
    %c0_i32 = arith.constant 0 : i32
    %c0_i32_0 = arith.constant 0 : i32
    %c0_i32_1 = arith.constant 0 : i32
    return %c0_i32, %c0_i32_0 : i32, i32
  }
  func.func @transform_7(%arg0: i32) -> (i32, i32) {
    %c0_i32 = arith.constant 0 : i32
    %c0_i32_0 = arith.constant 0 : i32
    %c0_i32_1 = arith.constant 0 : i32
    return %c0_i32, %c0_i32_0 : i32, i32
  }
  func.func @transform_8(%arg0: i32) -> (i32, i32) {
    %c0_i32 = arith.constant 0 : i32
    %c0_i32_0 = arith.constant 0 : i32
    %c0_i32_1 = arith.constant 0 : i32
    return %c0_i32, %c0_i32_0 : i32, i32
  }
  func.func @transform_9(%arg0: i32) -> (i32, i32) {
    %c0_i32 = arith.constant 0 : i32
    %c0_i32_0 = arith.constant 0 : i32
    %c0_i32_1 = arith.constant 0 : i32
    return %c0_i32, %c0_i32_0 : i32, i32
  }
  func.func @transform_10(%arg0: i32) -> (i32, i32) {
    %c0_i32 = arith.constant 0 : i32
    %c0_i32_0 = arith.constant 0 : i32
    %c0_i32_1 = arith.constant 0 : i32
    return %c0_i32, %c0_i32_0 : i32, i32
  }
  func.func @transform_11(%arg0: i32) -> (i32, i32) {
    %c0_i32 = arith.constant 0 : i32
    %c0_i32_0 = arith.constant 0 : i32
    %c0_i32_1 = arith.constant 0 : i32
    return %c0_i32, %c0_i32_0 : i32, i32
  }
  func.func @transform_12(%arg0: i32) -> (i32, i32) {
    %c0_i32 = arith.constant 0 : i32
    %c0_i32_0 = arith.constant 0 : i32
    %c0_i32_1 = arith.constant 0 : i32
    return %c0_i32, %c0_i32_0 : i32, i32
  }
  func.func @transform_13(%arg0: i32) -> (i32, i32) {
    %c0_i32 = arith.constant 0 : i32
    %c0_i32_0 = arith.constant 0 : i32
    %c0_i32_1 = arith.constant 0 : i32
    return %c0_i32, %c0_i32_0 : i32, i32
  }
  func.func @transform_14(%arg0: i32) -> (i32, i32) {
    %c0_i32 = arith.constant 0 : i32
    %c0_i32_0 = arith.constant 0 : i32
    %c0_i32_1 = arith.constant 0 : i32
    return %c0_i32, %c0_i32_0 : i32, i32
  }
  func.func @transform_15(%arg0: i32) -> (i32, i32) {
    %c0_i32 = arith.constant 0 : i32
    %c0_i32_0 = arith.constant 0 : i32
    %c0_i32_1 = arith.constant 0 : i32
    return %c0_i32, %c0_i32_0 : i32, i32
  }
  func.func @transform_16(%arg0: i32) -> (i32, i32) {
    %c0_i32 = arith.constant 0 : i32
    %c0_i32_0 = arith.constant 0 : i32
    %c0_i32_1 = arith.constant 0 : i32
    return %c0_i32, %c0_i32_0 : i32, i32
  }
  func.func @transform_17(%arg0: i32) -> (i32, i32) {
    %c0_i32 = arith.constant 0 : i32
    %c0_i32_0 = arith.constant 0 : i32
    %c0_i32_1 = arith.constant 0 : i32
    return %c0_i32, %c0_i32_0 : i32, i32
  }
  func.func @transform_18(%arg0: i32) -> (i32, i32) {
    %c0_i32 = arith.constant 0 : i32
    %c0_i32_0 = arith.constant 0 : i32
    %c0_i32_1 = arith.constant 0 : i32
    return %c0_i32, %c0_i32_0 : i32, i32
  }
  func.func @transform_19(%arg0: i32) -> (i32, i32) {
    %c0_i32 = arith.constant 0 : i32
    %c0_i32_0 = arith.constant 0 : i32
    %c0_i32_1 = arith.constant 0 : i32
    return %c0_i32, %c0_i32_0 : i32, i32
  }
  func.func @transform_20(%arg0: i32) -> (i32, i32) {
    %c0_i32 = arith.constant 0 : i32
    %c0_i32_0 = arith.constant 0 : i32
    %c0_i32_1 = arith.constant 0 : i32
    return %c0_i32, %c0_i32_0 : i32, i32
  }
  func.func @transform_21(%arg0: i32) -> (i32, i32) {
    %c0_i32 = arith.constant 0 : i32
    %c0_i32_0 = arith.constant 0 : i32
    %c0_i32_1 = arith.constant 0 : i32
    return %c0_i32, %c0_i32_0 : i32, i32
  }
  func.func @transform_22(%arg0: i32) -> (i32, i32) {
    %c0_i32 = arith.constant 0 : i32
    %c0_i32_0 = arith.constant 0 : i32
    %c0_i32_1 = arith.constant 0 : i32
    return %c0_i32, %c0_i32_0 : i32, i32
  }
  func.func @transform_23(%arg0: i32) -> (i32, i32) {
    %c0_i32 = arith.constant 0 : i32
    %c0_i32_0 = arith.constant 0 : i32
    %c0_i32_1 = arith.constant 0 : i32
    return %c0_i32, %c0_i32_0 : i32, i32
  }
  func.func @transform_24(%arg0: i32) -> (i32, i32) {
    %c0_i32 = arith.constant 0 : i32
    %c0_i32_0 = arith.constant 0 : i32
    %c0_i32_1 = arith.constant 0 : i32
    return %c0_i32, %c0_i32_0 : i32, i32
  }
  func.func @transform_25(%arg0: i32) -> (i32, i32) {
    %c0_i32 = arith.constant 0 : i32
    %c0_i32_0 = arith.constant 0 : i32
    %c0_i32_1 = arith.constant 0 : i32
    return %c0_i32, %c0_i32_0 : i32, i32
  }
  func.func @transform_26(%arg0: i32) -> (i32, i32) {
    %c0_i32 = arith.constant 0 : i32
    %c0_i32_0 = arith.constant 0 : i32
    %c0_i32_1 = arith.constant 0 : i32
    return %c0_i32, %c0_i32_0 : i32, i32
  }
  func.func @transform_27(%arg0: i32) -> (i32, i32) {
    %c0_i32 = arith.constant 0 : i32
    %c0_i32_0 = arith.constant 0 : i32
    %c0_i32_1 = arith.constant 0 : i32
    return %c0_i32, %c0_i32_0 : i32, i32
  }
  func.func @transform_28(%arg0: i32) -> (i32, i32) {
    %c0_i32 = arith.constant 0 : i32
    %c0_i32_0 = arith.constant 0 : i32
    %c0_i32_1 = arith.constant 0 : i32
    return %c0_i32, %c0_i32_0 : i32, i32
  }
  func.func @transform_29(%arg0: i32) -> (i32, i32) {
    %c0_i32 = arith.constant 0 : i32
    %c0_i32_0 = arith.constant 0 : i32
    %c0_i32_1 = arith.constant 0 : i32
    return %c0_i32, %c0_i32_0 : i32, i32
  }
  func.func @transform_30(%arg0: i32) -> (i32, i32) {
    %c0_i32 = arith.constant 0 : i32
    %c0_i32_0 = arith.constant 0 : i32
    %c0_i32_1 = arith.constant 0 : i32
    return %c0_i32, %c0_i32_0 : i32, i32
  }
  func.func @transform_31(%arg0: i32) -> (i32, i32) {
    %c0_i32 = arith.constant 0 : i32
    %c0_i32_0 = arith.constant 0 : i32
    %c0_i32_1 = arith.constant 0 : i32
    return %c0_i32, %c0_i32_0 : i32, i32
  }
  func.func @transform_32(%arg0: i32) -> (i32, i32) {
    %c0_i32 = arith.constant 0 : i32
    %c0_i32_0 = arith.constant 0 : i32
    %c0_i32_1 = arith.constant 0 : i32
    return %c0_i32, %c0_i32_0 : i32, i32
  }
  func.func @transform_33(%arg0: i32) -> (i32, i32, i32) {
    %c0_i32 = arith.constant 0 : i32
    %c0_i32_0 = arith.constant 0 : i32
    %c0_i32_1 = arith.constant 0 : i32
    return %arg0, %c0_i32, %c0_i32_0 : i32, i32, i32
  }
  func.func @transform_34(%arg0: i32) -> (i32, i32, i32) {
    %c0_i32 = arith.constant 0 : i32
    %c0_i32_0 = arith.constant 0 : i32
    %c0_i32_1 = arith.constant 0 : i32
    return %arg0, %c0_i32, %c0_i32_0 : i32, i32, i32
  }
  func.func @transform_35(%arg0: i32) -> (i32, i32, i32) {
    %c0_i32 = arith.constant 0 : i32
    %c0_i32_0 = arith.constant 0 : i32
    %c0_i32_1 = arith.constant 0 : i32
    return %arg0, %c0_i32, %c0_i32_0 : i32, i32, i32
  }
  func.func @transform_36(%arg0: i32) -> (i32, i32, i32) {
    %c0_i32 = arith.constant 0 : i32
    %c0_i32_0 = arith.constant 0 : i32
    %c0_i32_1 = arith.constant 0 : i32
    return %arg0, %c0_i32, %c0_i32_0 : i32, i32, i32
  }
  func.func @transform_37(%arg0: i32) -> (i32, i32, i32) {
    %c0_i32 = arith.constant 0 : i32
    %c0_i32_0 = arith.constant 0 : i32
    %c0_i32_1 = arith.constant 0 : i32
    return %arg0, %c0_i32, %c0_i32_0 : i32, i32, i32
  }
}

</mosaic_0001>

<bundles_post_ra>
// kernel: vlm_extract_features.1
= control target key start
LH: loop header
LB: loop body
LE: loop exit
PB: predicated region body
PF: predicated region fallthrough
CT: control target
= control target key end

     0   :  { %s6124_s6 = smov 1   ;;  %s6125_s10 = smov 2   ;;  %s7160_s0 = inlined_call_operand.smem [shape: u32[38], index: -1, kind: input, shape index: {}] }
   0x1   :  { %s6179_s5 = sld [smem:[%s7160_s0]]   ;;  %s6126_s14 = smov 3  }
   0x2   :  { %s6184_s9 = sld [smem:[%s7160_s0 + %s6124_s6]]   ;;  %s6127_s18 = smov 4  }
   0x3   :  { %s6189_s13 = sld [smem:[%s7160_s0 + %s6125_s10]]   ;;  %s6128_s22 = smov 5  }
   0x4   :  { %s6194_s17 = sld [smem:[%s7160_s0 + %s6126_s14]]   ;;  %s6129_s26 = smov 6  }
   0x5   :  { %s6199_s21 = sld [smem:[%s7160_s0 + %s6127_s18]]   ;;  %s6130_s30 = smov 7  }
   0x6   :  { %s6204_s25 = sld [smem:[%s7160_s0 + %s6128_s22]]   ;;  %s6131_s4 = smov 8  }
   0x7   :  { %7193 = sst [smem:[#allocation13_spill]] %s6179_s5  ;;  %s6132_s10 = smov 9  }
   0x8   :  { %7194 = sst [smem:[#allocation14_spill]] %s6184_s9  ;;  %s6133_s15 = smov 10  }
   0x9   :  { %7195 = sst [smem:[#allocation15_spill]] %s6189_s13  ;;  %s6134_s20 = smov 11  }
   0xa   :  { %7196 = sst [smem:[#allocation16_spill]] %s6194_s17  ;;  %s6136_s1 = smov 13  }
   0xb   :  { %7197 = sst [smem:[#allocation17_spill]] %s6199_s21  ;;  %s6137_s7 = smov 14  }
   0xc   :  { %7198 = sst [smem:[#allocation18_spill]] %s6204_s25  ;;  %s6139_s22 = smov 16  }
   0xd   :  { %s6209_s29 = sld [smem:[%s7160_s0 + %s6129_s26]]   ;;  %s6135_s26 = smov 12  }
   0xe   :  { %s6214_s3 = sld [smem:[%s7160_s0 + %s6130_s30]]   ;;  %s6140_s28 = smov 17  }
   0xf   :  { %s6219_s8 = sld [smem:[%s7160_s0 + %s6131_s4]]  }
  0x10   :  { %s6224_s14 = sld [smem:[%s7160_s0 + %s6132_s10]]  }
  0x11   :  { %s6229_s19 = sld [smem:[%s7160_s0 + %s6133_s15]]   ;;  %s6138_s15 = smov 15  }
  0x12   :  { %s6234_s24 = sld [smem:[%s7160_s0 + %s6134_s20]]  }
  0x13   :  { %s6239_s30 = sld [smem:[%s7160_s0 + %s6135_s26]]  }
  0x14   :  { %7199 = sst [smem:[#allocation19_spill]] %s6214_s3 }
  0x15   :  { %7200 = sst [smem:[#allocation20_spill]] %s6219_s8 }
  0x16   :  { %7201 = sst [smem:[#allocation21_spill]] %s6224_s14 }
  0x17   :  { %7202 = sst [smem:[#allocation22_spill]] %s6229_s19 }
  0x18   :  { %7203 = sst [smem:[#allocation23_spill]] %s6234_s24 }
  0x19   :  { %s6244_s6 = sld [smem:[%s7160_s0 + %s6136_s1]]  }
  0x1a   :  { %s6249_s12 = sld [smem:[%s7160_s0 + %s6137_s7]]   ;;  %s6141_s7 = smov 18  }
  0x1b   :  { %s6254_s20 = sld [smem:[%s7160_s0 + %s6138_s15]]   ;;  %s6142_s15 = smov 19  }
  0x1c   :  { %s6259_s27 = sld [smem:[%s7160_s0 + %s6139_s22]]   ;;  %s6143_s22 = smov 20  }
  0x1d   :  { %s6264_s4 = sld [smem:[%s7160_s0 + %s6140_s28]]   ;;  %s6144_s28 = smov 21  }
  0x1f   :  { %7204 = sst [smem:[#allocation24_spill]] %s6244_s6 }
  0x20   :  { %7205 = sst [smem:[#allocation25_spill]] %s6249_s12 }
  0x21   :  { %7206 = sst [smem:[#allocation26_spill]] %s6254_s20 }
  0x22   :  { %7207 = sst [smem:[#allocation27_spill]] %s6259_s27 }
  0x23   :  { %7208 = sst [smem:[#allocation28_spill]] %s6264_s4 }
  0x24   :  { %s6269_s6 = sld [smem:[%s7160_s0 + %s6141_s7]]   ;;  %s6145_s7 = smov 22  }
  0x25   :  { %s6274_s20 = sld [smem:[%s7160_s0 + %s6142_s15]]   ;;  %s6146_s15 = smov 23  }
  0x26   :  { %s6279_s27 = sld [smem:[%s7160_s0 + %s6143_s22]]   ;;  %s6147_s22 = smov 24  }
  0x27   :  { %s6284_s4 = sld [smem:[%s7160_s0 + %s6144_s28]]   ;;  %s6148_s28 = smov 25  }
  0x2a   :  { %7209 = sst [smem:[#allocation29_spill]] %s6269_s6 }
  0x2b   :  { %7210 = sst [smem:[#allocation30_spill]] %s6274_s20 }
  0x2c   :  { %7211 = sst [smem:[#allocation31_spill]] %s6279_s27 }
  0x2d   :  { %7212 = sst [smem:[#allocation32_spill]] %s6284_s4 }
  0x2e   :  { %s6289_s6 = sld [smem:[%s7160_s0 + %s6145_s7]]   ;;  %s6149_s7 = smov 26  }
  0x2f   :  { %s6294_s20 = sld [smem:[%s7160_s0 + %s6146_s15]]   ;;  %s6150_s15 = smov 27  }
  0x30   :  { %s6299_s27 = sld [smem:[%s7160_s0 + %s6147_s22]]   ;;  %s6151_s22 = smov 28  }
  0x31   :  { %s6304_s4 = sld [smem:[%s7160_s0 + %s6148_s28]]   ;;  %s6152_s28 = smov 29  }
  0x34   :  { %7213 = sst [smem:[#allocation33_spill]] %s6289_s6 }
  0x35   :  { %7214 = sst [smem:[#allocation34_spill]] %s6294_s20 }
  0x36   :  { %7215 = sst [smem:[#allocation35_spill]] %s6299_s27 }
  0x37   :  { %7216 = sst [smem:[#allocation36_spill]] %s6304_s4 }
  0x38   :  { %s6309_s6 = sld [smem:[%s7160_s0 + %s6149_s7]]   ;;  %s6153_s7 = smov 30  }
  0x39   :  { %s6314_s20 = sld [smem:[%s7160_s0 + %s6150_s15]]   ;;  %s6154_s15 = smov 31  }
  0x3a   :  { %s6319_s27 = sld [smem:[%s7160_s0 + %s6151_s22]]   ;;  %s6155_s22 = smov 32  }
  0x3b   :  { %s6324_s4 = sld [smem:[%s7160_s0 + %s6152_s28]]   ;;  %s6156_s28 = smov 33  }
  0x3e   :  { %7217 = sst [smem:[#allocation37_spill]] %s6309_s6 }
  0x3f   :  { %7218 = sst [smem:[#allocation38_spill]] %s6314_s20 }
  0x40   :  { %7219 = sst [smem:[#allocation39_spill]] %s6319_s27 }
  0x41   :  { %7220 = sst [smem:[#allocation40_spill]] %s6324_s4 }
  0x42   :  { %s6329_s6 = sld [smem:[%s7160_s0 + %s6153_s7]]   ;;  %s6157_s7 = smov 34  }
  0x43   :  { %s6334_s20 = sld [smem:[%s7160_s0 + %s6154_s15]]   ;;  %s6158_s15 = smov 35  }
  0x44   :  { %s6339_s27 = sld [smem:[%s7160_s0 + %s6155_s22]]   ;;  %s6159_s22 = smov 36  }
  0x45   :  { %s6344_s4 = sld [smem:[%s7160_s0 + %s6156_s28]]   ;;  %s6160_s28 = smov 37  }
  0x48   :  { %7221 = sst [smem:[#allocation41_spill]] %s6329_s6 }
  0x49   :  { %7222 = sst [smem:[#allocation42_spill]] %s6334_s20 }
  0x4a   :  { %7223 = sst [smem:[#allocation43_spill]] %s6339_s27 }
  0x4b   :  { %7224 = sst [smem:[#allocation44_spill]] %s6344_s4 }
  0x4c   :  { %s6349_s6 = sld [smem:[%s7160_s0 + %s6157_s7]]  }
  0x4d   :  { %s6354_s20 = sld [smem:[%s7160_s0 + %s6158_s15]]  }
  0x4e   :  { %s6359_s27 = sld [smem:[%s7160_s0 + %s6159_s22]]  }
  0x4f   :  { %s6364_s4 = sld [smem:[%s7160_s0 + %s6160_s28]]  }
  0x54   :  { %7225 = sst [smem:[#allocation45_spill]] %s6359_s27 }
  0x55   :  { %81 = vsyncpa [#allocation3], 0 }
  0x56   :  { %83 = vsyncpa [#allocation3 + $0x1], 0 }
  0x57   :  { %84 = vsyncpa [#allocation5], 0 }
  0x58   :  { %86 = vsyncpa [#allocation5 + $0x1], 0 }
  0x59   :  { %87 = vsyncpa [#allocation8], 0 }
  0x5a   :  { %89 = vsyncpa [#allocation8 + $0x1], 0  ;;  %s6366_s7 = smov 0   ;;  %s6368_s10 = smov 0  }
  0x5b   :  { %s6370_s11 = smov 0   ;;  %s6372_s15 = smov 0  }
  0x5c LB: > { %s7226_s27 = sld [smem:[#allocation45_spill]]  ;;  %s6387_s0 = sadd.s32 4294967295, %s6122_s15   ;;  %s6114_s10 = sphi %s6368_s10, %s7271_s10   ;;  %s6110_s7 = sphi %s6366_s7, %s7270_s7   ;;  %s6122_s15 = sphi %s6372_s15, %s7273_s15   ;;  %s6118_s11 = sphi %s6370_s11, %s7272_s11  }
  0x5d   : > { %s7227_s21 = sld [smem:[#allocation17_spill]]  ;;  %s7171_s16 = sadd.s32 4294967294, %s6122_s15  }
  0x5e   : > { %s7228_s14 = sld [smem:[#allocation21_spill]]  ;;  %s6391_s18 = sadd.s32 1, %s6122_s15  }
  0x5f   : > { %s7229_s13 = sld [smem:[#allocation15_spill]]  ;;  %s805_s22 = sadd.s32 1, %s6118_s11 }
  0x60   : > { %s7230_s12 = sld [smem:[#allocation25_spill]]  ;;  %s802_s23 = ssub.s32 %s6122_s15, %s6391_s18 }
  0x61   : > { %s7231_s8 = sld [smem:[#allocation20_spill]]  ;;  %p815_p0 = scmp.ne.s32.totalorder %s6118_s11, %s6114_s10 }
  0x62   : > { %p803_p1 = scmp.eq.s32.totalorder %s802_s23, 0  ;;  %p816_p2 = scmp.eq.s32.totalorder %s6387_s0, 1 }
  0x63   : > { %p821_p3 = scmp.ne.s32.totalorder %s6114_s10, %s6110_s7  ;;  %p822_p4 = scmp.eq.s32.totalorder %s7171_s16, 1 }
  0x64   : > { %s6404_s26 = scalar_select %p803_p1, %s6118_s11, %s805_s22  }
  0x65   : > { %p6406_p5 = por %p816_p2, %p815_p0  ;;  %p6410_p6 = por %p822_p4, %p821_p3 }
  0x66   : > { %p4798_p7 = scmp.ge.s32.totalorder %s6122_s15, 1  ;;  %p1052_p8 = scmp.lt.s32.totalorder %s6122_s15, 3 }
  0x68   : > { %p1053_p9 = pnand %p4798_p7, %p1052_p8 }
  0x69   : > { %s7234_s5 = sld [smem:[#allocation13_spill]] (!%p1053_p9)  ;;  %p1168_p10 = scmp.lt.s32.totalorder (!%p1053_p9), %s6387_s0, 1 }
  0x6a   : > { %1056 = sbr.rel (%p1053_p9) target bundleno = 5693 (0x163d), region = 152  ;;  %s7235_s17 = sld [smem:[#allocation16_spill]] (!%p1053_p9) }
  0x6b   : > { %s7236_s3 = sld [smem:[#allocation19_spill]] (!%p1053_p9) }
  0x6c   : > { %s7237_s9 = sld [smem:[#allocation14_spill]] (!%p1053_p9) }
  0x6d   : > { %s7238_s25 = sld [smem:[#allocation18_spill]] (!%p1053_p9) }
  0x6e   : > { %s7239_s19 = sld [smem:[#allocation22_spill]] (!%p1053_p9) }
  0x6f   : > { %v5586_v0 = vld [vmem:[%s7229_s13 + $0x38] sm:$0xff]   ;;  %v6161_v1 = vmov 0.0   ;;  %v5587_v2 = vld [vmem:[%s7229_s13 + $0x30] sm:$0xff]   ;;  %vm6162_vm0 = vmmov 0   ;;  %v5588_v3 = vld [vmem:[%s7229_s13 + $0x28] sm:$0xff]   ;;  %s6429_s2 = scalar_select %p1168_p10, %s6387_s0, 1 }
  0x70   : > { %5269 = vmatprep.subr.bf16.mxu0 %v6161_v1  ;;  %5285 = vmatprep.mubr.msk.bf16.mxu0 %vm6162_vm0, %v6161_v1  ;;  %v5589_v4 = vld [vmem:[%s7229_s13 + $0x20] sm:$0xff]   ;;  %v5590_v5 = vld [vmem:[%s7229_s13 + $0x18] sm:$0xff]   ;;  %v5591_v6 = vld [vmem:[%s7229_s13 + $0x10] sm:$0xff]   ;;  %v6163_v47 = vmov 0   ;;  %vm1644_vm1 = vcmask 130048   ;;  %s7240_s24 = sld [smem:[#allocation23_spill]] }
  0x71   : > { %5270 = vmatpush3.bf16.msra.mxu0 %v5586_v0  ;;  %s5085_s22 = sshll.u32 %s6429_s2, 4  ;;  %v5592_v7 = vld [vmem:[%s7229_s13 + $0x8] sm:$0xff]   ;;  %v5593_v8 = vld [vmem:[%s7229_s13] sm:$0xff]   ;;  %v5597_v25 = vld [vmem:[%s7231_s8 + $0xb0] ss:$12 sps:$4 sm:$0xff]   ;;  %1531 = vmatprep.mubr.bf16.mxu1 %v6163_v47  ;;  %s7245_s16 = sld [smem:[#allocation28_spill]] }
  0x72   : > { %5271 = vmatprep.subr.bf16.mxu0 %v6161_v1  ;;  %s1172_s23 = scalar_lea.vmem %s7234_s5, %s5085_s22  ;;  %v4807_v12 = vld [vmem:[%s7235_s17] ss:$0 sm:$0xff]  ;;  %v1294_v19 = vld [vmem:[%s7227_s21 + $0x8] sm:$0xff]  ;;  %v5600_v35 = vld [vmem:[%s7231_s8 + $0x90] ss:$12 sps:$4 sm:$0xff]   ;;  %s4806_s22 = sshll.u32 %s6429_s2, 3 }
  0x73   : > { %v1178_v9 = vld [vmem:[%s1172_s23] sm:$0xff]  ;;  %v1179_v10 = vld [vmem:[%s1172_s23 + $0x8] sm:$0xff]  ;;  %v5613_v45 = vld [vmem:[%s7231_s8 + $0x50] ss:$12 sps:$4 sm:$0xff]   ;;  %s1176_s23 = scalar_lea.vmem %s7237_s9, %s4806_s22  ;;  %s7241_s2 = sld [smem:[#allocation29_spill]]  ;;  %vm3024_vm2 = vcmask 64512  }
  0x74   : > { %v1196_v11 = vpack.c.bf16 %v1179_v10, %v1178_v9  ;;  %v1293_v14 = vld [vmem:[%s7227_s21] sm:$0xff]  ;;  %v5594_v23 = vld [vmem:[%s7231_s8 + $0xac] ss:$12 sps:$4 sm:$0xff]   ;;  %v5596_v24 = vld [vmem:[%s7231_s8 + $0xa8] ss:$12 sps:$4 sm:$0xff]   ;;  %s7242_s22 = sld [smem:[#allocation24_spill]] }
  0x75   : > { %5272 = vmatpush3.bf16.msra.mxu0 %v5587_v2  ;;  %1499 = vmatprep.subr.bf16.mxu1 %v5594_v23  ;;  %v5598_v34 = vld [vmem:[%s7231_s8 + $0x94] ss:$12 sps:$4 sm:$0xff]   ;;  %v5601_v36 = vld [vmem:[%s7231_s8 + $0x98] ss:$12 sps:$4 sm:$0xff]   ;;  %v5602_v37 = vld [vmem:[%s7231_s8 + $0x7c] ss:$12 sps:$4 sm:$0xff]  }
  0x76   : > { %5273 = vmatprep.subr.bf16.mxu0 %v6161_v1  ;;  %1500 = vmatpush1.bf16.msra.mxu1 %v5596_v24  ;;  %v5604_v38 = vld [vmem:[%s7231_s8 + $0x78] ss:$12 sps:$4 sm:$0xff]   ;;  %v5605_v39 = vld [vmem:[%s7231_s8 + $0x80] ss:$12 sps:$4 sm:$0xff]   ;;  %v5609_v42 = vld [vmem:[%s7231_s8 + $0x68] ss:$12 sps:$4 sm:$0xff]  }
  0x77   : > { %1501 = vmatprep.subr.bf16.mxu1 %v5598_v34  ;;  %v5606_v40 = vld [vmem:[%s7231_s8 + $0x64] ss:$12 sps:$4 sm:$0xff]   ;;  %v5608_v41 = vld [vmem:[%s7231_s8 + $0x60] ss:$12 sps:$4 sm:$0xff]   ;;  %v5612_v44 = vld [vmem:[%s7231_s8 + $0x48] ss:$12 sps:$4 sm:$0xff]  }
  0x78   : > { %v5610_v43 = vld [vmem:[%s7231_s8 + $0x4c] ss:$12 sps:$4 sm:$0xff]   ;;  %v5614_v46 = vld [vmem:[%s7231_s8 + $0x34] ss:$12 sps:$4 sm:$0xff]   ;;  %v5616_v48 = vld [vmem:[%s7231_s8 + $0x30] ss:$12 sps:$4 sm:$0xff]  }
  0x79   : > { %5274 = vmatpush3.bf16.msra.mxu0 %v5588_v3  ;;  %v5617_v49 = vld [vmem:[%s7231_s8 + $0x38] ss:$12 sps:$4 sm:$0xff]   ;;  %v5618_v50 = vld [vmem:[%s7231_s8 + $0x1c] ss:$12 sps:$4 sm:$0xff]   ;;  %v5621_v52 = vld [vmem:[%s7231_s8 + $0x20] ss:$12 sps:$4 sm:$0xff]  }
  0x7a   : > { %5275 = vmatprep.subr.bf16.mxu0 %v6161_v1  ;;  %1502 = vmatpush1.bf16.msra.mxu1 %v5600_v35  ;;  %v5620_v51 = vld [vmem:[%s7231_s8 + $0x18] ss:$12 sps:$4 sm:$0xff]   ;;  %v5624_v54 = vld [vmem:[%s7231_s8] ss:$12 sps:$4 sm:$0xff]   ;;  %v5625_v55 = vld [vmem:[%s7231_s8 + $0x8] ss:$12 sps:$4 sm:$0xff]  }
  0x7b   : > { %1503 = vmatprep.subr.bf16.mxu1 %v5602_v37  ;;  %v5622_v53 = vld [vmem:[%s7231_s8 + $0x4] ss:$12 sps:$4 sm:$0xff]   ;;  %v4816_v0 = vld [vmem:[%s6209_s29] ss:$0 sm:$0xff]  ;;  %vm3041_vm3 = vcmask 1043456   ;;  %s7250_s8 = sld [smem:[#allocation32_spill]] }
  0x7c   : > { %s7251_s9 = sld [smem:[#allocation35_spill]]  ;;  %s6164_s21 = smov [#allocation7]  }
  0x7d   : > { %5276 = vmatpush3.bf16.msra.mxu0 %v5589_v4 }
  0x7e   : > { %5277 = vmatprep.subr.bf16.mxu0 %v6161_v1  ;;  %1504 = vmatpush1.bf16.msra.mxu1 %v5604_v38 }
  0x7f   : > { %1505 = vmatprep.subr.bf16.mxu1 %v5606_v40 }
  0x81   : > { %5278 = vmatpush3.bf16.msra.mxu0 %v5590_v5  ;;  %v4817_v5 = vld [vmem:[%s7236_s3] ss:$0 sm:$0xff] }
  0x82   : > { %5279 = vmatprep.subr.bf16.mxu0 %v6161_v1  ;;  %1506 = vmatpush1.bf16.msra.mxu1 %v5608_v41 }
  0x83   : > { %1507 = vmatprep.subr.bf16.mxu1 %v5610_v43 }
  0x85   : > { %5280 = vmatpush3.bf16.msra.mxu0 %v5591_v6 }
  0x86   : > { %5281 = vmatprep.subr.bf16.mxu0 %v6161_v1  ;;  %1508 = vmatpush1.bf16.msra.mxu1 %v5612_v44 }
  0x87   : > { %1509 = vmatprep.subr.bf16.mxu1 %v5614_v46 }
  0x89   : > { %5282 = vmatpush3.bf16.msra.mxu0 %v5592_v7 }
  0x8a   : > { %5283 = vmatprep.subr.bf16.mxu0 %v6161_v1  ;;  %1510 = vmatpush1.bf16.msra.mxu1 %v5616_v48  ;;  %v5626_v48 = vld [vmem:[%s7228_s14 + $0x38] sm:$0xff]  }
  0x8b   : > { %1511 = vmatprep.subr.bf16.mxu1 %v5618_v50  ;;  %v5627_v50 = vld [vmem:[%s7228_s14 + $0x30] sm:$0xff]  }
  0x8d   : > { %5284 = vmatpush3.bf16.msra.mxu0 %v5593_v8 }
  0x8e   : > { %5289 = vmatprep.subr.bf16.mxu0 %v6161_v1  ;;  %1512 = vmatpush1.bf16.msra.mxu1 %v5620_v51  ;;  %v5628_v51 = vld [vmem:[%s7228_s14 + $0x28] sm:$0xff]  }
  0x8f   : > { %1513 = vmatprep.subr.bf16.mxu1 %v5622_v53  ;;  %v5630_v53 = vld [vmem:[%s7228_s14 + $0x18] sm:$0xff]  }
  0x90   : > { %5286 = vmatmul.mubr.bf16.vlgmr.msra.gmra.mxu0 %v1196_v11 }
  0x91   : > { %5305 = vmatprep.mubr.msk.bf16.mxu0 %vm6162_vm0, %v6161_v1  ;;  %5290 = vmatpush3.bf16.msra.mxu0 %v5597_v25 }
  0x92   : > { %5291 = vmatprep.subr.bf16.mxu0 %v6161_v1  ;;  %1514 = vmatpush1.bf16.msra.mxu1 %v5624_v54  ;;  %v5631_v54 = vld [vmem:[%s7228_s14 + $0x10] sm:$0xff]  }
  0x93   : > { %5309 = vmatprep.subr.bf16.mxu1 %v6161_v1 }
  0x95   : > { %5292 = vmatpush3.bf16.msra.mxu0 %v5601_v36 }
  0x96   : > { %5293 = vmatprep.subr.bf16.mxu0 %v6161_v1 }
  0x99   : > { %5294 = vmatpush3.bf16.msra.mxu0 %v5605_v39 }
  0x9a   : > { %5295 = vmatprep.subr.bf16.mxu0 %v6161_v1 }
  0x9d   : > { %5296 = vmatpush3.bf16.msra.mxu0 %v5609_v42 }
  0x9e   : > { %5297 = vmatprep.subr.bf16.mxu0 %v6161_v1 }
  0xa1   : > { %5298 = vmatpush3.bf16.msra.mxu0 %v5613_v45 }
  0xa2   : > { %5299 = vmatprep.subr.bf16.mxu0 %v6161_v1 }
  0xa5   : > { %5300 = vmatpush3.bf16.msra.mxu0 %v5617_v49 }
  0xa6   : > { %5301 = vmatprep.subr.bf16.mxu0 %v6161_v1 }
  0xa9   : > { %5302 = vmatpush3.bf16.msra.mxu0 %v5621_v52  ;;  %v5629_v52 = vld [vmem:[%s7228_s14 + $0x20] sm:$0xff]  }
  0xaa   : > { %5303 = vmatprep.subr.bf16.mxu0 %v6161_v1 }
  0xad   : > { %5304 = vmatpush3.bf16.msra.mxu0 %v5625_v55  ;;  %v5632_v55 = vld [vmem:[%s7228_s14 + $0x8] sm:$0xff]  }
 0x150   : > { %v1286_v13 = vpop.f32.mrf.mxu0 }
 0x151   : > { %v1287_v15 = vadd.f32 %v4807_v12, %v1286_v13 }
 0x152   : > { %v5287_v16 = vpop.f32.mrf.mxu0 }
 0x153   : > { %v6445_v17 = vadd.f32 %v1293_v14, %v1287_v15 }
 0x154   : > { %v1289_v18 = vpop.f32.mrf.mxu0 }
 0x155   : > { %v1290_v20 = vadd.f32 %v4807_v12, %v1289_v18  ;;  %1299 = vadd.xlane.f32.xlu0 %v6445_v17 }
 0x156   : > { %v5288_v21 = vpop.f32.mrf.mxu0 }
 0x157   : > { %v6449_v22 = vadd.f32 %v1294_v19, %v1290_v20 }
 0x159   : > { %1301 = vadd.xlane.f32.xlu0 %v6449_v22 }
 0x1de   : > { %v1300_v26 = vpop.xlane.xlu0 %1299 }
 0x1df   : > { %v1304_v27 = vmul.f32 0.0078125, %v1300_v26 }
 0x1e1   : > { %v6457_v28 = vsub.f32 %v6445_v17, %v1304_v27 }
 0x1e2   : > { %v1302_v29 = vpop.xlane.xlu0 %1301 }
 0x1e3   : > { %v1305_v30 = vmul.f32 0.0078125, %v1302_v29  ;;  %v1308_v31 = vmul.f32 %v6457_v28, %v6457_v28 }
 0x1e5   : > { %v6462_v32 = vsub.f32 %v6449_v22, %v1305_v30  ;;  %1310 = vadd.xlane.f32.xlu1 %v1308_v31 }
 0x1e7   : > { %v1309_v33 = vmul.f32 %v6462_v32, %v6462_v32 }
 0x1e9   : > { %1312 = vadd.xlane.f32.xlu1 %v1309_v33 }
 0x26e   : > { %v1311_v56 = vpop.xlane.xlu1 %1310 }
 0x26f   : > { %v1314_v57 = vmul.f32 0.0078125, %v1311_v56  ;;  %v5633_v56 = vld [vmem:[%s7228_s14] sm:$0xff]   ;;  %s7004_s14 = sshll.u32 %s6387_s0, 7 }
 0x271   : > { %v1316_v58 = vadd.f32 1e-06, %v1314_v57 }
 0x272   : > { %v1313_v59 = vpop.xlane.xlu1 %1312 }
 0x273   : > { %5890 = vrsqrt.f32 %v1316_v58  ;;  %v1315_v60 = vmul.f32 0.0078125, %v1313_v59 }
 0x275   : > { %v1317_v61 = vadd.f32 1e-06, %v1315_v60 }
 0x277   : > { %5892 = vrsqrt.f32 %v1317_v61 }
 0x280   : > { %v5891_v62 = vpop.eup %5890 }
 0x281   : > { %v1320_v63 = vmul.f32 %v5891_v62, %v6457_v28 }
 0x283   : > { %v1328_v4 = vmul.f32 %v4816_v0, %v1320_v63 }
 0x284   : > { %v5893_v2 = vpop.eup %5892 }
 0x285   : > { %v1321_v3 = vmul.f32 %v5893_v2, %v6462_v32  ;;  %v1336_v7 = vadd.f32 %v4817_v5, %v1328_v4 }
 0x287   : > { %v1329_v6 = vmul.f32 %v4816_v0, %v1321_v3 }
 0x289   : > { %v1337_v8 = vadd.f32 %v4817_v5, %v1329_v6  ;;  %v5634_v5 = vld [vmem:[%s6239_s30 + $0xe0] ss:$16 sps:$4 sm:$0xff]   ;;  %v5636_v6 = vld [vmem:[%s6239_s30 + $0xe4] ss:$16 sps:$4 sm:$0xff]  }
 0x28a   : > { %2060 = vmatprep.subr.bf16.mxu0 %v5636_v6 }
 0x28b   : > { %v1370_v9 = vpack.c.bf16 %v1337_v8, %v1336_v7  ;;  %v5637_v7 = vld [vmem:[%s6239_s30 + $0xe8] ss:$16 sps:$4 sm:$0xff]   ;;  %v5639_v8 = vld [vmem:[%s6239_s30 + $0xec] ss:$16 sps:$4 sm:$0xff]  }
 0x28d   : > { %1532 = vmatmul.mubr.bf16.vlgmr.msra.gmra.mxu1 %v1370_v9  ;;  %5306 = vmatmul.mubr.bf16.vlgmr.msra.gmra.mxu0 %v1370_v9 }
 0x28e   : > { %5311 = vmatprep.mubr.msk.bf16.mxu1 %vm6162_vm0, %v6161_v1  ;;  %2092 = vmatprep.mubr.bf16.mxu0 %v6163_v47 }
 0x28f   : > { %2061 = vmatpush1.bf16.msra.mxu0 %v5634_v5 }
 0x34d   : > { %v1533_v10 = vpop.f32.mrf.mxu1  ;;  %v1576_v11 = vpop.f32.mrf.mxu0 }
 0x34f   : > { %v1535_v12 = vpop.f32.mrf.mxu1  ;;  %v5307_v13 = vpop.f32.mrf.mxu0 }
 0x351   : > { %v1537_v14 = vpop.f32.mrf.mxu1  ;;  %v1579_v15 = vpop.f32.mrf.mxu0 }
 0x352   : > { %v1599_v20 = vpack.c.bf16 %v1537_v14, %v1533_v10  ;;  %v1668_v21 = vpack.c.bf16 %v1579_v15, %v1576_v11  ;;  %v2693_v11 = vld [vmem:[%s1176_s23] sm:$0xff]  ;;  %s7243_s23 = sld [smem:[#allocation37_spill]] }
 0x353   : > { %v1539_v16 = vpop.f32.mrf.mxu1  ;;  %v5308_v18 = vpop.f32.mrf.mxu0 }
 0x354   : > { %v1600_v19 = vpack.c.bf16 %v1539_v16, %v1535_v12  ;;  %v2694_v12 = vld [vmem:[%s7238_s25] sm:$0xff] }
 0x355   : > { %v6552_v16 = vadd.f32 %v2694_v12, %v2693_v11  ;;  %v5686_v11 = vld [vmem:[%s7230_s12 + $0xf0] sm:$0xff]  }
 0x356   : > { %5310 = vmatpush3.bf16.xpose.msra.mxu1 %v1600_v19  ;;  %v5642_v19 = vld [vmem:[%s6239_s30 + $0xc4] ss:$16 sps:$4 sm:$0xff]  }
 0x357   : > { %5315 = vmatprep.subr.bf16.mxu1 %v6161_v1  ;;  %2062 = vmatprep.subr.bf16.mxu0 %v5642_v19  ;;  %v5687_v12 = vld [vmem:[%s7230_s12 + $0x70] sm:$0xff]   ;;  %v5692_v19 = vld [vmem:[%s7230_s12 + $0xa8] sm:$0xff]  }
 0x35d   : > { %5312 = vmatmul.mubr.bf16.vlgmr.msra.gmra.mxu1 %v1599_v20  ;;  %v5645_v20 = vld [vmem:[%s6239_s30 + $0xcc] ss:$16 sps:$4 sm:$0xff]  }
 0x35e   : > { %5316 = vmatpush3.bf16.msra.mxu1 %v1668_v21  ;;  %5317 = vmatprep.mubr.msk.bf16.mxu1 %vm6162_vm0, %v6161_v1  ;;  %v5640_v21 = vld [vmem:[%s6239_s30 + $0xc0] ss:$16 sps:$4 sm:$0xff]  }
 0x35f   : > { %5321 = vmatprep.subr.bf16.mxu1 %v6161_v1  ;;  %2063 = vmatpush1.bf16.msra.mxu0 %v5640_v21  ;;  %v5694_v21 = vld [vmem:[%s7230_s12 + $0xe0] sm:$0xff]  }
 0x41d   : > { %v1635_v23 = vpop.f32.mrf.mxu1 }
 0x41e   : > { %v1642_v24 = vmul.f32 0.088388346, %v1635_v23  ;;  %v5643_v23 = vld [vmem:[%s6239_s30 + $0xc8] ss:$16 sps:$4 sm:$0xff]  }
 0x41f   : > { %v5313_v25 = vpop.f32.mrf.mxu1 }
 0x420   : > { %v1645_v26 = vsel %vm1644_vm1, %v1642_v24, -inf  ;;  %v5651_v25 = vld [vmem:[%s6239_s30 + $0xac] ss:$16 sps:$4 sm:$0xff]  }
 0x421   : > { %1646 = vmax.xlane.f32.xlu0 %v1645_v26  ;;  %v1638_v27 = vpop.f32.mrf.mxu1  ;;  %v5646_v26 = vld [vmem:[%s6239_s30 + $0xa0] ss:$16 sps:$4 sm:$0xff]  }
 0x422   : > { %v1643_v28 = vmul.f32 0.088388346, %v1638_v27  ;;  %v5649_v27 = vld [vmem:[%s6239_s30 + $0xa8] ss:$16 sps:$4 sm:$0xff]  }
 0x423   : > { %v5314_v29 = vpop.f32.mrf.mxu1 }
 0x424   : > { %v1648_v30 = vsel %vm1644_vm1, %v1643_v28, -inf  ;;  %v5654_v29 = vld [vmem:[%s6239_s30 + $0x84] ss:$16 sps:$4 sm:$0xff]  }
 0x425   : > { %1649 = vmax.xlane.f32.xlu1 %v1648_v30  ;;  %v5655_v30 = vld [vmem:[%s6239_s30 + $0x88] ss:$16 sps:$4 sm:$0xff]  }
 0x4aa   : > { %v1647_v31 = vpop.xlane.xlu0 %1646 }
 0x4ab   : > { %v1651_v32 = vsub.f32 %v1642_v24, %v1647_v31  ;;  %v5648_v24 = vld [vmem:[%s6239_s30 + $0xa4] ss:$16 sps:$4 sm:$0xff]   ;;  %v5657_v31 = vld [vmem:[%s6239_s30 + $0x8c] ss:$16 sps:$4 sm:$0xff]  }
 0x4ac   : > { %2064 = vmatprep.subr.bf16.mxu0 %v5648_v24  ;;  %v5696_v24 = vld [vmem:[%s7230_s12 + $0xa0] sm:$0xff]  }
 0x4ad   : > { %v1653_v33 = vmul.f32 1.442695, %v1651_v32  ;;  %2065 = vmatpush1.bf16.msra.mxu0 %v5646_v26  ;;  %v5660_v32 = vld [vmem:[%s6239_s30 + $0x64] ss:$16 sps:$4 sm:$0xff]   ;;  %v5698_v26 = vld [vmem:[%s7230_s12 + $0xd8] sm:$0xff]  }
 0x4ae   : > { %v1650_v34 = vpop.xlane.xlu1 %1649  ;;  %2066 = vmatprep.subr.bf16.mxu0 %v5654_v29  ;;  %v5701_v29 = vld [vmem:[%s7230_s12 + $0x18] sm:$0xff]  }
 0x4af   : > { %5894 = vpow2.f32 %v1653_v33  ;;  %v1652_v35 = vsub.f32 %v1643_v28, %v1650_v34  ;;  %v5652_v28 = vld [vmem:[%s6239_s30 + $0x80] ss:$16 sps:$4 sm:$0xff]   ;;  %v5663_v34 = vld [vmem:[%s6239_s30 + $0x6c] ss:$16 sps:$4 sm:$0xff]  }
 0x4b0   : > { %v5658_v33 = vld [vmem:[%s6239_s30 + $0x60] ss:$16 sps:$4 sm:$0xff]  }
 0x4b1   : > { %v1655_v36 = vmul.f32 1.442695, %v1652_v35  ;;  %2067 = vmatpush1.bf16.msra.mxu0 %v5652_v28  ;;  %v5661_v35 = vld [vmem:[%s6239_s30 + $0x68] ss:$16 sps:$4 sm:$0xff]  }
 0x4b2   : > { %2068 = vmatprep.subr.bf16.mxu0 %v5660_v32  ;;  %v5700_v28 = vld [vmem:[%s7230_s12 + $0x98] sm:$0xff]   ;;  %v5704_v32 = vld [vmem:[%s7230_s12 + $0x90] sm:$0xff]  }
 0x4b3   : > { %5896 = vpow2.f32 %v1655_v36  ;;  %v5666_v36 = vld [vmem:[%s6239_s30 + $0x44] ss:$16 sps:$4 sm:$0xff]  }
 0x4b5   : > { %2069 = vmatpush1.bf16.msra.mxu0 %v5658_v33  ;;  %v5705_v33 = vld [vmem:[%s7230_s12 + $0x10] sm:$0xff]  }
 0x4b6   : > { %2070 = vmatprep.subr.bf16.mxu0 %v5666_v36  ;;  %v5708_v36 = vld [vmem:[%s7230_s12 + $0x88] sm:$0xff]  }
 0x4bc   : > { %v5895_v37 = vpop.eup %5894 }
 0x4bd   : > { %v1657_v38 = vsel %vm1644_vm1, %v5895_v37, 0.0 }
 0x4be   : > { %1658 = vadd.xlane.f32.xlu0 %v1657_v38  ;;  %v5664_v38 = vld [vmem:[%s6239_s30 + $0x40] ss:$16 sps:$4 sm:$0xff]  }
 0x4bf   : > { %2071 = vmatpush1.bf16.msra.mxu0 %v5664_v38  ;;  %v5710_v38 = vld [vmem:[%s7230_s12 + $0xc0] sm:$0xff]  }
 0x4c0   : > { %v5897_v39 = vpop.eup %5896 }
 0x4c1   : > { %v1660_v40 = vsel %vm1644_vm1, %v5897_v39, 0.0 }
 0x4c2   : > { %1661 = vadd.xlane.f32.xlu1 %v1660_v40  ;;  %v5672_v40 = vld [vmem:[%s6239_s30 + $0x24] ss:$16 sps:$4 sm:$0xff]  }
 0x4c3   : > { %2072 = vmatprep.subr.bf16.mxu0 %v5672_v40  ;;  %v5712_v40 = vld [vmem:[%s7230_s12 + $0x80] sm:$0xff]  }
 0x547   : > { %v1659_v41 = vpop.xlane.xlu0 %1658 }
 0x548   : > { %5898 = vrcp.f32 %v1659_v41  ;;  %v5675_v41 = vld [vmem:[%s6239_s30 + $0x2c] ss:$16 sps:$4 sm:$0xff]  }
 0x54b   : > { %v1662_v42 = vpop.xlane.xlu1 %1661 }
 0x54c   : > { %5900 = vrcp.f32 %v1662_v42  ;;  %v5670_v42 = vld [vmem:[%s6239_s30 + $0x20] ss:$16 sps:$4 sm:$0xff]  }
 0x54d   : > { %2073 = vmatpush1.bf16.msra.mxu0 %v5670_v42  ;;  %v5716_v42 = vld [vmem:[%s7241_s2 + $0xac] ss:$12 sps:$4 sm:$0xff]  }
 0x555   : > { %v5899_v43 = vpop.eup %5898 }
 0x556   : > { %v1665_v45 = vmul.f32 %v5899_v43, %v5895_v37  ;;  %v5669_v37 = vld [vmem:[%s6239_s30 + $0x4c] ss:$16 sps:$4 sm:$0xff]   ;;  %v5673_v43 = vld [vmem:[%s6239_s30 + $0x28] ss:$16 sps:$4 sm:$0xff]  }
 0x559   : > { %v5901_v44 = vpop.eup %5900 }
 0x55a   : > { %v1666_v46 = vmul.f32 %v5901_v44, %v5897_v39  ;;  %v5667_v39 = vld [vmem:[%s6239_s30 + $0x48] ss:$16 sps:$4 sm:$0xff]   ;;  %v5678_v44 = vld [vmem:[%s6239_s30 + $0x4] ss:$16 sps:$4 sm:$0xff]  }
 0x55b   : > { %2074 = vmatprep.subr.bf16.mxu0 %v5678_v44 }
 0x55c   : > { %v1667_v49 = vpack.c.bf16 %v1666_v46, %v1665_v45  ;;  %v5681_v45 = vld [vmem:[%s6239_s30 + $0xc] ss:$16 sps:$4 sm:$0xff]   ;;  %v5676_v46 = vld [vmem:[%s6239_s30] ss:$16 sps:$4 sm:$0xff]  }
 0x55d   : > { %2075 = vmatpush1.bf16.msra.mxu0 %v5676_v46 }
 0x55e   : > { %5318 = vmatmul.mubr.msk.bf16.vlgmr.msra.gmra.mxu1 %vm1644_vm1, %v1667_v49 }
 0x55f   : > { %5322 = vmatpush3.bf16.msra.mxu1 %v5626_v48  ;;  %5337 = vmatprep.mubr.msk.bf16.mxu1 %vm6162_vm0, %v6161_v1  ;;  %v5679_v48 = vld [vmem:[%s6239_s30 + $0x8] ss:$16 sps:$4 sm:$0xff]  }
 0x560   : > { %5323 = vmatprep.subr.bf16.mxu1 %v6161_v1 }
 0x563   : > { %5324 = vmatpush3.bf16.msra.mxu1 %v5627_v50 }
 0x564   : > { %5325 = vmatprep.subr.bf16.mxu1 %v6161_v1 }
 0x567   : > { %5326 = vmatpush3.bf16.msra.mxu1 %v5628_v51 }
 0x568   : > { %5327 = vmatprep.subr.bf16.mxu1 %v6161_v1 }
 0x56b   : > { %5328 = vmatpush3.bf16.msra.mxu1 %v5629_v52 }
 0x56c   : > { %5329 = vmatprep.subr.bf16.mxu1 %v6161_v1 }
 0x56f   : > { %5330 = vmatpush3.bf16.msra.mxu1 %v5630_v53 }
 0x570   : > { %5331 = vmatprep.subr.bf16.mxu1 %v6161_v1 }
 0x573   : > { %5332 = vmatpush3.bf16.msra.mxu1 %v5631_v54 }
 0x574   : > { %5333 = vmatprep.subr.bf16.mxu1 %v6161_v1 }
 0x577   : > { %5334 = vmatpush3.bf16.msra.mxu1 %v5632_v55 }
 0x578   : > { %5335 = vmatprep.subr.bf16.mxu1 %v6161_v1 }
 0x57b   : > { %5336 = vmatpush3.bf16.msra.mxu1 %v5633_v56 }
 0x57c   : > { %2103 = vmatprep.subr.bf16.mxu1 %v5639_v8 }
 0x61e   : > { %v1706_v57 = vpop.f32.mrf.mxu1 }
 0x620   : > { %v5319_v58 = vpop.f32.mrf.mxu1 }
 0x622   : > { %v1709_v59 = vpop.f32.mrf.mxu1 }
 0x623   : > { %v1713_v60 = vpack.c.bf16 %v1709_v59, %v1706_v57 }
 0x624   : > { %v5320_v61 = vpop.f32.mrf.mxu1 }
 0x625   : > { %5338 = vmatmul.mubr.bf16.vlgmr.msra.gmra.mxu1 %v1713_v60  ;;  %v4851_v61 = vld [vmem:[%s7239_s19] ss:$0 sm:$0xff] }
 0x626   : > { %2135 = vmatprep.mubr.bf16.mxu1 %v6163_v47  ;;  %2104 = vmatpush1.bf16.msra.mxu1 %v5637_v7 }
 0x627   : > { %2105 = vmatprep.subr.bf16.mxu1 %v5645_v20  ;;  %v5693_v20 = vld [vmem:[%s7230_s12 + $0x28] sm:$0xff]  }
 0x62a   : > { %2106 = vmatpush1.bf16.msra.mxu1 %v5643_v23  ;;  %v5695_v23 = vld [vmem:[%s7230_s12 + $0x60] sm:$0xff]  }
 0x62b   : > { %2107 = vmatprep.subr.bf16.mxu1 %v5651_v25  ;;  %v5697_v25 = vld [vmem:[%s7230_s12 + $0x20] sm:$0xff]  }
 0x62e   : > { %2108 = vmatpush1.bf16.msra.mxu1 %v5649_v27  ;;  %v5699_v27 = vld [vmem:[%s7230_s12 + $0x58] sm:$0xff]  }
 0x62f   : > { %2109 = vmatprep.subr.bf16.mxu1 %v5657_v31  ;;  %v5703_v31 = vld [vmem:[%s7230_s12 + $0x50] sm:$0xff]  }
 0x632   : > { %2110 = vmatpush1.bf16.msra.mxu1 %v5655_v30  ;;  %v5702_v30 = vld [vmem:[%s7230_s12 + $0xd0] sm:$0xff]  }
 0x633   : > { %2111 = vmatprep.subr.bf16.mxu1 %v5663_v34  ;;  %v5706_v34 = vld [vmem:[%s7230_s12 + $0xc8] sm:$0xff]  }
 0x636   : > { %2112 = vmatpush1.bf16.msra.mxu1 %v5661_v35  ;;  %v5707_v35 = vld [vmem:[%s7230_s12 + $0x48] sm:$0xff]  }
 0x637   : > { %2113 = vmatprep.subr.bf16.mxu1 %v5669_v37  ;;  %v5709_v37 = vld [vmem:[%s7230_s12 + $0x8] sm:$0xff]  }
 0x63a   : > { %2114 = vmatpush1.bf16.msra.mxu1 %v5667_v39  ;;  %v5711_v39 = vld [vmem:[%s7230_s12 + $0x40] sm:$0xff]  }
 0x63b   : > { %2115 = vmatprep.subr.bf16.mxu1 %v5675_v41  ;;  %v5713_v41 = vld [vmem:[%s7230_s12] sm:$0xff]  }
 0x63e   : > { %2116 = vmatpush1.bf16.msra.mxu1 %v5673_v43  ;;  %v1880_v43 = vlaneseq }
 0x63f   : > { %2117 = vmatprep.subr.bf16.mxu1 %v5681_v45 }
 0x640   : > { %v6628_v44 = vshrl.u32 %v1880_v43, 7 }
 0x642   : > { %2118 = vmatpush1.bf16.msra.mxu1 %v5679_v48  ;;  %v1882_v45 = vsub.s32 0, %v6628_v44  ;;  %v1890_v46 = vsub.s32 2, %v6628_v44  ;;  %v1878_v48 = vld [vmem:[%s7242_s22] sm:$0xf]  ;;  %s7244_s22 = sld [smem:[#allocation27_spill]] }
 0x6e5   : > { %v1796_v62 = vpop.f32.mrf.mxu1 }
 0x6e6   : > { %v6530_v63 = vadd.f32 %v1796_v62, %v6445_v17 }
 0x6e7   : > { %v5339_v0 = vpop.f32.mrf.mxu1 }
 0x6e8   : > { %1807 = vadd.xlane.f32.xlu0 %v6530_v63 }
 0x6e9   : > { %v1799_v2 = vpop.f32.mrf.mxu1 }
 0x6ea   : > { %v6534_v3 = vadd.f32 %v1799_v2, %v6449_v22 }
 0x6eb   : > { %v5340_v4 = vpop.f32.mrf.mxu1 }
 0x6ec   : > { %1809 = vadd.xlane.f32.xlu1 %v6534_v3  ;;  %v4852_v4 = vld [vmem:[%s7240_s24] ss:$0 sm:$0xff] }
 0x771   : > { %v1808_v17 = vpop.xlane.xlu0 %1807 }
 0x772   : > { %v1811_v9 = vmul.f32 0.0078125, %v1808_v17  ;;  %v5682_v17 = vld [vmem:[%s7230_s12 + $0xf8] sm:$0xff]  }
 0x773   : > { %5141 = vmatprep.subr.bf16.mxu1 %v5682_v17 }
 0x774   : > { %v6544_v22 = vsub.f32 %v6530_v63, %v1811_v9  ;;  %v5683_v9 = vld [vmem:[%s7230_s12 + $0x78] sm:$0xff]  }
 0x775   : > { %v1810_v10 = vpop.xlane.xlu1 %1809  ;;  %5119 = vmatprep.subr.bf16.mxu0 %v5683_v9 }
 0x776   : > { %v1812_v13 = vmul.f32 0.0078125, %v1810_v10  ;;  %v1815_v14 = vmul.f32 %v6544_v22, %v6544_v22  ;;  %v5685_v10 = vld [vmem:[%s7230_s12 + $0x38] sm:$0xff]  }
 0x778   : > { %v6550_v15 = vsub.f32 %v6534_v3, %v1812_v13  ;;  %1817 = vadd.xlane.f32.xlu0 %v1815_v14  ;;  %v5688_v13 = vld [vmem:[%s7230_s12 + $0xb0] sm:$0xff]  }
 0x779   : > { %v5689_v14 = vld [vmem:[%s7230_s12 + $0x30] sm:$0xff]  }
 0x77a   : > { %v1816_v18 = vmul.f32 %v6550_v15, %v6550_v15 }
 0x77c   : > { %2698 = vadd.xlane.f32.xlu0 %v6552_v16  ;;  %1819 = vadd.xlane.f32.xlu1 %v1816_v18  ;;  %v5691_v18 = vld [vmem:[%s7230_s12 + $0x68] sm:$0xff]  }
 0x801   : > { %v1818_v49 = vpop.xlane.xlu0 %1817 }
 0x802   : > { %v1821_v50 = vmul.f32 0.0078125, %v1818_v49  ;;  %v1886_v49 = vsub.s32 1, %v6628_v44 }
 0x804   : > { %v1823_v51 = vadd.f32 1e-06, %v1821_v50  ;;  %v1894_v50 = vsub.s32 3, %v6628_v44 }
 0x805   : > { %v2699_v52 = vpop.xlane.xlu0 %2698  ;;  %v1820_v53 = vpop.xlane.xlu1 %1819 }
 0x806   : > { %5902 = vrsqrt.f32 %v1823_v51  ;;  %v2700_v54 = vmul.f32 0.0078125, %v2699_v52  ;;  %v1822_v55 = vmul.f32 0.0078125, %v1820_v53  ;;  %v1883_v51 = vrot.slane %v1878_v48, %v1882_v45 }
 0x807   : > { %v1891_v52 = vrot.slane %v1878_v48, %v1890_v46  ;;  %v1887_v53 = vrot.slane %v1878_v48, %v1886_v49 }
 0x808   : > { %v6586_v56 = vsub.f32 %v6552_v16, %v2700_v54  ;;  %v1824_v57 = vadd.f32 1e-06, %v1822_v55  ;;  %v1895_v54 = vrot.slane %v1878_v48, %v1894_v50 }
 0x80a   : > { %5904 = vrsqrt.f32 %v1824_v57  ;;  %v2702_v58 = vmul.f32 %v6586_v56, %v6586_v56 }
 0x80c   : > { %2703 = vadd.xlane.f32.xlu1 %v2702_v58 }
 0x813   : > { %v5903_v59 = vpop.eup %5902 }
 0x814   : > { %v1827_v60 = vmul.f32 %v5903_v59, %v6544_v22  ;;  %v5684_v22 = vld [vmem:[%s7230_s12 + $0xb8] sm:$0xff]  }
 0x816   : > { %v1835_v2 = vmul.f32 %v4851_v61, %v1827_v60 }
 0x817   : > { %v5905_v62 = vpop.eup %5904 }
 0x818   : > { %v1828_v0 = vmul.f32 %v5905_v62, %v6550_v15  ;;  %v1843_v6 = vadd.f32 %v4852_v4, %v1835_v2  ;;  %v5690_v15 = vld [vmem:[%s7230_s12 + $0xe8] sm:$0xff]   ;;  %s7188_s12 = sand.u32 1, %s6387_s0  }
 0x819   : > { %s7010_s19 = scalar_lea.sflag [#allocation8], %s7188_s12 }
 0x81a   : > { %v1836_v5 = vmul.f32 %v4851_v61, %v1828_v0 }
 0x81c   : > { %v1844_v7 = vadd.f32 %v4852_v4, %v1836_v5 }
 0x81e   : > { %v1877_v8 = vpack.c.bf16 %v1844_v7, %v1843_v6 }
 0x820   : > { %2093 = vmatmul.mubr.bf16.vlgmr.msra.gmra.mxu0 %v1877_v8  ;;  %2136 = vmatmul.mubr.bf16.vlgmr.msra.gmra.mxu1 %v1877_v8 }
 0x821   : > { %5142 = vmatpush3.bf16.msra.mxu1 %v5684_v22  ;;  %5120 = vmatpush3.bf16.msra.mxu0 %v5685_v10 }
 0x822   : > { %5143 = vmatprep.subr.bf16.mxu1 %v5686_v11  ;;  %5121 = vmatprep.subr.bf16.mxu0 %v5687_v12 }
 0x825   : > { %5144 = vmatpush3.bf16.msra.mxu1 %v5688_v13  ;;  %5122 = vmatpush3.bf16.msra.mxu0 %v5689_v14 }
 0x826   : > { %5145 = vmatprep.subr.bf16.mxu1 %v5690_v15  ;;  %5123 = vmatprep.subr.bf16.mxu0 %v5691_v18 }
 0x829   : > { %5146 = vmatpush3.bf16.msra.mxu1 %v5692_v19  ;;  %5124 = vmatpush3.bf16.msra.mxu0 %v5693_v20 }
 0x82a   : > { %5147 = vmatprep.subr.bf16.mxu1 %v5694_v21  ;;  %5125 = vmatprep.subr.bf16.mxu0 %v5695_v23 }
 0x82d   : > { %5148 = vmatpush3.bf16.msra.mxu1 %v5696_v24  ;;  %5126 = vmatpush3.bf16.msra.mxu0 %v5697_v25 }
 0x82e   : > { %5149 = vmatprep.subr.bf16.mxu1 %v5698_v26  ;;  %5127 = vmatprep.subr.bf16.mxu0 %v5699_v27 }
 0x831   : > { %5150 = vmatpush3.bf16.msra.mxu1 %v5700_v28  ;;  %5128 = vmatpush3.bf16.msra.mxu0 %v5701_v29 }
 0x832   : > { %5151 = vmatprep.subr.bf16.mxu1 %v5702_v30  ;;  %5129 = vmatprep.subr.bf16.mxu0 %v5703_v31 }
 0x835   : > { %5152 = vmatpush3.bf16.msra.mxu1 %v5704_v32  ;;  %5130 = vmatpush3.bf16.msra.mxu0 %v5705_v33 }
 0x836   : > { %5153 = vmatprep.subr.bf16.mxu1 %v5706_v34  ;;  %5131 = vmatprep.subr.bf16.mxu0 %v5707_v35 }
 0x839   : > { %5154 = vmatpush3.bf16.msra.mxu1 %v5708_v36  ;;  %5132 = vmatpush3.bf16.msra.mxu0 %v5709_v37 }
 0x83a   : > { %5155 = vmatprep.subr.bf16.mxu1 %v5710_v38  ;;  %5133 = vmatprep.subr.bf16.mxu0 %v5711_v39 }
 0x83d   : > { %5156 = vmatpush3.bf16.msra.mxu1 %v5712_v40  ;;  %5134 = vmatpush3.bf16.msra.mxu0 %v5713_v41 }
 0x83e   : > { %5341 = vmatprep.subr.bf16.mxu0 %v6161_v1  ;;  %2884 = vmatprep.subr.bf16.mxu1 %v5716_v42 }
 0x8e0   : > { %v2094_v55 = vpop.f32.mrf.mxu0  ;;  %v2137_v57 = vpop.f32.mrf.mxu1 }
 0x8e1   : > { %v6643_v58 = vadd.f32 %v2094_v55, %v1883_v51  ;;  %v6645_v59 = vadd.f32 %v2137_v57, %v1891_v52 }
 0x8e2   : > { %v2096_v60 = vpop.f32.mrf.mxu0  ;;  %v2139_v61 = vpop.f32.mrf.mxu1 }
 0x8e3   : > { %v2146_v62 = vmul.f32 %v6643_v58, %v6643_v58  ;;  %v2148_v0 = vmul.f32 %v6645_v59, %v6645_v59  ;;  %v6651_v2 = vadd.f32 %v2096_v60, %v1887_v53  ;;  %v6653_v4 = vadd.f32 %v2139_v61, %v1895_v54 }
 0x8e4   : > { %v2098_v5 = vpop.f32.mrf.mxu0  ;;  %v2141_v6 = vpop.f32.mrf.mxu1 }
 0x8e5   : > { %v2154_v7 = vmul.f32 %v2146_v62, %v6643_v58  ;;  %v2156_v8 = vmul.f32 %v2148_v0, %v6645_v59  ;;  %v2147_v17 = vmul.f32 %v6651_v2, %v6651_v2  ;;  %v2149_v9 = vmul.f32 %v6653_v4, %v6653_v4 }
 0x8e6   : > { %v6661_v22 = vadd.f32 %v2098_v5, %v1883_v51  ;;  %v6663_v10 = vadd.f32 %v2141_v6, %v1891_v52  ;;  %v2100_v11 = vpop.f32.mrf.mxu0  ;;  %v2143_v12 = vpop.f32.mrf.mxu1 }
 0x8e7   : > { %v2162_v13 = vmul.f32 0.044715, %v2154_v7  ;;  %v2164_v14 = vmul.f32 0.044715, %v2156_v8  ;;  %v2155_v15 = vmul.f32 %v2147_v17, %v6651_v2  ;;  %v2157_v18 = vmul.f32 %v2149_v9, %v6653_v4 }
 0x8e8   : > { %v2150_v19 = vmul.f32 %v6661_v22, %v6661_v22  ;;  %v2152_v20 = vmul.f32 %v6663_v10, %v6663_v10  ;;  %v6671_v21 = vadd.f32 %v2100_v11, %v1887_v53  ;;  %v6673_v23 = vadd.f32 %v2143_v12, %v1895_v54 }
 0x8e9   : > { %v2170_v24 = vadd.f32 %v2162_v13, %v6643_v58  ;;  %v2172_v25 = vadd.f32 %v2164_v14, %v6645_v59  ;;  %v2163_v26 = vmul.f32 0.044715, %v2155_v15  ;;  %v2165_v27 = vmul.f32 0.044715, %v2157_v18 }
 0x8ea   : > { %v2158_v28 = vmul.f32 %v2150_v19, %v6661_v22  ;;  %v2160_v29 = vmul.f32 %v2152_v20, %v6663_v10  ;;  %v2151_v30 = vmul.f32 %v6671_v21, %v6671_v21  ;;  %v2153_v31 = vmul.f32 %v6673_v23, %v6673_v23 }
 0x8eb   : > { %v2178_v32 = vmul.f32 0.7978846, %v2170_v24  ;;  %v2180_v33 = vmul.f32 0.7978846, %v2172_v25  ;;  %v2171_v34 = vadd.f32 %v2163_v26, %v6651_v2  ;;  %v2173_v35 = vadd.f32 %v2165_v27, %v6653_v4  ;;  %v2704_v24 = vpop.xlane.xlu1 %2703 }
 0x8ec   : > { %v2166_v36 = vmul.f32 0.044715, %v2158_v28  ;;  %v2168_v37 = vmul.f32 0.044715, %v2160_v29  ;;  %v2159_v38 = vmul.f32 %v2151_v30, %v6671_v21  ;;  %v2161_v39 = vmul.f32 %v2153_v31, %v6673_v23 }
 0x8ed   : > { %5906 = vtanh.f32 %v2178_v32  ;;  %v2179_v40 = vmul.f32 0.7978846, %v2171_v34  ;;  %v2181_v41 = vmul.f32 0.7978846, %v2173_v35 }
 0x8ee   : > { %5908 = vtanh.f32 %v2180_v33  ;;  %v2174_v42 = vadd.f32 %v2166_v36, %v6661_v22  ;;  %v2176_v43 = vadd.f32 %v2168_v37, %v6663_v10  ;;  %v2167_v48 = vmul.f32 0.044715, %v2159_v38 }
 0x8ef   : > { %5910 = vtanh.f32 %v2179_v40  ;;  %v2169_v51 = vmul.f32 0.044715, %v2161_v39  ;;  %v2705_v33 = vmul.f32 0.0078125, %v2704_v24 }
 0x8f0   : > { %5912 = vtanh.f32 %v2181_v41  ;;  %v2182_v52 = vmul.f32 0.7978846, %v2174_v42  ;;  %v2184_v53 = vmul.f32 0.7978846, %v2176_v43  ;;  %v2175_v54 = vadd.f32 %v2167_v48, %v6671_v21  ;;  %v5738_v41 = vld [vmem:[%s7243_s23 + $0x38] sm:$0xff]  }
 0x8f1   : > { %v2177_v55 = vadd.f32 %v2169_v51, %v6673_v23  ;;  %v5714_v43 = vld [vmem:[%s7241_s2 + $0xa8] ss:$12 sps:$4 sm:$0xff]   ;;  %v2706_v48 = vadd.f32 1e-06, %v2705_v33  ;;  %v5720_v51 = vld [vmem:[%s7241_s2 + $0x78] ss:$12 sps:$4 sm:$0xff]  }
 0x8f2   : > { %5914 = vtanh.f32 %v2182_v52  ;;  %v2183_v57 = vmul.f32 0.7978846, %v2175_v54  ;;  %v5725_v52 = vld [vmem:[%s7241_s2 + $0x64] ss:$12 sps:$4 sm:$0xff]   ;;  %v5723_v54 = vld [vmem:[%s7241_s2 + $0x60] ss:$12 sps:$4 sm:$0xff]  }
 0x8f3   : > { %5916 = vtanh.f32 %v2184_v53  ;;  %v2185_v60 = vmul.f32 0.7978846, %v2177_v55  ;;  %v5741_v53 = vld [vmem:[%s7243_s23 + $0x20] sm:$0xff]   ;;  %v5728_v55 = vld [vmem:[%s7241_s2 + $0x4c] ss:$12 sps:$4 sm:$0xff]  }
 0x8f4   : > { %5918 = vtanh.f32 %v2183_v57  ;;  %v5726_v57 = vld [vmem:[%s7241_s2 + $0x48] ss:$12 sps:$4 sm:$0xff]  }
 0x8f5   : > { %5920 = vtanh.f32 %v2185_v60  ;;  %v5731_v60 = vld [vmem:[%s7241_s2 + $0x34] ss:$12 sps:$4 sm:$0xff]  }
 0x8f6   : > { %5922 = vrsqrt.f32 %v2706_v48 }
 0x8fa   : > { %v5907_v61 = vpop.eup %5906 }
 0x8fb   : > { %v5909_v62 = vpop.eup %5908  ;;  %v2194_v8 = vadd.f32 1.0, %v5907_v61 }
 0x8fc   : > { %v5911_v0 = vpop.eup %5910  ;;  %v2196_v11 = vadd.f32 1.0, %v5909_v62  ;;  %v5729_v62 = vld [vmem:[%s7241_s2 + $0x30] ss:$12 sps:$4 sm:$0xff]  }
 0x8fd   : > { %v5913_v5 = vpop.eup %5912  ;;  %v2195_v6 = vadd.f32 1.0, %v5911_v0  ;;  %v2202_v25 = vmul.f32 0.5, %v2194_v8  ;;  %v5734_v0 = vld [vmem:[%s7241_s2 + $0x1c] ss:$12 sps:$4 sm:$0xff]   ;;  %v5737_v8 = vld [vmem:[%s7241_s2 + $0x4] ss:$12 sps:$4 sm:$0xff]  }
 0x8fe   : > { %v2197_v17 = vadd.f32 1.0, %v5913_v5  ;;  %v2204_v29 = vmul.f32 0.5, %v2196_v11  ;;  %v5735_v11 = vld [vmem:[%s7241_s2] ss:$12 sps:$4 sm:$0xff]  }
 0x8ff   : > { %v5915_v7 = vpop.eup %5914  ;;  %v2203_v20 = vmul.f32 0.5, %v2195_v6  ;;  %v2210_v37 = vmul.f32 %v2202_v25, %v6643_v58  ;;  %v5739_v58 = vld [vmem:[%s7243_s23 + $0x30] sm:$0xff]   ;;  %v4926_v6 = vld [vmem:[%s7244_s22] ss:$0 sm:$0xff]  ;;  %s6743_s22 = sand.u32 1, %s6114_s10  }
 0x900   : > { %v5917_v9 = vpop.eup %5916  ;;  %v2198_v12 = vadd.f32 1.0, %v5915_v7  ;;  %v2205_v28 = vmul.f32 0.5, %v2197_v17  ;;  %v2212_v40 = vmul.f32 %v2204_v29, %v6645_v59  ;;  %v5717_v59 = vld [vmem:[%s7241_s2 + $0x90] ss:$12 sps:$4 sm:$0xff]   ;;  %v5732_v7 = vld [vmem:[%s7241_s2 + $0x18] ss:$12 sps:$4 sm:$0xff]  }
 0x901   : > { %v5919_v13 = vpop.eup %5918  ;;  %v2200_v14 = vadd.f32 1.0, %v5917_v9  ;;  %v2211_v35 = vmul.f32 %v2203_v20, %v6651_v2  ;;  %v4927_v9 = vld [vmem:[%s7245_s16] ss:$0 sm:$0xff]  ;;  %s7246_s16 = sld [smem:[#allocation26_spill]]  ;;  %s7172_s3 = sshll.u32 %s6743_s22, 4 }
 0x902   : > { %v5921_v15 = vpop.eup %5920  ;;  %v2206_v18 = vmul.f32 0.5, %v2198_v12  ;;  %v2199_v19 = vadd.f32 1.0, %v5919_v13  ;;  %v2213_v38 = vmul.f32 %v2205_v28, %v6653_v4  ;;  %v5722_v4 = vld [vmem:[%s7241_s2 + $0x7c] ss:$12 sps:$4 sm:$0xff]   ;;  %s6750_s5 = scalar_lea.vmem [#allocation2], %s7172_s3  ;;  %s7248_s3 = sld [smem:[#allocation33_spill]] }
 0x903   : > { %v2208_v26 = vmul.f32 0.5, %v2200_v14  ;;  %v2201_v27 = vadd.f32 1.0, %v5921_v15  ;;  %v5923_v61 = vpop.eup %5922  ;;  %v5743_v14 = vld [vmem:[%s7243_s23 + $0x10] sm:$0xff]   ;;  %v5744_v15 = vld [vmem:[%s7243_s23 + $0x8] sm:$0xff]  }
 0x904   : > { %v2207_v30 = vmul.f32 0.5, %v2199_v19  ;;  %v2214_v31 = vmul.f32 %v2206_v18, %v6661_v22  ;;  %v2708_v5 = vmul.f32 %v5923_v61, %v6586_v56  ;;  %v5742_v56 = vld [vmem:[%s7243_s23 + $0x18] sm:$0xff]   ;;  %v5745_v18 = vld [vmem:[%s7243_s23] sm:$0xff]  }
 0x905   : > { %v2209_v32 = vmul.f32 0.5, %v2201_v27  ;;  %v2216_v34 = vmul.f32 %v2208_v26, %v6663_v10 }
 0x906   : > { %v2215_v36 = vmul.f32 %v2207_v30, %v6671_v21  ;;  %v2282_v10 = vpack.c.bf16 %v2214_v31, %v2210_v37  ;;  %v5719_v21 = vld [vmem:[%s7241_s2 + $0x94] ss:$12 sps:$4 sm:$0xff]   ;;  %v2715_v17 = vmul.f32 %v4926_v6, %v2708_v5 }
 0x907   : > { %v2217_v39 = vmul.f32 %v2209_v32, %v6673_v23  ;;  %v2284_v2 = vpack.c.bf16 %v2216_v34, %v2212_v40  ;;  %v5740_v23 = vld [vmem:[%s7243_s23 + $0x28] sm:$0xff]   ;;  %v4917_v32 = vld [vmem:[%s7246_s16] ss:$0 sm:$0xff]  ;;  %s7247_s16 = sld [smem:[#allocation30_spill]]  ;;  %s5954_s23 = sshll.u32 %s6164_s21, 4  ;;  %s5955_s23 = int_to_ptr.vmem [resolvable:$false] %s5954_s23 }
 0x908   : > { %v2283_v22 = vpack.c.bf16 %v2215_v36, %v2211_v35  ;;  %v2722_v12 = vadd.f32 %v4927_v9, %v2715_v17  ;;  %s5956_s24 = scalar_lea.vmem %s5955_s23, 256 }
 0x909   : > { %v2285_v42 = vpack.c.bf16 %v2217_v39, %v2213_v38 }
 0x90a   : > { %2510 = vmatprep.mubr.bf16.mxu0 %v2283_v22  ;;  %v6728_v13 = vpack.c.bf16 %v2722_v12, %v2722_v12  ;;  %v5746_v22 = vld [vmem:[%s7241_s2 + $0xb0] ss:$12 sps:$4 sm:$0xff]  }
 0x90b   : > { %2551 = vmatprep.mubr.bf16.mxu1 %v2285_v42  ;;  %2511 = vmatmul.mubr.bf16.vlgmr.msra.gmra.mxu0 %v2282_v10  ;;  %v5748_v42 = vld [vmem:[%s7241_s2 + $0x80] ss:$12 sps:$4 sm:$0xff]  }
 0x90c   : > { %2552 = vmatmul.mubr.bf16.vlgmr.msra.gmra.mxu1 %v2284_v2  ;;  %5342 = vmatpush3.bf16.msra.mxu0 %v5738_v41  ;;  %v5751_v2 = vld [vmem:[%s7241_s2 + $0x38] ss:$12 sps:$4 sm:$0xff]  }
 0x90d   : > { %2885 = vmatpush1.bf16.msra.mxu1 %v5714_v43  ;;  %2916 = vmatprep.mubr.bf16.mxu1 %v6163_v47  ;;  %v5750_v43 = vld [vmem:[%s7241_s2 + $0x50] ss:$12 sps:$4 sm:$0xff]  }
 0x90e   : > { %2886 = vmatprep.subr.bf16.mxu1 %v5719_v21  ;;  %5343 = vmatprep.subr.bf16.mxu0 %v6161_v1 }
 0x90f   : > { %5357 = vmatprep.mubr.msk.bf16.mxu0 %vm6162_vm0, %v6161_v1 }
 0x910   : > { %5344 = vmatpush3.bf16.msra.mxu0 %v5739_v58 }
 0x911   : > { %2887 = vmatpush1.bf16.msra.mxu1 %v5717_v59  ;;  %5345 = vmatprep.subr.bf16.mxu0 %v6161_v1 }
 0x912   : > { %2888 = vmatprep.subr.bf16.mxu1 %v5722_v4  ;;  %v5752_v4 = vld [vmem:[%s7241_s2 + $0x20] ss:$12 sps:$4 sm:$0xff]  }
 0x914   : > { %5346 = vmatpush3.bf16.msra.mxu0 %v5740_v23 }
 0x915   : > { %2889 = vmatpush1.bf16.msra.mxu1 %v5720_v51  ;;  %5347 = vmatprep.subr.bf16.mxu0 %v6161_v1  ;;  %v5753_v51 = vld [vmem:[%s7241_s2 + $0x8] ss:$12 sps:$4 sm:$0xff]  }
 0x916   : > { %2890 = vmatprep.subr.bf16.mxu1 %v5725_v52 }
 0x918   : > { %5348 = vmatpush3.bf16.msra.mxu0 %v5741_v53 }
 0x919   : > { %2891 = vmatpush1.bf16.msra.mxu1 %v5723_v54  ;;  %5349 = vmatprep.subr.bf16.mxu0 %v6161_v1 }
 0x91a   : > { %2892 = vmatprep.subr.bf16.mxu1 %v5728_v55 }
 0x91c   : > { %5350 = vmatpush3.bf16.msra.mxu0 %v5742_v56 }
 0x91d   : > { %2893 = vmatpush1.bf16.msra.mxu1 %v5726_v57  ;;  %5351 = vmatprep.subr.bf16.mxu0 %v6161_v1 }
 0x91e   : > { %2894 = vmatprep.subr.bf16.mxu1 %v5731_v60 }
 0x920   : > { %5352 = vmatpush3.bf16.msra.mxu0 %v5743_v14 }
 0x921   : > { %2895 = vmatpush1.bf16.msra.mxu1 %v5729_v62  ;;  %5353 = vmatprep.subr.bf16.mxu0 %v6161_v1 }
 0x922   : > { %2896 = vmatprep.subr.bf16.mxu1 %v5734_v0 }
 0x924   : > { %5354 = vmatpush3.bf16.msra.mxu0 %v5744_v15 }
 0x925   : > { %2897 = vmatpush1.bf16.msra.mxu1 %v5732_v7  ;;  %5355 = vmatprep.subr.bf16.mxu0 %v6161_v1 }
 0x926   : > { %2898 = vmatprep.subr.bf16.mxu1 %v5737_v8 }
 0x928   : > { %5356 = vmatpush3.bf16.msra.mxu0 %v5745_v18  ;;  %v5754_v18 = vld [vmem:[%s7247_s16 + $0x38] sm:$0xff]  }
 0x929   : > { %2899 = vmatpush1.bf16.msra.mxu1 %v5735_v11  ;;  %5361 = vmatprep.subr.bf16.mxu0 %v6161_v1 }
 0x92a   : > { %5381 = vmatprep.subr.bf16.mxu1 %v6161_v1 }
 0x92c   : > { %2917 = vmatmul.mubr.bf16.vlgmr.msra.gmra.mxu1 %v6728_v13 }
 0x92d   : > { %5383 = vmatprep.mubr.msk.bf16.mxu1 %vm6162_vm0, %v6161_v1 }
 0x9cb   : > { %v5135_v19 = vpop.f32.mrf.mxu0 }
 0x9cc   : > { %v5157_v20 = vpop.f32.mrf.mxu1 }
 0x9cd   : > { %v5136_v24 = vpop.f32.mrf.mxu0 }
 0x9ce   : > { %v5137_v25 = vadd.f32 %v5136_v24, %v5135_v19  ;;  %v5158_v26 = vpop.f32.mrf.mxu1  ;;  %v5755_v19 = vld [vmem:[%s7247_s16 + $0x30] sm:$0xff]   ;;  %v5757_v24 = vld [vmem:[%s7247_s16 + $0x20] sm:$0xff]  }
 0x9cf   : > { %v5159_v27 = vadd.f32 %v5158_v26, %v5157_v20  ;;  %v5138_v28 = vpop.f32.mrf.mxu0  ;;  %v5756_v20 = vld [vmem:[%s7247_s16 + $0x28] sm:$0xff]   ;;  %v5759_v26 = vld [vmem:[%s7247_s16 + $0x10] sm:$0xff]  }
 0x9d0   : > { %v5160_v29 = vpop.f32.mrf.mxu1 }
 0x9d1   : > { %v2554_v30 = vadd.f32 %v5159_v27, %v5137_v25  ;;  %v5139_v31 = vpop.f32.mrf.mxu0  ;;  %v5758_v25 = vld [vmem:[%s7247_s16 + $0x18] sm:$0xff]   ;;  %v5760_v27 = vld [vmem:[%s7247_s16 + $0x8] sm:$0xff]  }
 0x9d2   : > { %v5140_v33 = vadd.f32 %v5139_v31, %v5138_v28  ;;  %v5161_v34 = vpop.f32.mrf.mxu1 }
 0x9d3   : > { %v2560_v35 = vadd.f32 %v2554_v30, %v6530_v63  ;;  %v5162_v36 = vadd.f32 %v5161_v34, %v5160_v29  ;;  %v5747_v63 = vld [vmem:[%s7241_s2 + $0x98] ss:$12 sps:$4 sm:$0xff]  }
 0x9d5   : > { %v2569_v37 = vadd.f32 %v4917_v32, %v2560_v35  ;;  %v2557_v38 = vadd.f32 %v5162_v36, %v5140_v33 }
 0x9d7   : > { %2571 = vst [vmem:[%s6750_s5] sm:$0xff] %v2569_v37  ;;  %v2561_v39 = vadd.f32 %v2557_v38, %v6534_v3  ;;  %v5749_v3 = vld [vmem:[%s7241_s2 + $0x68] ss:$12 sps:$4 sm:$0xff]   ;;  %s7249_s2 = sld [smem:[#allocation31_spill]] }
 0x9d9   : > { %v2570_v40 = vadd.f32 %v4917_v32, %v2561_v39  ;;  %v5761_v32 = vld [vmem:[%s7247_s16] sm:$0xff]   ;;  %s4550_s16 = scalar_lea.hbm %s7226_s27, %s7004_s14 }
 0x9db   : > { %2572 = vst [vmem:[%s6750_s5 + $0x8] sm:$0xff] %v2570_v40  ;;  %v6756_v41 = vpack.c.bf16 %v2570_v40, %v2569_v37 }
 0x9dd   : > { %5358 = vmatmul.mubr.bf16.vlgmr.msra.gmra.mxu0 %v6756_v41 }
 0x9de   : > { %5362 = vmatpush3.bf16.msra.mxu0 %v5746_v22  ;;  %5377 = vmatprep.mubr.msk.bf16.mxu0 %vm6162_vm0, %v6161_v1 }
 0x9df   : > { %5363 = vmatprep.subr.bf16.mxu0 %v6161_v1 }
 0x9e2   : > { %5364 = vmatpush3.bf16.msra.mxu0 %v5747_v63 }
 0x9e3   : > { %5365 = vmatprep.subr.bf16.mxu0 %v6161_v1 }
 0x9e6   : > { %5366 = vmatpush3.bf16.msra.mxu0 %v5748_v42  ;;  %v5762_v42 = vld [vmem:[%s7248_s3 + $0xe0] ss:$16 sps:$4 sm:$0xff]  }
 0x9e7   : > { %5367 = vmatprep.subr.bf16.mxu0 %v6161_v1 }
 0x9ea   : > { %5368 = vmatpush3.bf16.msra.mxu0 %v5749_v3  ;;  %v5764_v3 = vld [vmem:[%s7248_s3 + $0xe4] ss:$16 sps:$4 sm:$0xff]  }
 0x9eb   : > { %5369 = vmatprep.subr.bf16.mxu0 %v6161_v1 }
 0x9ec   : > { %v2918_v10 = vpop.f32.mrf.mxu1 }
 0x9ed   : > { %v2981_v23 = vpack.c.bf16 %v2918_v10, %v2918_v10  ;;  %v5767_v10 = vld [vmem:[%s7248_s3 + $0xec] ss:$16 sps:$4 sm:$0xff]  }
 0x9ee   : > { %v2920_v48 = vpop.f32.mrf.mxu1  ;;  %5370 = vmatpush3.bf16.msra.mxu0 %v5750_v43  ;;  %v5765_v43 = vld [vmem:[%s7248_s3 + $0xe8] ss:$16 sps:$4 sm:$0xff]  }
 0x9ef   : > { %v2982_v21 = vpack.c.bf16 %v2920_v48, %v2920_v48  ;;  %5371 = vmatprep.subr.bf16.mxu0 %v6161_v1  ;;  %v5770_v48 = vld [vmem:[%s7248_s3 + $0xc4] ss:$16 sps:$4 sm:$0xff]  }
 0x9f0   : > { %v2922_v58 = vpop.f32.mrf.mxu1 }
 0x9f1   : > { %5382 = vmatpush3.bf16.xpose.msra.mxu1 %v2982_v21  ;;  %v5771_v21 = vld [vmem:[%s7248_s3 + $0xc8] ss:$16 sps:$4 sm:$0xff]  }
 0x9f2   : > { %v2923_v59 = vpop.f32.mrf.mxu1  ;;  %5372 = vmatpush3.bf16.msra.mxu0 %v5751_v2  ;;  %5387 = vmatprep.subr.bf16.mxu1 %v6161_v1  ;;  %v5773_v2 = vld [vmem:[%s7248_s3 + $0xcc] ss:$16 sps:$4 sm:$0xff]  }
 0x9f3   : > { %5373 = vmatprep.subr.bf16.mxu0 %v6161_v1 }
 0x9f6   : > { %5374 = vmatpush3.bf16.msra.mxu0 %v5752_v4 }
 0x9f7   : > { %5375 = vmatprep.subr.bf16.mxu0 %v6161_v1 }
 0x9f8   : > { %5384 = vmatmul.mubr.bf16.vlgmr.msra.gmra.mxu1 %v2981_v23 }
 0x9f9   : > { %5389 = vmatprep.mubr.msk.bf16.mxu1 %vm6162_vm0, %v6161_v1 }
 0x9fa   : > { %5376 = vmatpush3.bf16.msra.mxu0 %v5753_v51  ;;  %v5776_v51 = vld [vmem:[%s7248_s3 + $0xa4] ss:$16 sps:$4 sm:$0xff]  }
 0x9fb   : > { %5393 = vmatprep.subr.bf16.mxu0 %v6161_v1 }
 0x9fd   : > { %5378 = vmatmul.mubr.bf16.vlgmr.msra.gmra.mxu0 %v6728_v13 }
 0x9fe   : > { %5409 = vmatprep.mubr.msk.bf16.mxu0 %vm6162_vm0, %v6161_v1  ;;  %5394 = vmatpush3.bf16.msra.mxu0 %v5754_v18  ;;  %v5806_v18 = vld [vmem:[%s7248_s3 + $0x4] ss:$16 sps:$4 sm:$0xff]  }
 0x9ff   : > { %5395 = vmatprep.subr.bf16.mxu0 %v6161_v1 }
 0xa02   : > { %5396 = vmatpush3.bf16.msra.mxu0 %v5755_v19  ;;  %v5809_v19 = vld [vmem:[%s7248_s3 + $0xc] ss:$16 sps:$4 sm:$0xff]  }
 0xa03   : > { %5397 = vmatprep.subr.bf16.mxu0 %v6161_v1 }
 0xa06   : > { %5398 = vmatpush3.bf16.msra.mxu0 %v5756_v20  ;;  %v5804_v20 = vld [vmem:[%s7248_s3] ss:$16 sps:$4 sm:$0xff]  }
 0xa07   : > { %5399 = vmatprep.subr.bf16.mxu0 %v6161_v1 }
 0xa0a   : > { %5400 = vmatpush3.bf16.msra.mxu0 %v5757_v24  ;;  %v5807_v24 = vld [vmem:[%s7248_s3 + $0x8] ss:$16 sps:$4 sm:$0xff]  }
 0xa0b   : > { %5401 = vmatprep.subr.bf16.mxu0 %v6161_v1 }
 0xa0e   : > { %5402 = vmatpush3.bf16.msra.mxu0 %v5758_v25 }
 0xa0f   : > { %5403 = vmatprep.subr.bf16.mxu0 %v6161_v1 }
 0xa12   : > { %5404 = vmatpush3.bf16.msra.mxu0 %v5759_v26 }
 0xa13   : > { %5405 = vmatprep.subr.bf16.mxu0 %v6161_v1 }
 0xa16   : > { %5406 = vmatpush3.bf16.msra.mxu0 %v5760_v27 }
 0xa17   : > { %5407 = vmatprep.subr.bf16.mxu0 %v6161_v1 }
 0xa1a   : > { %5408 = vmatpush3.bf16.msra.mxu0 %v5761_v32 }
 0xa1b   : > { %3458 = vmatprep.subr.bf16.mxu0 %v5767_v10  ;;  %v5820_v10 = vld [vmem:[%s7251_s9 + $0x28] sm:$0xff]  }
 0xa9d   : > { %v6782_v52 = vpop.f32.mrf.mxu0 }
 0xa9f   : > { %v5359_v53 = vpop.f32.mrf.mxu0 }
 0xaa0   : > { %v5779_v53 = vld [vmem:[%s7248_s3 + $0xac] ss:$16 sps:$4 sm:$0xff]  }
 0xaa1   : > { %v6784_v54 = vpop.f32.mrf.mxu0 }
 0xaa3   : > { %v5360_v55 = vpop.f32.mrf.mxu0 }
 0xaa4   : > { %v5774_v55 = vld [vmem:[%s7248_s3 + $0xa0] ss:$16 sps:$4 sm:$0xff]  }
 0xab8   : > { %v3017_v57 = vpop.f32.mrf.mxu1 }
 0xab9   : > { %v3023_v60 = vmul.f32 0.088388346, %v3017_v57  ;;  %v5777_v57 = vld [vmem:[%s7248_s3 + $0xa8] ss:$16 sps:$4 sm:$0xff]  }
 0xaba   : > { %v5385_v61 = vpop.f32.mrf.mxu1 }
 0xabb   : > { %v3025_v62 = vsel %vm3024_vm2, %v3023_v60, -inf  ;;  %v5782_v61 = vld [vmem:[%s7248_s3 + $0x84] ss:$16 sps:$4 sm:$0xff]  }
 0xabc   : > { %3026 = vmax.xlane.f32.xlu0 %v3025_v62  ;;  %v3020_v0 = vpop.f32.mrf.mxu1  ;;  %v5783_v62 = vld [vmem:[%s7248_s3 + $0x88] ss:$16 sps:$4 sm:$0xff]  }
 0xabd   : > { %v2959_v5 = vpop.f32.mrf.mxu0  ;;  %v5785_v0 = vld [vmem:[%s7248_s3 + $0x8c] ss:$16 sps:$4 sm:$0xff]  }
 0xabe   : > { %v3037_v6 = vpack.c.bf16 %v2959_v5, %v2959_v5  ;;  %v5386_v7 = vpop.f32.mrf.mxu1  ;;  %v5788_v5 = vld [vmem:[%s7248_s3 + $0x64] ss:$16 sps:$4 sm:$0xff]  }
 0xabf   : > { %v5379_v8 = vpop.f32.mrf.mxu0  ;;  %v5786_v7 = vld [vmem:[%s7248_s3 + $0x60] ss:$16 sps:$4 sm:$0xff]  }
 0xac0   : > { %v3043_v17 = vsel %vm3041_vm3, %v3037_v6, 0  ;;  %v5791_v6 = vld [vmem:[%s7248_s3 + $0x6c] ss:$16 sps:$4 sm:$0xff]   ;;  %v5789_v8 = vld [vmem:[%s7248_s3 + $0x68] ss:$16 sps:$4 sm:$0xff]  }
 0xac1   : > { %v2962_v9 = vpop.f32.mrf.mxu0  ;;  %5388 = vmatpush3.bf16.msra.mxu1 %v3043_v17  ;;  %v5794_v17 = vld [vmem:[%s7248_s3 + $0x44] ss:$16 sps:$4 sm:$0xff]  }
 0xac2   : > { %3417 = vmatprep.subr.bf16.mxu1 %v5764_v3  ;;  %v5797_v9 = vld [vmem:[%s7248_s3 + $0x4c] ss:$16 sps:$4 sm:$0xff]  }
 0xac3   : > { %v5380_v11 = vpop.f32.mrf.mxu0  ;;  %v5818_v3 = vld [vmem:[%s7251_s9 + $0x68] sm:$0xff]  }
 0xac4   : > { %v5792_v11 = vld [vmem:[%s7248_s3 + $0x40] ss:$16 sps:$4 sm:$0xff]  }
 0xb45   : > { %v3027_v12 = vpop.xlane.xlu0 %3026 }
 0xb46   : > { %v3028_v13 = vsub.f32 %v3023_v60, %v3027_v12  ;;  %v5780_v60 = vld [vmem:[%s7248_s3 + $0x80] ss:$16 sps:$4 sm:$0xff]   ;;  %v5795_v12 = vld [vmem:[%s7248_s3 + $0x48] ss:$16 sps:$4 sm:$0xff]  }
 0xb48   : > { %v3029_v56 = vmul.f32 1.442695, %v3028_v13  ;;  %v5800_v13 = vld [vmem:[%s7248_s3 + $0x24] ss:$16 sps:$4 sm:$0xff]  }
 0xb4a   : > { %5924 = vpow2.f32 %v3029_v56  ;;  %v5803_v56 = vld [vmem:[%s7248_s3 + $0x2c] ss:$16 sps:$4 sm:$0xff]  }
 0xb57   : > { %v5925_v14 = vpop.eup %5924 }
 0xb58   : > { %v3031_v15 = vsel %vm3024_vm2, %v5925_v14, 0.0 }
 0xb59   : > { %3032 = vadd.xlane.f32.xlu1 %v3031_v15  ;;  %v5801_v15 = vld [vmem:[%s7248_s3 + $0x28] ss:$16 sps:$4 sm:$0xff]  }
 0xbe2   : > { %v3033_v28 = vpop.xlane.xlu1 %3032 }
 0xbe3   : > { %5926 = vrcp.f32 %v3033_v28 }
 0xbf0   : > { %v5927_v29 = vpop.eup %5926 }
 0xbf1   : > { %v3035_v30 = vmul.f32 %v5927_v29, %v5925_v14  ;;  %v5798_v14 = vld [vmem:[%s7248_s3 + $0x20] ss:$16 sps:$4 sm:$0xff]  }
 0xbf2   : > { %v4961_v29 = vld [vmem:[%s7249_s2] ss:$0 sm:$0xff]  ;;  %s7253_s2 = sld [smem:[#allocation38_spill]] }
 0xbf3   : > { %v3036_v31 = vpack.c.bf16 %v3035_v30, %v3035_v30 }
 0xbf5   : > { %5390 = vmatmul.mubr.msk.bf16.vlgmr.msra.gmra.mxu1 %vm3024_vm2, %v3036_v31  ;;  %v4962_v31 = vld [vmem:[%s7250_s8] ss:$0 sm:$0xff]  ;;  %s7252_s8 = sld [smem:[#allocation34_spill]] }
 0xbf6   : > { %3449 = vmatprep.mubr.bf16.mxu1 %v6163_v47  ;;  %3418 = vmatpush1.bf16.msra.mxu1 %v5762_v42  ;;  %v5817_v42 = vld [vmem:[%s7251_s9 + $0xb0] sm:$0xff]  }
 0xbf7   : > { %3419 = vmatprep.subr.bf16.mxu1 %v5770_v48  ;;  %v5821_v48 = vld [vmem:[%s7251_s9 + $0xa8] sm:$0xff]  }
 0xcb5   : > { %v3079_v33 = vpop.f32.mrf.mxu1 }
 0xcb6   : > { %v3085_v34 = vpack.c.bf16 %v3079_v33, %v3079_v33 }
 0xcb7   : > { %v5391_v35 = vpop.f32.mrf.mxu1 }
 0xcb8   : > { %5410 = vmatmul.mubr.bf16.vlgmr.msra.gmra.mxu0 %v3085_v34  ;;  %v5810_v35 = vld [vmem:[%s7251_s9 + $0x78] sm:$0xff]  }
 0xcb9   : > { %v3082_v36 = vpop.f32.mrf.mxu1  ;;  %3490 = vmatprep.mubr.bf16.mxu0 %v6163_v47  ;;  %3459 = vmatpush1.bf16.msra.mxu0 %v5765_v43  ;;  %v5819_v43 = vld [vmem:[%s7251_s9 + $0xe8] sm:$0xff]  }
 0xcba   : > { %3460 = vmatprep.subr.bf16.mxu0 %v5773_v2  ;;  %v5811_v36 = vld [vmem:[%s7251_s9 + $0xf8] sm:$0xff]   ;;  %v5822_v2 = vld [vmem:[%s7251_s9 + $0x60] sm:$0xff]  }
 0xcbb   : > { %v5392_v37 = vpop.f32.mrf.mxu1 }
 0xcbc   : > { %v5812_v37 = vld [vmem:[%s7251_s9 + $0x38] sm:$0xff]  }
 0xcbd   : > { %3461 = vmatpush1.bf16.msra.mxu0 %v5771_v21  ;;  %v5824_v21 = vld [vmem:[%s7251_s9 + $0x20] sm:$0xff]  }
 0xcbe   : > { %3462 = vmatprep.subr.bf16.mxu0 %v5779_v53  ;;  %v5830_v53 = vld [vmem:[%s7251_s9 + $0x50] sm:$0xff]  }
 0xcc1   : > { %3463 = vmatpush1.bf16.msra.mxu0 %v5777_v57  ;;  %v5832_v57 = vld [vmem:[%s7251_s9 + $0x10] sm:$0xff]  }
 0xcc2   : > { %3464 = vmatprep.subr.bf16.mxu0 %v5785_v0  ;;  %v5836_v0 = vld [vmem:[%s7251_s9 + $0x8] sm:$0xff]  }
 0xcc5   : > { %3465 = vmatpush1.bf16.msra.mxu0 %v5783_v62  ;;  %v5835_v62 = vld [vmem:[%s7251_s9 + $0xc8] sm:$0xff]  }
 0xcc6   : > { %3466 = vmatprep.subr.bf16.mxu0 %v5791_v6  ;;  %v5838_v6 = vld [vmem:[%s7251_s9 + $0x40] sm:$0xff]  }
 0xcc9   : > { %3467 = vmatpush1.bf16.msra.mxu0 %v5789_v8  ;;  %v5840_v8 = vld [vmem:[%s7251_s9] sm:$0xff]  }
 0xcca   : > { %3468 = vmatprep.subr.bf16.mxu0 %v5797_v9  ;;  %v3235_v9 = vld [vmem:[%s7252_s8] sm:$0xf]  ;;  %s7254_s8 = sld [smem:[#allocation39_spill]] }
 0xccd   : > { %3469 = vmatpush1.bf16.msra.mxu0 %v5795_v12  ;;  %v3248_v12 = vrot.slane %v3235_v9, %v1890_v46 }
 0xcce   : > { %3470 = vmatprep.subr.bf16.mxu0 %v5803_v56  ;;  %v3252_v56 = vrot.slane %v3235_v9, %v1894_v50 }
 0xcd1   : > { %3471 = vmatpush1.bf16.msra.mxu0 %v5801_v15 }
 0xcd2   : > { %3472 = vmatprep.subr.bf16.mxu0 %v5809_v19 }
 0xcd5   : > { %3473 = vmatpush1.bf16.msra.mxu0 %v5807_v24 }
 0xcd6   : > { %5216 = vmatprep.subr.bf16.mxu0 %v5811_v36 }
 0xd78   : > { %v3168_v38 = vpop.f32.mrf.mxu0 }
 0xd79   : > { %v6807_v39 = vadd.f32 %v3168_v38, %v6552_v16  ;;  %v5768_v16 = vld [vmem:[%s7248_s3 + $0xc0] ss:$16 sps:$4 sm:$0xff]   ;;  %v5813_v38 = vld [vmem:[%s7251_s9 + $0xb8] sm:$0xff]   ;;  %s7255_s3 = sld [smem:[#allocation40_spill]] }
 0xd7a   : > { %v5411_v40 = vpop.f32.mrf.mxu0  ;;  %3420 = vmatpush1.bf16.msra.mxu1 %v5768_v16  ;;  %v5823_v16 = vld [vmem:[%s7251_s9 + $0xe0] sm:$0xff]  }
 0xd7b   : > { %3177 = vadd.xlane.f32.xlu0 %v6807_v39  ;;  %3421 = vmatprep.subr.bf16.mxu1 %v5776_v51  ;;  %v5814_v40 = vld [vmem:[%s7251_s9 + $0x70] sm:$0xff]   ;;  %v5829_v51 = vld [vmem:[%s7251_s9 + $0x98] sm:$0xff]  }
 0xd7c   : > { %v3171_v22 = vpop.f32.mrf.mxu0 }
 0xd7d   : > { %v5815_v22 = vld [vmem:[%s7251_s9 + $0xf0] sm:$0xff]  }
 0xd7e   : > { %v5412_v63 = vpop.f32.mrf.mxu0  ;;  %3422 = vmatpush1.bf16.msra.mxu1 %v5774_v55  ;;  %v5831_v55 = vld [vmem:[%s7251_s9 + $0xd0] sm:$0xff]  }
 0xd7f   : > { %3423 = vmatprep.subr.bf16.mxu1 %v5782_v61  ;;  %v5816_v63 = vld [vmem:[%s7251_s9 + $0x30] sm:$0xff]   ;;  %v5834_v61 = vld [vmem:[%s7251_s9 + $0x48] sm:$0xff]  }
 0xd82   : > { %3424 = vmatpush1.bf16.msra.mxu1 %v5780_v60  ;;  %v5833_v60 = vld [vmem:[%s7251_s9 + $0x90] sm:$0xff]  }
 0xd83   : > { %3425 = vmatprep.subr.bf16.mxu1 %v5788_v5  ;;  %v5837_v5 = vld [vmem:[%s7251_s9 + $0x88] sm:$0xff]  }
 0xd86   : > { %3426 = vmatpush1.bf16.msra.mxu1 %v5786_v7  ;;  %v5839_v7 = vld [vmem:[%s7251_s9 + $0xc0] sm:$0xff]  }
 0xd87   : > { %3427 = vmatprep.subr.bf16.mxu1 %v5794_v17  ;;  %v5841_v17 = vld [vmem:[%s7251_s9 + $0x80] sm:$0xff]  }
 0xd8a   : > { %3428 = vmatpush1.bf16.msra.mxu1 %v5792_v11  ;;  %v3240_v11 = vrot.slane %v3235_v9, %v1882_v45 }
 0xd8b   : > { %3429 = vmatprep.subr.bf16.mxu1 %v5800_v13  ;;  %v3244_v13 = vrot.slane %v3235_v9, %v1886_v49 }
 0xd8e   : > { %3430 = vmatpush1.bf16.msra.mxu1 %v5798_v14 }
 0xd8f   : > { %3431 = vmatprep.subr.bf16.mxu1 %v5806_v18 }
 0xd92   : > { %3432 = vmatpush1.bf16.msra.mxu1 %v5804_v20 }
 0xd93   : > { %5194 = vmatprep.subr.bf16.mxu1 %v5810_v35 }
 0xe04   : > { %v3178_v58 = vpop.xlane.xlu0 %3177 }
 0xe05   : > { %v3179_v59 = vmul.f32 0.0078125, %v3178_v58  ;;  %v5825_v58 = vld [vmem:[%s7251_s9 + $0xa0] sm:$0xff]  }
 0xe07   : > { %v3180_v4 = vsub.f32 %v6807_v39, %v3179_v59  ;;  %v5826_v59 = vld [vmem:[%s7251_s9 + $0x58] sm:$0xff]  }
 0xe09   : > { %v3181_v23 = vmul.f32 %v3180_v4, %v3180_v4 }
 0xe0b   : > { %3182 = vadd.xlane.f32.xlu1 %v3181_v23  ;;  %v5828_v23 = vld [vmem:[%s7251_s9 + $0x18] sm:$0xff]  }
 0xe94   : > { %v3183_v25 = vpop.xlane.xlu1 %3182 }
 0xe95   : > { %v3184_v26 = vmul.f32 0.0078125, %v3183_v25 }
 0xe97   : > { %v3185_v27 = vadd.f32 1e-06, %v3184_v26 }
 0xe99   : > { %5928 = vrsqrt.f32 %v3185_v27 }
 0xea6   : > { %v5929_v28 = vpop.eup %5928 }
 0xea7   : > { %v3187_v30 = vmul.f32 %v5929_v28, %v3180_v4  ;;  %v5827_v4 = vld [vmem:[%s7251_s9 + $0xd8] sm:$0xff]   ;;  %s7256_s9 = sld [smem:[#allocation36_spill]] }
 0xea9   : > { %v3194_v32 = vmul.f32 %v4961_v29, %v3187_v30 }
 0xeab   : > { %v3201_v33 = vadd.f32 %v4962_v31, %v3194_v32 }
 0xead   : > { %v3234_v34 = vpack.c.bf16 %v3201_v33, %v3201_v33 }
 0xeaf   : > { %3450 = vmatmul.mubr.bf16.vlgmr.msra.gmra.mxu1 %v3234_v34  ;;  %3491 = vmatmul.mubr.bf16.vlgmr.msra.gmra.mxu0 %v3234_v34 }
 0xeb0   : > { %5195 = vmatpush3.bf16.msra.mxu1 %v5812_v37  ;;  %5217 = vmatpush3.bf16.msra.mxu0 %v5813_v38 }
 0xeb1   : > { %5196 = vmatprep.subr.bf16.mxu1 %v5814_v40  ;;  %5218 = vmatprep.subr.bf16.mxu0 %v5815_v22 }
 0xeb4   : > { %5197 = vmatpush3.bf16.msra.mxu1 %v5816_v63  ;;  %5219 = vmatpush3.bf16.msra.mxu0 %v5817_v42 }
 0xeb5   : > { %5198 = vmatprep.subr.bf16.mxu1 %v5818_v3  ;;  %5220 = vmatprep.subr.bf16.mxu0 %v5819_v43 }
 0xeb8   : > { %5199 = vmatpush3.bf16.msra.mxu1 %v5820_v10  ;;  %5221 = vmatpush3.bf16.msra.mxu0 %v5821_v48 }
 0xeb9   : > { %5200 = vmatprep.subr.bf16.mxu1 %v5822_v2  ;;  %5222 = vmatprep.subr.bf16.mxu0 %v5823_v16 }
 0xebc   : > { %5201 = vmatpush3.bf16.msra.mxu1 %v5824_v21  ;;  %5223 = vmatpush3.bf16.msra.mxu0 %v5825_v58 }
 0xebd   : > { %5202 = vmatprep.subr.bf16.mxu1 %v5826_v59  ;;  %5224 = vmatprep.subr.bf16.mxu0 %v5827_v4 }
 0xec0   : > { %5203 = vmatpush3.bf16.msra.mxu1 %v5828_v23  ;;  %5225 = vmatpush3.bf16.msra.mxu0 %v5829_v51 }
 0xec1   : > { %5204 = vmatprep.subr.bf16.mxu1 %v5830_v53  ;;  %5226 = vmatprep.subr.bf16.mxu0 %v5831_v55 }
 0xec4   : > { %5205 = vmatpush3.bf16.msra.mxu1 %v5832_v57  ;;  %5227 = vmatpush3.bf16.msra.mxu0 %v5833_v60 }
 0xec5   : > { %5206 = vmatprep.subr.bf16.mxu1 %v5834_v61  ;;  %5228 = vmatprep.subr.bf16.mxu0 %v5835_v62 }
 0xec8   : > { %5207 = vmatpush3.bf16.msra.mxu1 %v5836_v0  ;;  %5229 = vmatpush3.bf16.msra.mxu0 %v5837_v5 }
 0xec9   : > { %5208 = vmatprep.subr.bf16.mxu1 %v5838_v6  ;;  %5230 = vmatprep.subr.bf16.mxu0 %v5839_v7  ;;  %v5842_v6 = vld [vmem:[%s7253_s2 + $0x38] sm:$0xff]  }
 0xecc   : > { %5209 = vmatpush3.bf16.msra.mxu1 %v5840_v8  ;;  %5231 = vmatpush3.bf16.msra.mxu0 %v5841_v17  ;;  %v5843_v17 = vld [vmem:[%s7254_s8 + $0x38] sm:$0xff]  }
 0xecd   : > { %5413 = vmatprep.subr.bf16.mxu1 %v6161_v1  ;;  %5433 = vmatprep.subr.bf16.mxu0 %v6161_v1 }
 0xf6f   : > { %v3451_v14 = vpop.f32.mrf.mxu1  ;;  %v3492_v15 = vpop.f32.mrf.mxu0 }
 0xf70   : > { %v3452_v18 = vadd.f32 %v3451_v14, %v3240_v11  ;;  %v3493_v19 = vadd.f32 %v3492_v15, %v3248_v12  ;;  %v5844_v11 = vld [vmem:[%s7253_s2 + $0x30] sm:$0xff]   ;;  %v5848_v14 = vld [vmem:[%s7253_s2 + $0x20] sm:$0xff]  }
 0xf71   : > { %v3453_v20 = vpop.f32.mrf.mxu1  ;;  %v3494_v24 = vpop.f32.mrf.mxu0  ;;  %v5845_v12 = vld [vmem:[%s7254_s8 + $0x30] sm:$0xff]   ;;  %v5849_v15 = vld [vmem:[%s7254_s8 + $0x20] sm:$0xff]  }
 0xf72   : > { %v3499_v25 = vmul.f32 %v3452_v18, %v3452_v18  ;;  %v3501_v26 = vmul.f32 %v3493_v19, %v3493_v19  ;;  %v3454_v27 = vadd.f32 %v3453_v20, %v3244_v13  ;;  %v3495_v28 = vadd.f32 %v3494_v24, %v3252_v56  ;;  %v5846_v13 = vld [vmem:[%s7253_s2 + $0x28] sm:$0xff]   ;;  %v5852_v20 = vld [vmem:[%s7253_s2 + $0x10] sm:$0xff]  }
 0xf73   : > { %v3455_v45 = vpop.f32.mrf.mxu1  ;;  %v3496_v29 = vpop.f32.mrf.mxu0  ;;  %v5847_v56 = vld [vmem:[%s7254_s8 + $0x28] sm:$0xff]   ;;  %v5853_v24 = vld [vmem:[%s7254_s8 + $0x10] sm:$0xff]  }
 0xf74   : > { %v3503_v30 = vmul.f32 %v3499_v25, %v3452_v18  ;;  %v3505_v46 = vmul.f32 %v3501_v26, %v3493_v19  ;;  %v3500_v31 = vmul.f32 %v3454_v27, %v3454_v27  ;;  %v3502_v32 = vmul.f32 %v3495_v28, %v3495_v28  ;;  %v5854_v25 = vld [vmem:[%s7253_s2 + $0x8] sm:$0xff]   ;;  %v5860_v45 = vld [vmem:[%s7255_s3 + $0x74] ss:$8 sps:$4 sm:$0xff]  }
 0xf75   : > { %v3456_v49 = vpop.f32.mrf.mxu1  ;;  %v3497_v33 = vpop.f32.mrf.mxu0  ;;  %v5855_v26 = vld [vmem:[%s7254_s8 + $0x8] sm:$0xff]  }
 0xf76   : > { %v3507_v44 = vmul.f32 0.044715, %v3503_v30  ;;  %v3509_v50 = vmul.f32 0.044715, %v3505_v46  ;;  %v3504_v34 = vmul.f32 %v3500_v31, %v3454_v27  ;;  %v3506_v35 = vmul.f32 %v3502_v32, %v3495_v28 }
 0xf78   : > { %v3511_v36 = vadd.f32 %v3507_v44, %v3452_v18  ;;  %v3513_v37 = vadd.f32 %v3509_v50, %v3493_v19  ;;  %v3508_v38 = vmul.f32 0.044715, %v3504_v34  ;;  %v3510_v40 = vmul.f32 0.044715, %v3506_v35  ;;  %v5027_v35 = vld [vmem:[%s7256_s9] ss:$0 sm:$0xff] }
 0xf79   : > { %s7257_s9 = sld [smem:[#allocation41_spill]] }
 0xf7a   : > { %v3515_v22 = vmul.f32 0.7978846, %v3511_v36  ;;  %v3517_v63 = vmul.f32 0.7978846, %v3513_v37  ;;  %v3512_v42 = vadd.f32 %v3508_v38, %v3454_v27  ;;  %v3514_v3 = vadd.f32 %v3510_v40, %v3495_v28  ;;  %v5858_v40 = vld [vmem:[%s7255_s3 + $0x70] ss:$8 sps:$4 sm:$0xff]  }
 0xf7c   : > { %5930 = vtanh.f32 %v3515_v22  ;;  %v3516_v43 = vmul.f32 0.7978846, %v3512_v42  ;;  %v3518_v10 = vmul.f32 0.7978846, %v3514_v3  ;;  %v5866_v42 = vld [vmem:[%s7255_s3 + $0x54] ss:$8 sps:$4 sm:$0xff]  }
 0xf7d   : > { %5932 = vtanh.f32 %v3517_v63  ;;  %v5863_v63 = vld [vmem:[%s7255_s3 + $0x64] ss:$8 sps:$4 sm:$0xff]   ;;  %v5864_v3 = vld [vmem:[%s7255_s3 + $0x50] ss:$8 sps:$4 sm:$0xff]  }
 0xf7e   : > { %5934 = vtanh.f32 %v3516_v43  ;;  %v5869_v43 = vld [vmem:[%s7255_s3 + $0x44] ss:$8 sps:$4 sm:$0xff]  }
 0xf7f   : > { %5936 = vtanh.f32 %v3518_v10  ;;  %v5867_v10 = vld [vmem:[%s7255_s3 + $0x40] ss:$8 sps:$4 sm:$0xff]  }
 0xf89   : > { %v5931_v48 = vpop.eup %5930 }
 0xf8a   : > { %v5933_v2 = vpop.eup %5932  ;;  %v3523_v16 = vadd.f32 1.0, %v5931_v48  ;;  %v5872_v48 = vld [vmem:[%s7255_s3 + $0x34] ss:$8 sps:$4 sm:$0xff]  }
 0xf8b   : > { %v5935_v21 = vpop.eup %5934  ;;  %v3525_v58 = vadd.f32 1.0, %v5933_v2  ;;  %v5875_v2 = vld [vmem:[%s7255_s3 + $0x24] ss:$8 sps:$4 sm:$0xff]  }
 0xf8c   : > { %v5937_v59 = vpop.eup %5936  ;;  %v3524_v4 = vadd.f32 1.0, %v5935_v21  ;;  %v3527_v23 = vmul.f32 0.5, %v3523_v16  ;;  %v5873_v16 = vld [vmem:[%s7255_s3 + $0x20] ss:$8 sps:$4 sm:$0xff]   ;;  %v5878_v21 = vld [vmem:[%s7255_s3 + $0x14] ss:$8 sps:$4 sm:$0xff]  }
 0xf8d   : > { %v3526_v51 = vadd.f32 1.0, %v5937_v59  ;;  %v3529_v53 = vmul.f32 0.5, %v3525_v58  ;;  %v5876_v58 = vld [vmem:[%s7255_s3 + $0x10] ss:$8 sps:$4 sm:$0xff]   ;;  %v5881_v59 = vld [vmem:[%s7255_s3 + $0x4] ss:$8 sps:$4 sm:$0xff]  }
 0xf8e   : > { %v3528_v55 = vmul.f32 0.5, %v3524_v4  ;;  %v3531_v60 = vmul.f32 %v3527_v23, %v3452_v18  ;;  %v5850_v18 = vld [vmem:[%s7253_s2 + $0x18] sm:$0xff]   ;;  %v5879_v4 = vld [vmem:[%s7255_s3] ss:$8 sps:$4 sm:$0xff]  }
 0xf8f   : > { %v3530_v57 = vmul.f32 0.5, %v3526_v51  ;;  %v3533_v62 = vmul.f32 %v3529_v53, %v3493_v19  ;;  %v5851_v19 = vld [vmem:[%s7254_s8 + $0x18] sm:$0xff]  }
 0xf90   : > { %v3532_v61 = vmul.f32 %v3528_v55, %v3454_v27  ;;  %v3599_v8 = vpack.c.bf16 %v3531_v60, %v3531_v60  ;;  %v5856_v27 = vld [vmem:[%s7253_s2] sm:$0xff]   ;;  %s6925_s2 = sshll.u32 %s6743_s22, 3 }
 0xf91   : > { %v3534_v0 = vmul.f32 %v3530_v57, %v3495_v28  ;;  %v3601_v9 = vpack.c.bf16 %v3533_v62, %v3533_v62  ;;  %v5857_v28 = vld [vmem:[%s7254_s8] sm:$0xff]   ;;  %s7179_s8 = scalar_lea.vmem [#allocation6], %s6925_s2 }
 0xf92   : > { %v3600_v5 = vpack.c.bf16 %v3532_v61, %v3532_v61 }
 0xf93   : > { %v3602_v7 = vpack.c.bf16 %v3534_v0, %v3534_v0 }
 0xf94   : > { %3827 = vmatprep.mubr.bf16.mxu1 %v3600_v5 }
 0xf95   : > { %3867 = vmatprep.mubr.bf16.mxu0 %v3602_v7  ;;  %3828 = vmatmul.mubr.bf16.vlgmr.msra.gmra.mxu1 %v3599_v8 }
 0xf96   : > { %3868 = vmatmul.mubr.bf16.vlgmr.msra.gmra.mxu0 %v3601_v9  ;;  %5414 = vmatpush3.bf16.msra.mxu1 %v5842_v6 }
 0xf97   : > { %5434 = vmatpush3.bf16.msra.mxu0 %v5843_v17  ;;  %5415 = vmatprep.subr.bf16.mxu1 %v6161_v1 }
 0xf98   : > { %5435 = vmatprep.subr.bf16.mxu0 %v6161_v1  ;;  %5429 = vmatprep.mubr.msk.bf16.mxu1 %vm6162_vm0, %v6161_v1 }
 0xf99   : > { %5449 = vmatprep.mubr.msk.bf16.mxu0 %vm6162_vm0, %v6161_v1 }
 0xf9a   : > { %5416 = vmatpush3.bf16.msra.mxu1 %v5844_v11 }
 0xf9b   : > { %5436 = vmatpush3.bf16.msra.mxu0 %v5845_v12  ;;  %5417 = vmatprep.subr.bf16.mxu1 %v6161_v1 }
 0xf9c   : > { %5437 = vmatprep.subr.bf16.mxu0 %v6161_v1 }
 0xf9e   : > { %5418 = vmatpush3.bf16.msra.mxu1 %v5846_v13 }
 0xf9f   : > { %5438 = vmatpush3.bf16.msra.mxu0 %v5847_v56  ;;  %5419 = vmatprep.subr.bf16.mxu1 %v6161_v1 }
 0xfa0   : > { %5439 = vmatprep.subr.bf16.mxu0 %v6161_v1 }
 0xfa2   : > { %5420 = vmatpush3.bf16.msra.mxu1 %v5848_v14 }
 0xfa3   : > { %5440 = vmatpush3.bf16.msra.mxu0 %v5849_v15  ;;  %5421 = vmatprep.subr.bf16.mxu1 %v6161_v1 }
 0xfa4   : > { %5441 = vmatprep.subr.bf16.mxu0 %v6161_v1 }
 0xfa6   : > { %5422 = vmatpush3.bf16.msra.mxu1 %v5850_v18 }
 0xfa7   : > { %5442 = vmatpush3.bf16.msra.mxu0 %v5851_v19  ;;  %5423 = vmatprep.subr.bf16.mxu1 %v6161_v1 }
 0xfa8   : > { %5443 = vmatprep.subr.bf16.mxu0 %v6161_v1 }
 0xfaa   : > { %5424 = vmatpush3.bf16.msra.mxu1 %v5852_v20 }
 0xfab   : > { %5444 = vmatpush3.bf16.msra.mxu0 %v5853_v24  ;;  %5425 = vmatprep.subr.bf16.mxu1 %v6161_v1 }
 0xfac   : > { %5445 = vmatprep.subr.bf16.mxu0 %v6161_v1 }
 0xfae   : > { %5426 = vmatpush3.bf16.msra.mxu1 %v5854_v25  ;;  %v5882_v25 = vld [vmem:[%s7257_s9 + $0x38] sm:$0xff]  }
 0xfaf   : > { %5446 = vmatpush3.bf16.msra.mxu0 %v5855_v26  ;;  %5427 = vmatprep.subr.bf16.mxu1 %v6161_v1  ;;  %v5883_v26 = vld [vmem:[%s7257_s9 + $0x30] sm:$0xff]  }
 0xfb0   : > { %5447 = vmatprep.subr.bf16.mxu0 %v6161_v1 }
 0xfb2   : > { %5428 = vmatpush3.bf16.msra.mxu1 %v5856_v27  ;;  %v5884_v27 = vld [vmem:[%s7257_s9 + $0x28] sm:$0xff]  }
 0xfb3   : > { %5448 = vmatpush3.bf16.msra.mxu0 %v5857_v28  ;;  %4197 = vmatprep.subr.bf16.mxu1 %v5860_v45  ;;  %v5885_v28 = vld [vmem:[%s7257_s9 + $0x20] sm:$0xff]   ;;  %v5886_v45 = vld [vmem:[%s7257_s9 + $0x18] sm:$0xff]  }
 0xfb4   : > { %5465 = vmatprep.subr.bf16.mxu0 %v6161_v1 }
0x1055   : > { %v5210_v29 = vpop.f32.mrf.mxu1 }
0x1056   : > { %v5232_v30 = vpop.f32.mrf.mxu0 }
0x1057   : > { %v5211_v46 = vpop.f32.mrf.mxu1 }
0x1058   : > { %v5212_v31 = vadd.f32 %v5211_v46, %v5210_v29  ;;  %v5233_v32 = vpop.f32.mrf.mxu0  ;;  %v5887_v29 = vld [vmem:[%s7257_s9 + $0x10] sm:$0xff]  }
0x1059   : > { %v5234_v49 = vadd.f32 %v5233_v32, %v5232_v30  ;;  %v5213_v33 = vpop.f32.mrf.mxu1  ;;  %v5888_v30 = vld [vmem:[%s7257_s9 + $0x8] sm:$0xff]  }
0x105a   : > { %v5235_v44 = vpop.f32.mrf.mxu0  ;;  %v5889_v33 = vld [vmem:[%s7257_s9] sm:$0xff]   ;;  %s1160_s9 = scalar_lea.vmem [#allocation7], %s6925_s2 }
0x105b   : > { %v3870_v50 = vadd.f32 %v5234_v49, %v5212_v31  ;;  %v5214_v34 = vpop.f32.mrf.mxu1  ;;  %s4552_s17 = sshll.u32 %s1160_s9, 4  ;;  %s4553_s17 = int_to_ptr.vmem [resolvable:$true] %s4552_s17 }
0x105c   : > { %v5236_v36 = vpop.f32.mrf.mxu0  ;;  %p5957_p0 = scmp.lt.s32.totalorder %s4553_s17, %s5955_s23 }
0x105d   : > { %v3875_v37 = vadd.f32 %v3870_v50, %v6807_v39  ;;  %v5861_v39 = vld [vmem:[%s7255_s3 + $0x60] ss:$8 sps:$4 sm:$0xff]  }
0x105f   : > { %v6929_v38 = vadd.f32 %v5027_v35, %v3875_v37 }
0x1061   : > { %v3901_v22 = vpack.c.bf16 %v6929_v38, %v6929_v38  ;;  %3884 = vst [vmem:[%s7179_s8] sm:$0xff] %v6929_v38  ;;  %s7258_s8 = sshll.u32 %s6743_s22, 4 }
0x1063   : > { %5430 = vmatmul.mubr.bf16.vlgmr.msra.gmra.mxu1 %v3901_v22  ;;  %5450 = vmatmul.mubr.bf16.vlgmr.msra.gmra.mxu0 %v3901_v22 }
0x1064   : > { %4198 = vmatpush1.bf16.msra.mxu1 %v5858_v40  ;;  %4229 = vmatprep.mubr.bf16.mxu1 %v6163_v47  ;;  %v5870_v47 = vld [vmem:[%s7255_s3 + $0x30] ss:$8 sps:$4 sm:$0xff]   ;;  %s6996_s3 = scalar_lea.vmem [#allocation4], %s7258_s8  ;;  %s5950_s8 = scalar_lea.vmem %s4553_s17, 128 }
0x1065   : > { %4199 = vmatprep.subr.bf16.mxu1 %v5863_v63  ;;  %5481 = vmatprep.mubr.msk.bf16.mxu0 %vm6162_vm0, %v6161_v1  ;;  %v2679_v63 = vmul.f32 %v6782_v52, %v6782_v52  ;;  %p5951_p11 = scmp.ne.s32.totalorder %s4553_s17, %s5950_s8  ;;  %p5958_p1 = scmp.lt.s32.totalorder %s5956_s24, %s5950_s8 }
0x1066   : > { %5466 = vmatpush3.bf16.msra.mxu0 %v5882_v25 }
0x1067   : > { %5467 = vmatprep.subr.bf16.mxu0 %v6161_v1  ;;  %p5952_p12 = pnand %p5951_p11, %p6406_p5  ;;  %p5959_p2 = por %p5958_p1, %p5957_p0 }
0x1068   : > { %4200 = vmatpush1.bf16.msra.mxu1 %v5861_v39 }
0x1069   : > { %4201 = vmatprep.subr.bf16.mxu1 %v5866_v42  ;;  %p5953_p13 = pneg %p5952_p12 }
0x106a   : > { %5468 = vmatpush3.bf16.msra.mxu0 %v5883_v26 }
0x106b   : > { %5469 = vmatprep.subr.bf16.mxu0 %v6161_v1  ;;  %p5960_p3 = pnand %p5959_p2, %p5953_p13 }
0x106c   : > { %4202 = vmatpush1.bf16.msra.mxu1 %v5864_v3 }
0x106d   : > { %4203 = vmatprep.subr.bf16.mxu1 %v5869_v43 }
0x106e   : > { %5470 = vmatpush3.bf16.msra.mxu0 %v5884_v27 }
0x106f   : > { %5471 = vmatprep.subr.bf16.mxu0 %v6161_v1 }
0x1070   : > { %4204 = vmatpush1.bf16.msra.mxu1 %v5867_v10 }
0x1071   : > { %4205 = vmatprep.subr.bf16.mxu1 %v5872_v48 }
0x1072   : > { %5472 = vmatpush3.bf16.msra.mxu0 %v5885_v28 }
0x1073   : > { %5473 = vmatprep.subr.bf16.mxu0 %v6161_v1 }
0x1074   : > { %4206 = vmatpush1.bf16.msra.mxu1 %v5870_v47 }
0x1075   : > { %4207 = vmatprep.subr.bf16.mxu1 %v5875_v2 }
0x1076   : > { %5474 = vmatpush3.bf16.msra.mxu0 %v5886_v45 }
0x1077   : > { %5475 = vmatprep.subr.bf16.mxu0 %v6161_v1 }
0x1078   : > { %4208 = vmatpush1.bf16.msra.mxu1 %v5873_v16 }
0x1079   : > { %4209 = vmatprep.subr.bf16.mxu1 %v5878_v21  ;;  %v2680_v21 = vmul.f32 %v6784_v54, %v6784_v54 }
0x107a   : > { %5476 = vmatpush3.bf16.msra.mxu0 %v5887_v29 }
0x107b   : > { %5477 = vmatprep.subr.bf16.mxu0 %v6161_v1 }
0x107c   : > { %4210 = vmatpush1.bf16.msra.mxu1 %v5876_v58 }
0x107d   : > { %4211 = vmatprep.subr.bf16.mxu1 %v5881_v59 }
0x107e   : > { %5478 = vmatpush3.bf16.msra.mxu0 %v5888_v30 }
0x107f   : > { %5479 = vmatprep.subr.bf16.mxu0 %v6161_v1 }
0x1080   : > { %4212 = vmatpush1.bf16.msra.mxu1 %v5879_v4 }
0x1081   : > { %5453 = vmatprep.subr.bf16.mxu1 %v6161_v1 }
0x1082   : > { %5480 = vmatpush3.bf16.msra.mxu0 %v5889_v33 }
0x1083   : > { %4230 = vmatmul.mubr.bf16.vlgmr.msra.gmra.mxu1 %v6756_v41 }
0x1084   : > { %5455 = vmatprep.mubr.msk.bf16.mxu1 %vm6162_vm0, %v6161_v1 }
0x1123   : > { %v6959_v23 = vpop.f32.mrf.mxu1  ;;  %v4095_v51 = vpop.f32.mrf.mxu0 }
0x1124   : > { %v4256_v8 = vpack.c.bf16 %v4095_v51, %v4095_v51  ;;  %v3990_v42 = vmul.f32 %v6959_v23, %v6959_v23 }
0x1125   : > { %v5431_v53 = vpop.f32.mrf.mxu1  ;;  %v5451_v55 = vpop.f32.mrf.mxu0 }
0x1127   : > { %v3987_v57 = vpop.f32.mrf.mxu1  ;;  %v4098_v60 = vpop.f32.mrf.mxu0 }
0x1129   : > { %v5432_v61 = vpop.f32.mrf.mxu1  ;;  %v5452_v62 = vpop.f32.mrf.mxu0 }
0x1143   : > { %v4231_v0 = vpop.f32.mrf.mxu1 }
0x1145   : > { %v4233_v5 = vpop.f32.mrf.mxu1 }
0x1147   : > { %v4235_v6 = vpop.f32.mrf.mxu1 }
0x1148   : > { %v4257_v7 = vpack.c.bf16 %v4235_v6, %v4231_v0 }
0x1149   : > { %v4237_v41 = vpop.f32.mrf.mxu1 }
0x114a   : > { %5454 = vmatpush3.bf16.xpose.msra.mxu1 %v4257_v7  ;;  %v4311_v17 = vpack.c.bf16 %v4237_v41, %v4233_v5 }
0x114b   : > { %5459 = vmatprep.subr.bf16.mxu1 %v6161_v1 }
0x1151   : > { %5456 = vmatmul.mubr.bf16.vlgmr.msra.gmra.mxu1 %v4256_v8 }
0x1152   : > { %5460 = vmatpush3.bf16.msra.mxu1 %v4311_v17  ;;  %5461 = vmatprep.mubr.msk.bf16.mxu1 %vm6162_vm0, %v6161_v1 }
0x1211   : > { %v4292_v9 = vpop.f32.mrf.mxu1 }
0x1212   : > { %v4298_v11 = vmul.f32 0.088388346, %v4292_v9 }
0x1213   : > { %v5457_v12 = vpop.f32.mrf.mxu1 }
0x1214   : > { %v4299_v13 = vsel %vm1644_vm1, %v4298_v11, -inf }
0x1215   : > { %4300 = vmax.xlane.f32.xlu0 %v4299_v13  ;;  %v4295_v56 = vpop.f32.mrf.mxu1 }
0x1217   : > { %v5458_v14 = vpop.f32.mrf.mxu1 }
0x129e   : > { %v4301_v15 = vpop.xlane.xlu0 %4300 }
0x129f   : > { %v4302_v18 = vsub.f32 %v4298_v11, %v4301_v15 }
0x12a1   : > { %v4303_v19 = vmul.f32 1.442695, %v4302_v18 }
0x12a3   : > { %5938 = vpow2.f32 %v4303_v19 }
0x12b0   : > { %v5939_v20 = vpop.eup %5938 }
0x12b1   : > { %v4305_v24 = vsel %vm1644_vm1, %v5939_v20, 0.0 }
0x12b2   : > { %4306 = vadd.xlane.f32.xlu1 %v4305_v24 }
0x133b   : > { %v4307_v46 = vpop.xlane.xlu1 %4306 }
0x133c   : > { %5940 = vrcp.f32 %v4307_v46 }
0x1349   : > { %v5941_v31 = vpop.eup %5940 }
0x134a   : > { %v4309_v32 = vmul.f32 %v5941_v31, %v5939_v20 }
0x134c   : > { %v4310_v49 = vpack.c.bf16 %v4309_v32, %v4309_v32 }
0x134e   : > { %5462 = vmatmul.mubr.msk.bf16.vlgmr.msra.gmra.mxu1 %vm1644_vm1, %v4310_v49 }
0x140e   : > { %v4349_v44 = vpop.f32.mrf.mxu1 }
0x140f   : > { %v4355_v50 = vpack.c.bf16 %v4349_v44, %v4349_v44 }
0x1410   : > { %v5463_v34 = vpop.f32.mrf.mxu1 }
0x1411   : > { %5482 = vmatmul.mubr.bf16.vlgmr.msra.gmra.mxu0 %v4355_v50 }
0x1412   : > { %v4352_v35 = vpop.f32.mrf.mxu1 }
0x1414   : > { %v5464_v36 = vpop.f32.mrf.mxu1 }
0x14d1   : > { %v4438_v37 = vpop.f32.mrf.mxu0 }
0x14d2   : > { %v4444_v40 = vadd.f32 %v4438_v37, %v6929_v38 }
0x14d3   : > { %v5483_v22 = vpop.f32.mrf.mxu0 }
0x14d4   : > { %4447 = vadd.xlane.f32.xlu0 %v4444_v40 }
0x14d5   : > { %v4441_v1 = vpop.f32.mrf.mxu0 }
0x14d7   : > { %v5484_v39 = vpop.f32.mrf.mxu0 }
0x14d8   : > { %2681 = vadd.xlane.f32.xlu0 %v2679_v63 }
0x14dc   : > { %3991 = vadd.xlane.f32.xlu0 %v3990_v42 }
0x155d   : > { %v4448_v3 = vpop.xlane.xlu0 %4447 }
0x155e   : > { %v4449_v43 = vmul.f32 0.0078125, %v4448_v3 }
0x1560   : > { %v6987_v10 = vsub.f32 %v4444_v40, %v4449_v43 }
0x1561   : > { %v2682_v48 = vpop.xlane.xlu0 %2681 }
0x1562   : > { %v2685_v38 = vadd.f32 1e-12, %v2682_v48  ;;  %v4451_v47 = vmul.f32 %v6987_v10, %v6987_v10 }
0x1564   : > { %5942 = vrsqrt.f32 %v2685_v38  ;;  %4452 = vadd.xlane.f32.xlu1 %v4451_v47 }
0x1565   : > { %v3992_v2 = vpop.xlane.xlu0 %3991 }
0x1566   : > { %v3993_v16 = vadd.f32 1e-12, %v3992_v2 }
0x1568   : > { %5944 = vrsqrt.f32 %v3993_v16  ;;  %2683 = vadd.xlane.f32.xlu1 %v2680_v21 }
0x1571   : > { %v5943_v58 = vpop.eup %5942 }
0x1572   : > { %v2689_v59 = vmul.f32 %v5943_v58, %v6782_v52 }
0x1574   : > { %2691 = vst [vmem:[%s6996_s3] sm:$0xff] %v2689_v59 }
0x1575   : > { %v5945_v4 = vpop.eup %5944 }
0x1576   : > { %v3995_v51 = vmul.f32 %v5945_v4, %v6959_v23 }
0x1578   : > { %3996 = vst [vmem:[%s1160_s9] sm:$0xff] %v3995_v51 }
0x1579   : > { %5963 = shalt.err (!%p5960_p3)
}
0x157a   : > { %s5964_s13 = scalar_lea.hbm %s4550_s16, 128  ;;  %s5968_s9 = scalar_lea.hbm %s7226_s27, 256 }
0x157b   : > { %p5965_p4 = scmp.ne.s32.totalorder %s4550_s16, %s5964_s13  ;;  %p5969_p9 = scmp.lt.s32.totalorder %s4550_s16, %s7226_s27 }
0x157c   : > { %p5970_p10 = scmp.lt.s32.totalorder %s5968_s9, %s5964_s13 }
0x157d   : > { %p5966_p7 = pnand %p5965_p4, %p6406_p5 }
0x157e   : > { %p5971_p11 = por %p5970_p10, %p5969_p9 }
0x157f   : > { %p5967_p8 = pneg %p5966_p7 }
0x1581   : > { %p5972_p12 = pnand %p5971_p11, %p5967_p8 }
0x1583   : > { %5975 = shalt.err (!%p5972_p12)
}
0x1584   : > { %s7259_s21 = sld [smem:[#allocation44_spill]]  ;;  %s7260_s24 = sshll.u32 %s6387_s0, 8 }
0x1585   : > { %5488 = dma.vmem_to_hbm [thread:$0]  (%p6406_p5), %s4553_s17, 128, %s4550_s16, %s7010_s19  }
0x1586   : > { %s4507_s8 = sshll.u32 %s6750_s5, 4  ;;  %s4474_s13 = scalar_lea.sflag [#allocation3], %s6743_s22  ;;  %s7027_s8 = int_to_ptr.vmem [resolvable:$true] %s4507_s8 }
0x1587   : > { %s5976_s9 = scalar_lea.vmem %s7027_s8, 256  ;;  %s6165_s12 = smov [#allocation2]  }
0x1588   : > { %p5977_p13 = scmp.ne.s32.totalorder %s7027_s8, %s5976_s9  ;;  %s5980_s25 = sshll.u32 %s6165_s12, 4  ;;  %s5981_s25 = int_to_ptr.vmem [resolvable:$false] %s5980_s25 }
0x1589   : > { %s5982_s27 = scalar_lea.vmem %s5981_s25, 512  ;;  %p5983_p2 = scmp.lt.s32.totalorder %s7027_s8, %s5981_s25 }
0x158a   : > { %s7024_s23 = scalar_lea.hbm %s7259_s21, %s7260_s24  ;;  %p5978_p0 = pnand %p5977_p13, %p6406_p5 }
0x158b   : > { %p5984_p3 = scmp.lt.s32.totalorder %s5982_s27, %s5976_s9 }
0x158c   : > { %p5979_p1 = pneg %p5978_p0 }
0x158d   : > { %p5985_p4 = por %p5984_p3, %p5983_p2 }
0x158f   : > { %p5986_p7 = pnand %p5985_p4, %p5979_p1 }
0x1591   : > { %5989 = shalt.err (!%p5986_p7)
}
0x1592   : > { %s5990_s5 = scalar_lea.hbm %s7024_s23, 256  ;;  %s5994_s17 = scalar_lea.hbm %s7259_s21, 512 }
0x1593   : > { %p5991_p8 = scmp.ne.s32.totalorder %s7024_s23, %s5990_s5  ;;  %p5995_p11 = scmp.lt.s32.totalorder %s7024_s23, %s7259_s21 }
0x1594   : > { %p5996_p12 = scmp.lt.s32.totalorder %s5994_s17, %s5990_s5 }
0x1595   : > { %p5992_p9 = pnand %p5991_p8, %p6406_p5 }
0x1596   : > { %p5997_p13 = por %p5996_p12, %p5995_p11 }
0x1597   : > { %p5993_p10 = pneg %p5992_p9 }
0x1599   : > { %p5998_p0 = pnand %p5997_p13, %p5993_p10 }
0x159b   : > { %6001 = shalt.err (!%p5998_p0)
}
0x159c   : > { %s7191_s25 = smov 128   ;;  %s7261_s12 = sld [smem:[#allocation42_spill]] }
0x159d   : > { %s7262_s27 = sld [smem:[#allocation43_spill]]  ;;  %s7192_s16 = smov 8  }
0x159e   : > { %5485 = dma.vmem_to_hbm [thread:$0]  (%p6406_p5), %s7027_s8, 256, %s7024_s23, %s4474_s13, %s7191_s25, %s7191_s25, %s7192_s16  }
0x159f   : > { %s4523_s24 = sshll.u32 %s6996_s3, 4  ;;  %s7263_s22 = scalar_lea.vmem [#allocation6], %s6925_s2  ;;  %s7066_s24 = int_to_ptr.vmem [resolvable:$true] %s4523_s24 }
0x15a0   : > { %s4539_s23 = sshll.u32 %s7263_s22, 4  ;;  %s7190_s8 = scalar_lea.vmem [#allocation9], %s6925_s2  ;;  %s7072_s23 = int_to_ptr.vmem [resolvable:$true] %s4539_s23 }
0x15a1   : > { %s4565_s13 = sshll.u32 %s7190_s8, 4  ;;  %s7264_s9 = sshll.u32 %s6387_s0, 8  ;;  %s7079_s13 = int_to_ptr.vmem [resolvable:$true] %s4565_s13 }
0x15a2   : > { %v5069_v61 = vld [vmem:[%s7261_s12] ss:$0 sm:$0xff]  ;;  %s7064_s5 = scalar_lea.hbm %s6349_s6, %s7264_s9  ;;  %s7070_s17 = scalar_lea.hbm %s6354_s20, %s7004_s14 }
0x15a3   : > { %v5070_v5 = vld [vmem:[%s7262_s27] ss:$0 sm:$0xff]  ;;  %s7077_s12 = scalar_lea.hbm %s6364_s4, %s7004_s14  ;;  %s7265_s27 = sand.u32 1, %s6387_s0  }
0x15a4   : > { %s7083_s22 = scalar_lea.sflag [#allocation5], %s7265_s27  ;;  %s6002_s9 = scalar_lea.vmem %s7066_s24, 256 }
0x15a5   : > { %p6003_p1 = scmp.ne.s32.totalorder %s7066_s24, %s6002_s9  ;;  %s6168_s8 = smov [#allocation4]  }
0x15a6   : > { %s6006_s25 = sshll.u32 %s6168_s8, 4  ;;  %s6007_s25 = int_to_ptr.vmem [resolvable:$false] %s6006_s25 }
0x15a7   : > { %p6004_p2 = pnand %p6003_p1, %p6406_p5  ;;  %s6008_s16 = scalar_lea.vmem %s6007_s25, 512 }
0x15a8   : > { %p6009_p4 = scmp.lt.s32.totalorder %s7066_s24, %s6007_s25  ;;  %p6010_p7 = scmp.lt.s32.totalorder %s6008_s16, %s6002_s9 }
0x15a9   : > { %p6005_p3 = pneg %p6004_p2 }
0x15aa   : > { %p6011_p8 = por %p6010_p7, %p6009_p4 }
0x15ac   : > { %p6012_p9 = pnand %p6011_p8, %p6005_p3 }
0x15ed   : > { %v4453_v52 = vpop.xlane.xlu1 %4452 }
0x15ee   : > { %v4454_v23 = vmul.f32 0.0078125, %v4453_v52 }
0x15f0   : > { %v4455_v53 = vadd.f32 1e-06, %v4454_v23 }
0x15f1   : > { %v2684_v55 = vpop.xlane.xlu1 %2683 }
0x15f2   : > { %5946 = vrsqrt.f32 %v4455_v53  ;;  %v2686_v57 = vadd.f32 1e-12, %v2684_v55 }
0x15f4   : > { %5948 = vrsqrt.f32 %v2686_v57 }
0x15ff   : > { %v5947_v60 = vpop.eup %5946 }
0x1600   : > { %v4457_v62 = vmul.f32 %v5947_v60, %v6987_v10 }
0x1601   : > { %v5949_v0 = vpop.eup %5948 }
0x1602   : > { %v2690_v6 = vmul.f32 %v5949_v0, %v6784_v54  ;;  %v4464_v7 = vmul.f32 %v5069_v61, %v4457_v62 }
0x1604   : > { %2692 = vst [vmem:[%s6996_s3 + $0x8] sm:$0xff] %v2690_v6  ;;  %v4471_v41 = vadd.f32 %v5070_v5, %v4464_v7 }
0x1605   : > { %6015 = shalt.err (!%p6012_p9)
}
0x1606   : > { %s6016_s3 = scalar_lea.hbm %s7064_s5, 256  ;;  %s6020_s14 = scalar_lea.hbm %s6349_s6, 512 }
0x1607   : > { %p6017_p10 = scmp.ne.s32.totalorder %s7064_s5, %s6016_s3  ;;  %p6021_p13 = scmp.lt.s32.totalorder %s7064_s5, %s6349_s6 }
0x1608   : > { %p6022_p0 = scmp.lt.s32.totalorder %s6020_s14, %s6016_s3 }
0x1609   : > { %p6018_p11 = pnand %p6017_p10, %p6406_p5 }
0x160a   : > { %p6023_p1 = por %p6022_p0, %p6021_p13 }
0x160b   : > { %p6019_p12 = pneg %p6018_p11 }
0x160d   : > { %p6024_p2 = pnand %p6023_p1, %p6019_p12 }
0x160f   : > { %6027 = shalt.err (!%p6024_p2)
}
0x1610   : > { %s7266_s0 = smov 8   ;;  %s7267_s25 = smov 128  }
0x1611   : > { %5486 = dma.vmem_to_hbm [thread:$0]  (%p6406_p5), %s7066_s24, 256, %s7064_s5, %s7083_s22, %s7267_s25, %s7267_s25, %s7266_s0  }
0x1612   : > { %s6028_s16 = scalar_lea.vmem %s7072_s23, 128  ;;  %s6169_s8 = smov [#allocation6]  }
0x1613   : > { %p6029_p3 = scmp.ne.s32.totalorder %s7072_s23, %s6028_s16  ;;  %s6032_s27 = sshll.u32 %s6169_s8, 4  ;;  %s6033_s27 = int_to_ptr.vmem [resolvable:$false] %s6032_s27 }
0x1614   : > { %s6034_s9 = scalar_lea.vmem %s6033_s27, 256  ;;  %p6035_p8 = scmp.lt.s32.totalorder %s7072_s23, %s6033_s27 }
0x1615   : > { %p6030_p4 = pnand %p6029_p3, %p6406_p5  ;;  %p6036_p9 = scmp.lt.s32.totalorder %s6034_s9, %s6028_s16 }
0x1617   : > { %p6031_p7 = pneg %p6030_p4  ;;  %p6037_p10 = por %p6036_p9, %p6035_p8 }
0x1619   : > { %p6038_p11 = pnand %p6037_p10, %p6031_p7 }
0x161b   : > { %6041 = shalt.err (!%p6038_p11)
}
0x161c   : > { %s6042_s24 = scalar_lea.hbm %s7070_s17, 128  ;;  %s6046_s5 = scalar_lea.hbm %s6354_s20, 256 }
0x161d   : > { %p6043_p12 = scmp.ne.s32.totalorder %s7070_s17, %s6042_s24  ;;  %p6047_p1 = scmp.lt.s32.totalorder %s7070_s17, %s6354_s20 }
0x161e   : > { %p6048_p2 = scmp.lt.s32.totalorder %s6046_s5, %s6042_s24 }
0x161f   : > { %p6044_p13 = pnand %p6043_p12, %p6406_p5 }
0x1620   : > { %p6049_p3 = por %p6048_p2, %p6047_p1 }
0x1621   : > { %p6045_p0 = pneg %p6044_p13 }
0x1623   : > { %p6050_p4 = pnand %p6049_p3, %p6045_p0 }
0x1625   : > { %6053 = shalt.err (!%p6050_p4)
}
0x1626   : > { %5487 = dma.vmem_to_hbm [thread:$0]  (%p6406_p5), %s7072_s23, 128, %s7070_s17, %s7083_s22  }
0x1627   : > { %s7268_s3 = scalar_lea.vmem [#allocation9], %s6925_s2  ;;  %s6054_s14 = scalar_lea.vmem %s7079_s13, 128 }
0x1628   : > { %4472 = vst [vmem:[%s7268_s3] sm:$0xff] %v4471_v41  ;;  %p6055_p7 = scmp.ne.s32.totalorder %s7079_s13, %s6054_s14  ;;  %s6170_s0 = smov [#allocation9]  }
0x1629   : > { %s6058_s25 = sshll.u32 %s6170_s0, 4  ;;  %s6059_s25 = int_to_ptr.vmem [resolvable:$false] %s6058_s25 }
0x162a   : > { %p6056_p8 = pnand %p6055_p7, %p6406_p5  ;;  %s6060_s16 = scalar_lea.vmem %s6059_s25, 256 }
0x162b   : > { %p6061_p10 = scmp.lt.s32.totalorder %s7079_s13, %s6059_s25  ;;  %p6062_p11 = scmp.lt.s32.totalorder %s6060_s16, %s6054_s14 }
0x162c   : > { %p6057_p9 = pneg %p6056_p8 }
0x162d   : > { %p6063_p12 = por %p6062_p11, %p6061_p10 }
0x162f   : > { %p6064_p13 = pnand %p6063_p12, %p6057_p9 }
0x1631   : > { %6067 = shalt.err (!%p6064_p13)
}
0x1632   : > { %s6068_s2 = scalar_lea.hbm %s7077_s12, 128  ;;  %s6072_s23 = scalar_lea.hbm %s6364_s4, 256 }
0x1633   : > { %p6069_p0 = scmp.ne.s32.totalorder %s7077_s12, %s6068_s2  ;;  %p6073_p3 = scmp.lt.s32.totalorder %s7077_s12, %s6364_s4 }
0x1634   : > { %p6074_p4 = scmp.lt.s32.totalorder %s6072_s23, %s6068_s2 }
0x1635   : > { %p6070_p1 = pnand %p6069_p0, %p6406_p5 }
0x1636   : > { %p6075_p7 = por %p6074_p4, %p6073_p3 }
0x1637   : > { %p6071_p2 = pneg %p6070_p1 }
0x1639   : > { %p6076_p8 = pnand %p6075_p7, %p6071_p2 }
0x163b   : > { %6079 = shalt.err (!%p6076_p8)
}
0x163c   : > { %5489 = dma.vmem_to_hbm [thread:$0]  (%p6406_p5), %s7079_s13, 128, %s7077_s12, %s7010_s19  }
0x163d PF: > { %p5511_p9 = scmp.ge.s32.totalorder %s6122_s15, 2  ;;  %s4577_s17 = sand.u32 1, %s6110_s7  }
0x163e   : > { %s4578_s22 = scalar_lea.sflag [#allocation3], %s4577_s17 }
0x163f   : > { %p5496_p10 = pnand %p5511_p9, %p6410_p6 }
0x1641   : > { %p5497_p11 = pneg %p5496_p10 }
0x1643   : > { %6097 = dma.done.wait (%p5497_p11), %s4578_s22, 256  }
0x1644   : > { %6099 = vsyncadd (%p5497_p11), %s4578_s22, 4294967040  ;;  %s7269_s8 = sadd.s32 4294967294, %s6122_s15  }
0x1645   : > { %s4586_s27 = sand.u32 1, %s7269_s8  }
0x1646   : > { %s4587_s28 = scalar_lea.sflag [#allocation5], %s4586_s27 }
0x1647   : > { %6101 = dma.done.wait (%p5497_p11), %s4587_s28, 384  }
0x1648   : > { %6103 = vsyncadd (%p5497_p11), %s4587_s28, 4294966912  ;;  %s4605_s9 = scalar_lea.sflag [#allocation8], %s4586_s27 }
0x1649   : > { %6105 = dma.done.wait (%p5497_p11), %s4605_s9, 256  }
0x164a   : > { %6107 = vsyncadd (%p5497_p11), %s4605_s9, 4294967040  ;;  %p92_p5 = scmp.ge.s32.totalorder %s6391_s18, 4   ;;  %s7270_s7 = smov %s6114_s10 }
0x164b   : > { %s7271_s10 = smov %s6118_s11  ;;  %s7272_s11 = smov %s6404_s26 }
0x164c   : > { %s7273_s15 = smov %s6391_s18  ;;  %94 = sbr.rel (!%p92_p5) target bundleno = 92 (0x5c), region = 291 }
0x1651   :  { %4619 = vsyncpa [#allocation3], 1 }
0x1652   :  { %4621 = vsyncpa [#allocation3 + $0x1], 1 }
0x1653   :  { %4622 = vsyncpa [#allocation5], 1 }
0x1654   :  { %4624 = vsyncpa [#allocation5 + $0x1], 1 }
0x1655   :  { %4625 = vsyncpa [#allocation8], 1 }
0x1656   :  { %4627 = vsyncpa [#allocation8 + $0x1], 1 }

</bundles_post_ra>
